<compile_context>
chip_gen: v5e
topology: v5e:2x2
jax: 0.10.0
libtpu: 0.0.40
codegen_flags: <defaults>
</compile_context>

<pallas_src>
import functools
import math

import jax
import jax.numpy as jnp
from jax.experimental import pallas as pl
from jax.experimental.pallas import tpu as pltpu


# ----------------------------------------------------------------------------
# fused encoder kernel (everything resident in VMEM, one grid step per group)
# ----------------------------------------------------------------------------
def _layer_norm(x, gamma, beta):
    # LayerNorm over the last (feature) axis, eps = 1e-5 (torch default)
    mu = jnp.mean(x, axis=-1, keepdims=True)
    var = jnp.mean((x - mu) ** 2, axis=-1, keepdims=True)
    return (x - mu) * jax.lax.rsqrt(var + 1e-5) * gamma + beta


def _encoder_kernel(x_ref, wewt_ref, web_ref, pos_ref,
                    wq_ref, wk_ref, wv_ref, wfc_ref,
                    g1_ref, b1_ref, wff1_ref, bff1_ref, wff2_ref, bff2_ref,
                    g2_ref, b2_ref, o_ref, *, heads, num_layers, seq_len, seqs):
    embed = wewt_ref.shape[0]
    scale = math.sqrt(embed)      # softmax 1/sqrt(E), applied to the scores

    # word encoding with lane-dense transposed weight: (M, 768) . (E, 768)^T
    h = jax.lax.dot_general(x_ref[...], wewt_ref[...],
                            (((1,), (1,)), ((), ())),
                            preferred_element_type=jnp.float32)      # (M, E)
    h = h + web_ref[...]
    # TODO(synk): torch `.long()` is int64; the int32 round-trip assumes
    # |val| < 2^31 (safe for the init scales used here).
    h = h.astype(jnp.int32).astype(jnp.float32)
    h = h + pos_ref[...]          # pos already tiled to (M, E) in the wrapper

    for l in range(num_layers):                              # static unroll (small L)
        attn = jnp.zeros_like(h)
        for hd in range(heads):                              # per-head weights: no lane slicing
            qh = jnp.dot(h, wq_ref[l, hd], preferred_element_type=jnp.float32)  # (M, dh)
            kh = jnp.dot(h, wk_ref[l, hd], preferred_element_type=jnp.float32)
            vh = jnp.dot(h, wv_ref[l, hd], preferred_element_type=jnp.float32)
            blocks = []
            for b in range(seqs):                            # per-sequence attention
                r = slice(b * seq_len, (b + 1) * seq_len)    # sublane-aligned rows
                s = jax.lax.dot_general(qh[r], kh[r], (((1,), (1,)), ((), ())),
                                        preferred_element_type=jnp.float32)     # (N, N)
                s = s / scale
                s = s - jnp.max(s, axis=-1, keepdims=True)
                p = jnp.exp(s)
                p = p / jnp.sum(p, axis=-1, keepdims=True)   # exact (matches torch.softmax)
                blocks.append(jnp.dot(p, vh[r], preferred_element_type=jnp.float32))
            oh = blocks[0] if seqs == 1 else jnp.concatenate(blocks, axis=0)     # (M, dh)
            # accumulate the output projection per head (row slice of fc weights)
            attn = attn + jnp.dot(oh, wfc_ref[l, hd], preferred_element_type=jnp.float32)

        # l1(attention + query), FFN(+ReLU), l2(x + y); dropout == identity (eval)
        x1 = _layer_norm(attn + h, g1_ref[l], b1_ref[l])
        y = jnp.dot(x1, wff1_ref[l], preferred_element_type=jnp.float32) + bff1_ref[l]
        y = jnp.maximum(y, 0.0)
        y = jnp.dot(y, wff2_ref[l], preferred_element_type=jnp.float32) + bff2_ref[l]
        h = _layer_norm(x1 + y, g2_ref[l], b2_ref[l])

    # per-sequence mean over tokens (dim=1 of the original (1, N, E) tensor)
    for b in range(seqs):
        o_ref[b:b + 1, :] = jnp.mean(h[b * seq_len:(b + 1) * seq_len, :],
                                     axis=0, keepdims=True)


# ----------------------------------------------------------------------------
# wrapper
# ----------------------------------------------------------------------------
def encoder_forward(x, mask, params, heads, groups=None):
    """x: (B, N, 768) -- batch of sequences, each processed exactly like the
    original module's (1, N, 768) forward. mask is ignored on purpose (the
    reference's masked_fill result is discarded). Returns (B, 1, E)."""
    del mask
    batch, n_tok, d_in = x.shape
    if groups is None:
        groups = 2 if batch % 2 == 0 else 1
    assert batch % groups == 0
    seqs = batch // groups                      # sequences per grid step
    rows = seqs * n_tok                         # sublane rows per grid step

    packed = params["packed"]
    num_layers, n_heads = packed["wq"].shape[:2]
    assert n_heads == heads
    embed = packed["we_wt"].shape[0]
    dh = embed // heads
    ffn = packed["wff1"].shape[2]

    x2 = x.reshape(batch * n_tok, d_in)
    pos = jnp.tile(params["pos_emb"][:n_tok], (seqs, 1))     # (rows, E), per-step const

    inputs = (
        x2, packed["we_wt"], packed["we_b"], pos,
        packed["wq"], packed["wk"], packed["wv"], packed["wfc"],
        packed["g1"], packed["b1"], packed["wff1"], packed["bff1"],
        packed["wff2"], packed["bff2"], packed["g2"], packed["b2"],
    )

    def whole(arr):
        # whole array resident in VMEM; same block index every step -> no re-DMA
        nd = arr.ndim
        return pl.BlockSpec(arr.shape, lambda g, _nd=nd: (0,) * _nd)

    in_specs = [
        pl.BlockSpec((rows, d_in), lambda g: (g, 0)),         # this group's rows
        whole(packed["we_wt"]), whole(packed["we_b"]),
        pl.BlockSpec((rows, embed), lambda g: (0, 0)),        # pos (per-step constant)
        whole(packed["wq"]), whole(packed["wk"]), whole(packed["wv"]),
        whole(packed["wfc"]),
        whole(packed["g1"]), whole(packed["b1"]),
        whole(packed["wff1"]), whole(packed["bff1"]),
        whole(packed["wff2"]), whole(packed["bff2"]),
        whole(packed["g2"]), whole(packed["b2"]),
    ]
    out_specs = pl.BlockSpec((None, seqs, embed), lambda g: (g, 0, 0))
    out_shape = jax.ShapeDtypeStruct((groups, seqs, embed), jnp.float32)

    # advisory cost hint so XLA schedules around this small custom call
    flops = 2 * batch * n_tok * d_in * embed                               # embedding
    flops += num_layers * (3 * 2 * batch * n_tok * embed * embed)          # q/k/v proj
    flops += num_layers * heads * batch * 4 * n_tok * n_tok * dh           # scores + p@v
    flops += num_layers * (2 * batch * n_tok * embed * embed)              # out proj
    flops += num_layers * (4 * batch * n_tok * embed * ffn)                # FFN
    transcendentals = num_layers * heads * batch * n_tok * n_tok           # exp
    bytes_accessed = sum(int(a.size) * a.dtype.itemsize for a in inputs)
    bytes_accessed += groups * seqs * embed * 4

    out = pl.pallas_call(
        functools.partial(_encoder_kernel, heads=heads, num_layers=num_layers,
                          seq_len=n_tok, seqs=seqs),
        grid=(groups,),
        in_specs=in_specs,
        out_specs=out_specs,
        out_shape=out_shape,
        compiler_params=pltpu.CompilerParams(dimension_semantics=("parallel",)),
        cost_estimate=pl.CostEstimate(flops=int(flops),
                                      transcendentals=int(transcendentals),
                                      bytes_accessed=int(bytes_accessed)),
    )(*inputs)
    return out.reshape(batch, 1, embed)


# ----------------------------------------------------------------------------
# parameter construction / packing
# ----------------------------------------------------------------------------
def pack_params(params, embed, heads):
    dh = embed // heads
    layers = params["layers"]

    def stack(fn):
        return jnp.stack([fn(lp) for lp in layers], axis=0)

    def cols_per_head(w):     # (E, E) -> (heads, E, dh): split output features per head
        return jnp.transpose(w.reshape(embed, heads, dh), (1, 0, 2))

    def rows_per_head(w):     # (E, E) -> (heads, dh, E): split input features per head
        return w.reshape(heads, dh, embed)

    return {
        "we_wt": jnp.transpose(params["we_w"]),               # (E, 768): lane-dense
        "we_b": params["we_b"],                                # (1, E)
        "wq": stack(lambda lp: cols_per_head(lp["wq"])),       # (L, H, E, dh)
        "wk": stack(lambda lp: cols_per_head(lp["wk"])),
        "wv": stack(lambda lp: cols_per_head(lp["wv"])),
        "wfc": stack(lambda lp: rows_per_head(lp["wfc"])),     # (L, H, dh, E)
        "g1": stack(lambda lp: lp["g1"]),                      # (L, 1, E)
        "b1": stack(lambda lp: lp["b1"]),
        "wff1": stack(lambda lp: lp["wff1"]),                  # (L, E, F)
        "bff1": stack(lambda lp: lp["bff1"]),                  # (L, 1, F)
        "wff2": stack(lambda lp: lp["wff2"]),                  # (L, F, E)
        "bff2": stack(lambda lp: lp["bff2"]),                  # (L, 1, E)
        "g2": stack(lambda lp: lp["g2"]),
        "b2": stack(lambda lp: lp["b2"]),
    }


def init_params(key, *, d_in, embed, heads, expansion, num_layers, max_length):
    def nrm(k, shape, scale):
        return scale * jax.random.normal(k, shape, jnp.float32)

    keys = jax.random.split(key, 4 + num_layers)
    params = {
        "we_w": nrm(keys[0], (d_in, embed), 0.05),
        "we_b": nrm(keys[1], (1, embed), 0.05),
        "pos_emb": nrm(keys[2], (max_length, embed), 1.0),
        "layers": [],
    }
    for li in range(num_layers):
        lk = jax.random.split(keys[4 + li], 8)
        params["layers"].append({
            "wv": nrm(lk[0], (embed, embed), 0.1),
            "wk": nrm(lk[1], (embed, embed), 0.1),
            "wq": nrm(lk[2], (embed, embed), 0.1),
            "wfc": nrm(lk[3], (embed, embed), 0.1),
            "g1": jnp.ones((1, embed), jnp.float32),
            "b1": jnp.zeros((1, embed), jnp.float32),
            "wff1": nrm(lk[4], (embed, embed * expansion), 0.1),
            "bff1": nrm(lk[5], (1, embed * expansion), 0.05),
            "wff2": nrm(lk[6], (embed * expansion, embed), 0.1),
            "bff2": nrm(lk[7], (1, embed), 0.05),
            "g2": jnp.ones((1, embed), jnp.float32),
            "b2": jnp.zeros((1, embed), jnp.float32),
        })
    params["packed"] = pack_params(params, embed, heads)
    return params


if __name__ == "__main__":
    SEQ, D_IN, EMBED, HEADS, EXPANSION, NUM_LAYERS, MAX_LEN = 8, 768, 32, 4, 2, 2, 16
    BATCH, GROUPS = 4, 2    # 2 groups x 2 sequences: "parallel" axis feeds both v7x TCs

    key = jax.random.PRNGKey(0)
    k_param, k_x = jax.random.split(key)
    params = init_params(k_param, d_in=D_IN, embed=EMBED, heads=HEADS,
                         expansion=EXPANSION, num_layers=NUM_LAYERS,
                         max_length=MAX_LEN)

    x = jax.random.normal(k_x, (BATCH, SEQ, D_IN), jnp.float32)
    mask = jnp.ones((BATCH, SEQ, SEQ), jnp.float32)   # unused (no-op in reference)

    fwd = jax.jit(functools.partial(encoder_forward, heads=HEADS, groups=GROUPS))
    out = fwd(x, mask, params)
    out = jax.block_until_ready(out)
    assert out.shape == (BATCH, 1, EMBED), out.shape
    assert jnp.all(jnp.isfinite(out))
    print("KERNEL_OK")
</pallas_src>

<mosaic_0001>
module attributes {stable_mosaic.version = 11 : i64} {
  func.func @_encoder_kernel(%arg0: i32, %arg1: memref<16x768xf32, #tpu.memory_space<vmem>>, %arg2: memref<32x768xf32, #tpu.memory_space<vmem>>, %arg3: memref<1x32xf32, #tpu.memory_space<vmem>>, %arg4: memref<16x32xf32, #tpu.memory_space<vmem>>, %arg5: memref<2x4x32x8xf32, #tpu.memory_space<vmem>>, %arg6: memref<2x4x32x8xf32, #tpu.memory_space<vmem>>, %arg7: memref<2x4x32x8xf32, #tpu.memory_space<vmem>>, %arg8: memref<2x4x8x32xf32, #tpu.memory_space<vmem>>, %arg9: memref<2x1x32xf32, #tpu.memory_space<vmem>>, %arg10: memref<2x1x32xf32, #tpu.memory_space<vmem>>, %arg11: memref<2x32x64xf32, #tpu.memory_space<vmem>>, %arg12: memref<2x1x64xf32, #tpu.memory_space<vmem>>, %arg13: memref<2x64x32xf32, #tpu.memory_space<vmem>>, %arg14: memref<2x1x32xf32, #tpu.memory_space<vmem>>, %arg15: memref<2x1x32xf32, #tpu.memory_space<vmem>>, %arg16: memref<2x1x32xf32, #tpu.memory_space<vmem>>, %arg17: memref<1x2x32xf32, #tpu.memory_space<vmem>>) attributes {dimension_semantics = [#tpu.dimension_semantics<parallel>], iteration_bounds = array<i64: 2>, scalar_prefetch = 0 : i64, scratch_operands = 0 : i64, tpu.core_type = #tpu.core_type<tc>, window_params = [{transform_indices = @transform_0, window_bounds = array<i64: 16, 768>}, {pipeline_mode = #tpu.pipeline_mode<synchronous>, transform_indices = @transform_1, window_bounds = array<i64: 32, 768>}, {pipeline_mode = #tpu.pipeline_mode<synchronous>, transform_indices = @transform_2, window_bounds = array<i64: 1, 32>}, {pipeline_mode = #tpu.pipeline_mode<synchronous>, transform_indices = @transform_3, window_bounds = array<i64: 16, 32>}, {pipeline_mode = #tpu.pipeline_mode<synchronous>, transform_indices = @transform_4, window_bounds = array<i64: 2, 4, 32, 8>}, {pipeline_mode = #tpu.pipeline_mode<synchronous>, transform_indices = @transform_5, window_bounds = array<i64: 2, 4, 32, 8>}, {pipeline_mode = #tpu.pipeline_mode<synchronous>, transform_indices = @transform_6, window_bounds = array<i64: 2, 4, 32, 8>}, {pipeline_mode = #tpu.pipeline_mode<synchronous>, transform_indices = @transform_7, window_bounds = array<i64: 2, 4, 8, 32>}, {pipeline_mode = #tpu.pipeline_mode<synchronous>, transform_indices = @transform_8, window_bounds = array<i64: 2, 1, 32>}, {pipeline_mode = #tpu.pipeline_mode<synchronous>, transform_indices = @transform_9, window_bounds = array<i64: 2, 1, 32>}, {pipeline_mode = #tpu.pipeline_mode<synchronous>, transform_indices = @transform_10, window_bounds = array<i64: 2, 32, 64>}, {pipeline_mode = #tpu.pipeline_mode<synchronous>, transform_indices = @transform_11, window_bounds = array<i64: 2, 1, 64>}, {pipeline_mode = #tpu.pipeline_mode<synchronous>, transform_indices = @transform_12, window_bounds = array<i64: 2, 64, 32>}, {pipeline_mode = #tpu.pipeline_mode<synchronous>, transform_indices = @transform_13, window_bounds = array<i64: 2, 1, 32>}, {pipeline_mode = #tpu.pipeline_mode<synchronous>, transform_indices = @transform_14, window_bounds = array<i64: 2, 1, 32>}, {pipeline_mode = #tpu.pipeline_mode<synchronous>, transform_indices = @transform_15, window_bounds = array<i64: 2, 1, 32>}, {transform_indices = @transform_16, window_bounds = array<i64: 1, 2, 32>}]} {
    %c0 = arith.constant 0 : index
    %c0_0 = arith.constant 0 : index
    %0 = vector.load %arg1[%c0, %c0_0] : memref<16x768xf32, #tpu.memory_space<vmem>>, vector<16x768xf32>
    %c0_1 = arith.constant 0 : index
    %c0_2 = arith.constant 0 : index
    %1 = vector.load %arg2[%c0_1, %c0_2] : memref<32x768xf32, #tpu.memory_space<vmem>>, vector<32x768xf32>
    %cst = arith.constant dense<0.000000e+00> : vector<16x32xf32>
    %2 = tpu.matmul %0, %1, %cst {dimension_numbers = #tpu.dot_dimension_numbers<[1], [1], [0], [0], [0, 0, 1, 0], [], []>} : vector<16x768xf32>, vector<32x768xf32>, vector<16x32xf32> -> vector<16x32xf32>
    %c0_3 = arith.constant 0 : index
    %c0_4 = arith.constant 0 : index
    %3 = vector.load %arg3[%c0_3, %c0_4] : memref<1x32xf32, #tpu.memory_space<vmem>>, vector<1x32xf32>
    %4 = vector.broadcast %3 : vector<1x32xf32> to vector<16x32xf32>
    %5 = arith.addf %2, %4 : vector<16x32xf32>
    %6 = arith.fptosi %5 : vector<16x32xf32> to vector<16x32xi32>
    %7 = arith.sitofp %6 : vector<16x32xi32> to vector<16x32xf32>
    %c0_5 = arith.constant 0 : index
    %c0_6 = arith.constant 0 : index
    %8 = vector.load %arg4[%c0_5, %c0_6] : memref<16x32xf32, #tpu.memory_space<vmem>>, vector<16x32xf32>
    %9 = arith.addf %7, %8 : vector<16x32xf32>
    %cst_7 = arith.constant 0.000000e+00 : f32
    %10 = vector.broadcast %cst_7 : f32 to vector<16x32xf32>
    %c0_8 = arith.constant 0 : index
    %c0_9 = arith.constant 0 : index
    %c0_10 = arith.constant 0 : index
    %c0_11 = arith.constant 0 : index
    %11 = vector.load %arg5[%c0_8, %c0_9, %c0_10, %c0_11] : memref<2x4x32x8xf32, #tpu.memory_space<vmem>>, vector<1x1x32x8xf32>
    %12 = vector.shape_cast %11 : vector<1x1x32x8xf32> to vector<32x8xf32>
    %cst_12 = arith.constant dense<0.000000e+00> : vector<16x8xf32>
    %13 = tpu.matmul %9, %12, %cst_12 {dimension_numbers = #tpu.dot_dimension_numbers<[1], [0], [0], [1], [0, 0, 1, 1], [], []>} : vector<16x32xf32>, vector<32x8xf32>, vector<16x8xf32> -> vector<16x8xf32>
    %c0_13 = arith.constant 0 : index
    %c0_14 = arith.constant 0 : index
    %c0_15 = arith.constant 0 : index
    %c0_16 = arith.constant 0 : index
    %14 = vector.load %arg6[%c0_13, %c0_14, %c0_15, %c0_16] : memref<2x4x32x8xf32, #tpu.memory_space<vmem>>, vector<1x1x32x8xf32>
    %15 = vector.shape_cast %14 : vector<1x1x32x8xf32> to vector<32x8xf32>
    %cst_17 = arith.constant dense<0.000000e+00> : vector<16x8xf32>
    %16 = tpu.matmul %9, %15, %cst_17 {dimension_numbers = #tpu.dot_dimension_numbers<[1], [0], [0], [1], [0, 0, 1, 1], [], []>} : vector<16x32xf32>, vector<32x8xf32>, vector<16x8xf32> -> vector<16x8xf32>
    %c0_18 = arith.constant 0 : index
    %c0_19 = arith.constant 0 : index
    %c0_20 = arith.constant 0 : index
    %c0_21 = arith.constant 0 : index
    %17 = vector.load %arg7[%c0_18, %c0_19, %c0_20, %c0_21] : memref<2x4x32x8xf32, #tpu.memory_space<vmem>>, vector<1x1x32x8xf32>
    %18 = vector.shape_cast %17 : vector<1x1x32x8xf32> to vector<32x8xf32>
    %cst_22 = arith.constant dense<0.000000e+00> : vector<16x8xf32>
    %19 = tpu.matmul %9, %18, %cst_22 {dimension_numbers = #tpu.dot_dimension_numbers<[1], [0], [0], [1], [0, 0, 1, 1], [], []>} : vector<16x32xf32>, vector<32x8xf32>, vector<16x8xf32> -> vector<16x8xf32>
    %20 = vector.extract_strided_slice %13 {offsets = [0, 0], sizes = [8, 8], strides = [1, 1]} : vector<16x8xf32> to vector<8x8xf32>
    %21 = vector.extract_strided_slice %16 {offsets = [0, 0], sizes = [8, 8], strides = [1, 1]} : vector<16x8xf32> to vector<8x8xf32>
    %cst_23 = arith.constant dense<0.000000e+00> : vector<8x8xf32>
    %22 = tpu.matmul %20, %21, %cst_23 {dimension_numbers = #tpu.dot_dimension_numbers<[1], [1], [0], [0], [0, 0, 1, 0], [], []>} : vector<8x8xf32>, vector<8x8xf32>, vector<8x8xf32> -> vector<8x8xf32>
    %cst_24 = arith.constant 5.65685415 : f32
    %23 = vector.broadcast %cst_24 : f32 to vector<8x8xf32>
    %24 = arith.divf %22, %23 : vector<8x8xf32>
    %cst_25 = arith.constant dense<0xFF800000> : vector<8xf32>
    %25 = vector.multi_reduction <maximumf>, %24, %cst_25 [1] : vector<8x8xf32> to vector<8xf32>
    %26 = vector.shape_cast %25 : vector<8xf32> to vector<8x1xf32>
    %27 = vector.broadcast %26 : vector<8x1xf32> to vector<8x8xf32>
    %28 = arith.subf %24, %27 : vector<8x8xf32>
    %29 = math.exp %28 : vector<8x8xf32>
    %cst_26 = arith.constant dense<0.000000e+00> : vector<8xf32>
    %30 = vector.multi_reduction <add>, %29, %cst_26 [1] : vector<8x8xf32> to vector<8xf32>
    %31 = vector.shape_cast %30 : vector<8xf32> to vector<8x1xf32>
    %32 = vector.broadcast %31 : vector<8x1xf32> to vector<8x8xf32>
    %33 = arith.divf %29, %32 : vector<8x8xf32>
    %34 = vector.extract_strided_slice %19 {offsets = [0, 0], sizes = [8, 8], strides = [1, 1]} : vector<16x8xf32> to vector<8x8xf32>
    %cst_27 = arith.constant dense<0.000000e+00> : vector<8x8xf32>
    %35 = tpu.matmul %33, %34, %cst_27 {dimension_numbers = #tpu.dot_dimension_numbers<[1], [0], [0], [1], [0, 0, 1, 1], [], []>} : vector<8x8xf32>, vector<8x8xf32>, vector<8x8xf32> -> vector<8x8xf32>
    %36 = vector.extract_strided_slice %13 {offsets = [8, 0], sizes = [8, 8], strides = [1, 1]} : vector<16x8xf32> to vector<8x8xf32>
    %37 = vector.extract_strided_slice %16 {offsets = [8, 0], sizes = [8, 8], strides = [1, 1]} : vector<16x8xf32> to vector<8x8xf32>
    %cst_28 = arith.constant dense<0.000000e+00> : vector<8x8xf32>
    %38 = tpu.matmul %36, %37, %cst_28 {dimension_numbers = #tpu.dot_dimension_numbers<[1], [1], [0], [0], [0, 0, 1, 0], [], []>} : vector<8x8xf32>, vector<8x8xf32>, vector<8x8xf32> -> vector<8x8xf32>
    %cst_29 = arith.constant 5.65685415 : f32
    %39 = vector.broadcast %cst_29 : f32 to vector<8x8xf32>
    %40 = arith.divf %38, %39 : vector<8x8xf32>
    %cst_30 = arith.constant dense<0xFF800000> : vector<8xf32>
    %41 = vector.multi_reduction <maximumf>, %40, %cst_30 [1] : vector<8x8xf32> to vector<8xf32>
    %42 = vector.shape_cast %41 : vector<8xf32> to vector<8x1xf32>
    %43 = vector.broadcast %42 : vector<8x1xf32> to vector<8x8xf32>
    %44 = arith.subf %40, %43 : vector<8x8xf32>
    %45 = math.exp %44 : vector<8x8xf32>
    %cst_31 = arith.constant dense<0.000000e+00> : vector<8xf32>
    %46 = vector.multi_reduction <add>, %45, %cst_31 [1] : vector<8x8xf32> to vector<8xf32>
    %47 = vector.shape_cast %46 : vector<8xf32> to vector<8x1xf32>
    %48 = vector.broadcast %47 : vector<8x1xf32> to vector<8x8xf32>
    %49 = arith.divf %45, %48 : vector<8x8xf32>
    %50 = vector.extract_strided_slice %19 {offsets = [8, 0], sizes = [8, 8], strides = [1, 1]} : vector<16x8xf32> to vector<8x8xf32>
    %cst_32 = arith.constant dense<0.000000e+00> : vector<8x8xf32>
    %51 = tpu.matmul %49, %50, %cst_32 {dimension_numbers = #tpu.dot_dimension_numbers<[1], [0], [0], [1], [0, 0, 1, 1], [], []>} : vector<8x8xf32>, vector<8x8xf32>, vector<8x8xf32> -> vector<8x8xf32>
    %52 = tpu.concatenate %35, %51 in 0 : vector<8x8xf32>, vector<8x8xf32> -> vector<16x8xf32>
    %c0_33 = arith.constant 0 : index
    %c0_34 = arith.constant 0 : index
    %c0_35 = arith.constant 0 : index
    %c0_36 = arith.constant 0 : index
    %53 = vector.load %arg8[%c0_33, %c0_34, %c0_35, %c0_36] : memref<2x4x8x32xf32, #tpu.memory_space<vmem>>, vector<1x1x8x32xf32>
    %54 = vector.shape_cast %53 : vector<1x1x8x32xf32> to vector<8x32xf32>
    %cst_37 = arith.constant dense<0.000000e+00> : vector<16x32xf32>
    %55 = tpu.matmul %52, %54, %cst_37 {dimension_numbers = #tpu.dot_dimension_numbers<[1], [0], [0], [1], [0, 0, 1, 1], [], []>} : vector<16x8xf32>, vector<8x32xf32>, vector<16x32xf32> -> vector<16x32xf32>
    %56 = arith.addf %10, %55 : vector<16x32xf32>
    %c0_38 = arith.constant 0 : index
    %c1 = arith.constant 1 : index
    %c0_39 = arith.constant 0 : index
    %c0_40 = arith.constant 0 : index
    %57 = vector.load %arg5[%c0_38, %c1, %c0_39, %c0_40] : memref<2x4x32x8xf32, #tpu.memory_space<vmem>>, vector<1x1x32x8xf32>
    %58 = vector.shape_cast %57 : vector<1x1x32x8xf32> to vector<32x8xf32>
    %cst_41 = arith.constant dense<0.000000e+00> : vector<16x8xf32>
    %59 = tpu.matmul %9, %58, %cst_41 {dimension_numbers = #tpu.dot_dimension_numbers<[1], [0], [0], [1], [0, 0, 1, 1], [], []>} : vector<16x32xf32>, vector<32x8xf32>, vector<16x8xf32> -> vector<16x8xf32>
    %c0_42 = arith.constant 0 : index
    %c1_43 = arith.constant 1 : index
    %c0_44 = arith.constant 0 : index
    %c0_45 = arith.constant 0 : index
    %60 = vector.load %arg6[%c0_42, %c1_43, %c0_44, %c0_45] : memref<2x4x32x8xf32, #tpu.memory_space<vmem>>, vector<1x1x32x8xf32>
    %61 = vector.shape_cast %60 : vector<1x1x32x8xf32> to vector<32x8xf32>
    %cst_46 = arith.constant dense<0.000000e+00> : vector<16x8xf32>
    %62 = tpu.matmul %9, %61, %cst_46 {dimension_numbers = #tpu.dot_dimension_numbers<[1], [0], [0], [1], [0, 0, 1, 1], [], []>} : vector<16x32xf32>, vector<32x8xf32>, vector<16x8xf32> -> vector<16x8xf32>
    %c0_47 = arith.constant 0 : index
    %c1_48 = arith.constant 1 : index
    %c0_49 = arith.constant 0 : index
    %c0_50 = arith.constant 0 : index
    %63 = vector.load %arg7[%c0_47, %c1_48, %c0_49, %c0_50] : memref<2x4x32x8xf32, #tpu.memory_space<vmem>>, vector<1x1x32x8xf32>
    %64 = vector.shape_cast %63 : vector<1x1x32x8xf32> to vector<32x8xf32>
    %cst_51 = arith.constant dense<0.000000e+00> : vector<16x8xf32>
    %65 = tpu.matmul %9, %64, %cst_51 {dimension_numbers = #tpu.dot_dimension_numbers<[1], [0], [0], [1], [0, 0, 1, 1], [], []>} : vector<16x32xf32>, vector<32x8xf32>, vector<16x8xf32> -> vector<16x8xf32>
    %66 = vector.extract_strided_slice %59 {offsets = [0, 0], sizes = [8, 8], strides = [1, 1]} : vector<16x8xf32> to vector<8x8xf32>
    %67 = vector.extract_strided_slice %62 {offsets = [0, 0], sizes = [8, 8], strides = [1, 1]} : vector<16x8xf32> to vector<8x8xf32>
    %cst_52 = arith.constant dense<0.000000e+00> : vector<8x8xf32>
    %68 = tpu.matmul %66, %67, %cst_52 {dimension_numbers = #tpu.dot_dimension_numbers<[1], [1], [0], [0], [0, 0, 1, 0], [], []>} : vector<8x8xf32>, vector<8x8xf32>, vector<8x8xf32> -> vector<8x8xf32>
    %cst_53 = arith.constant 5.65685415 : f32
    %69 = vector.broadcast %cst_53 : f32 to vector<8x8xf32>
    %70 = arith.divf %68, %69 : vector<8x8xf32>
    %cst_54 = arith.constant dense<0xFF800000> : vector<8xf32>
    %71 = vector.multi_reduction <maximumf>, %70, %cst_54 [1] : vector<8x8xf32> to vector<8xf32>
    %72 = vector.shape_cast %71 : vector<8xf32> to vector<8x1xf32>
    %73 = vector.broadcast %72 : vector<8x1xf32> to vector<8x8xf32>
    %74 = arith.subf %70, %73 : vector<8x8xf32>
    %75 = math.exp %74 : vector<8x8xf32>
    %cst_55 = arith.constant dense<0.000000e+00> : vector<8xf32>
    %76 = vector.multi_reduction <add>, %75, %cst_55 [1] : vector<8x8xf32> to vector<8xf32>
    %77 = vector.shape_cast %76 : vector<8xf32> to vector<8x1xf32>
    %78 = vector.broadcast %77 : vector<8x1xf32> to vector<8x8xf32>
    %79 = arith.divf %75, %78 : vector<8x8xf32>
    %80 = vector.extract_strided_slice %65 {offsets = [0, 0], sizes = [8, 8], strides = [1, 1]} : vector<16x8xf32> to vector<8x8xf32>
    %cst_56 = arith.constant dense<0.000000e+00> : vector<8x8xf32>
    %81 = tpu.matmul %79, %80, %cst_56 {dimension_numbers = #tpu.dot_dimension_numbers<[1], [0], [0], [1], [0, 0, 1, 1], [], []>} : vector<8x8xf32>, vector<8x8xf32>, vector<8x8xf32> -> vector<8x8xf32>
    %82 = vector.extract_strided_slice %59 {offsets = [8, 0], sizes = [8, 8], strides = [1, 1]} : vector<16x8xf32> to vector<8x8xf32>
    %83 = vector.extract_strided_slice %62 {offsets = [8, 0], sizes = [8, 8], strides = [1, 1]} : vector<16x8xf32> to vector<8x8xf32>
    %cst_57 = arith.constant dense<0.000000e+00> : vector<8x8xf32>
    %84 = tpu.matmul %82, %83, %cst_57 {dimension_numbers = #tpu.dot_dimension_numbers<[1], [1], [0], [0], [0, 0, 1, 0], [], []>} : vector<8x8xf32>, vector<8x8xf32>, vector<8x8xf32> -> vector<8x8xf32>
    %cst_58 = arith.constant 5.65685415 : f32
    %85 = vector.broadcast %cst_58 : f32 to vector<8x8xf32>
    %86 = arith.divf %84, %85 : vector<8x8xf32>
    %cst_59 = arith.constant dense<0xFF800000> : vector<8xf32>
    %87 = vector.multi_reduction <maximumf>, %86, %cst_59 [1] : vector<8x8xf32> to vector<8xf32>
    %88 = vector.shape_cast %87 : vector<8xf32> to vector<8x1xf32>
    %89 = vector.broadcast %88 : vector<8x1xf32> to vector<8x8xf32>
    %90 = arith.subf %86, %89 : vector<8x8xf32>
    %91 = math.exp %90 : vector<8x8xf32>
    %cst_60 = arith.constant dense<0.000000e+00> : vector<8xf32>
    %92 = vector.multi_reduction <add>, %91, %cst_60 [1] : vector<8x8xf32> to vector<8xf32>
    %93 = vector.shape_cast %92 : vector<8xf32> to vector<8x1xf32>
    %94 = vector.broadcast %93 : vector<8x1xf32> to vector<8x8xf32>
    %95 = arith.divf %91, %94 : vector<8x8xf32>
    %96 = vector.extract_strided_slice %65 {offsets = [8, 0], sizes = [8, 8], strides = [1, 1]} : vector<16x8xf32> to vector<8x8xf32>
    %cst_61 = arith.constant dense<0.000000e+00> : vector<8x8xf32>
    %97 = tpu.matmul %95, %96, %cst_61 {dimension_numbers = #tpu.dot_dimension_numbers<[1], [0], [0], [1], [0, 0, 1, 1], [], []>} : vector<8x8xf32>, vector<8x8xf32>, vector<8x8xf32> -> vector<8x8xf32>
    %98 = tpu.concatenate %81, %97 in 0 : vector<8x8xf32>, vector<8x8xf32> -> vector<16x8xf32>
    %c0_62 = arith.constant 0 : index
    %c1_63 = arith.constant 1 : index
    %c0_64 = arith.constant 0 : index
    %c0_65 = arith.constant 0 : index
    %99 = vector.load %arg8[%c0_62, %c1_63, %c0_64, %c0_65] : memref<2x4x8x32xf32, #tpu.memory_space<vmem>>, vector<1x1x8x32xf32>
    %100 = vector.shape_cast %99 : vector<1x1x8x32xf32> to vector<8x32xf32>
    %cst_66 = arith.constant dense<0.000000e+00> : vector<16x32xf32>
    %101 = tpu.matmul %98, %100, %cst_66 {dimension_numbers = #tpu.dot_dimension_numbers<[1], [0], [0], [1], [0, 0, 1, 1], [], []>} : vector<16x8xf32>, vector<8x32xf32>, vector<16x32xf32> -> vector<16x32xf32>
    %102 = arith.addf %56, %101 : vector<16x32xf32>
    %c0_67 = arith.constant 0 : index
    %c2 = arith.constant 2 : index
    %c0_68 = arith.constant 0 : index
    %c0_69 = arith.constant 0 : index
    %103 = vector.load %arg5[%c0_67, %c2, %c0_68, %c0_69] : memref<2x4x32x8xf32, #tpu.memory_space<vmem>>, vector<1x1x32x8xf32>
    %104 = vector.shape_cast %103 : vector<1x1x32x8xf32> to vector<32x8xf32>
    %cst_70 = arith.constant dense<0.000000e+00> : vector<16x8xf32>
    %105 = tpu.matmul %9, %104, %cst_70 {dimension_numbers = #tpu.dot_dimension_numbers<[1], [0], [0], [1], [0, 0, 1, 1], [], []>} : vector<16x32xf32>, vector<32x8xf32>, vector<16x8xf32> -> vector<16x8xf32>
    %c0_71 = arith.constant 0 : index
    %c2_72 = arith.constant 2 : index
    %c0_73 = arith.constant 0 : index
    %c0_74 = arith.constant 0 : index
    %106 = vector.load %arg6[%c0_71, %c2_72, %c0_73, %c0_74] : memref<2x4x32x8xf32, #tpu.memory_space<vmem>>, vector<1x1x32x8xf32>
    %107 = vector.shape_cast %106 : vector<1x1x32x8xf32> to vector<32x8xf32>
    %cst_75 = arith.constant dense<0.000000e+00> : vector<16x8xf32>
    %108 = tpu.matmul %9, %107, %cst_75 {dimension_numbers = #tpu.dot_dimension_numbers<[1], [0], [0], [1], [0, 0, 1, 1], [], []>} : vector<16x32xf32>, vector<32x8xf32>, vector<16x8xf32> -> vector<16x8xf32>
    %c0_76 = arith.constant 0 : index
    %c2_77 = arith.constant 2 : index
    %c0_78 = arith.constant 0 : index
    %c0_79 = arith.constant 0 : index
    %109 = vector.load %arg7[%c0_76, %c2_77, %c0_78, %c0_79] : memref<2x4x32x8xf32, #tpu.memory_space<vmem>>, vector<1x1x32x8xf32>
    %110 = vector.shape_cast %109 : vector<1x1x32x8xf32> to vector<32x8xf32>
    %cst_80 = arith.constant dense<0.000000e+00> : vector<16x8xf32>
    %111 = tpu.matmul %9, %110, %cst_80 {dimension_numbers = #tpu.dot_dimension_numbers<[1], [0], [0], [1], [0, 0, 1, 1], [], []>} : vector<16x32xf32>, vector<32x8xf32>, vector<16x8xf32> -> vector<16x8xf32>
    %112 = vector.extract_strided_slice %105 {offsets = [0, 0], sizes = [8, 8], strides = [1, 1]} : vector<16x8xf32> to vector<8x8xf32>
    %113 = vector.extract_strided_slice %108 {offsets = [0, 0], sizes = [8, 8], strides = [1, 1]} : vector<16x8xf32> to vector<8x8xf32>
    %cst_81 = arith.constant dense<0.000000e+00> : vector<8x8xf32>
    %114 = tpu.matmul %112, %113, %cst_81 {dimension_numbers = #tpu.dot_dimension_numbers<[1], [1], [0], [0], [0, 0, 1, 0], [], []>} : vector<8x8xf32>, vector<8x8xf32>, vector<8x8xf32> -> vector<8x8xf32>
    %cst_82 = arith.constant 5.65685415 : f32
    %115 = vector.broadcast %cst_82 : f32 to vector<8x8xf32>
    %116 = arith.divf %114, %115 : vector<8x8xf32>
    %cst_83 = arith.constant dense<0xFF800000> : vector<8xf32>
    %117 = vector.multi_reduction <maximumf>, %116, %cst_83 [1] : vector<8x8xf32> to vector<8xf32>
    %118 = vector.shape_cast %117 : vector<8xf32> to vector<8x1xf32>
    %119 = vector.broadcast %118 : vector<8x1xf32> to vector<8x8xf32>
    %120 = arith.subf %116, %119 : vector<8x8xf32>
    %121 = math.exp %120 : vector<8x8xf32>
    %cst_84 = arith.constant dense<0.000000e+00> : vector<8xf32>
    %122 = vector.multi_reduction <add>, %121, %cst_84 [1] : vector<8x8xf32> to vector<8xf32>
    %123 = vector.shape_cast %122 : vector<8xf32> to vector<8x1xf32>
    %124 = vector.broadcast %123 : vector<8x1xf32> to vector<8x8xf32>
    %125 = arith.divf %121, %124 : vector<8x8xf32>
    %126 = vector.extract_strided_slice %111 {offsets = [0, 0], sizes = [8, 8], strides = [1, 1]} : vector<16x8xf32> to vector<8x8xf32>
    %cst_85 = arith.constant dense<0.000000e+00> : vector<8x8xf32>
    %127 = tpu.matmul %125, %126, %cst_85 {dimension_numbers = #tpu.dot_dimension_numbers<[1], [0], [0], [1], [0, 0, 1, 1], [], []>} : vector<8x8xf32>, vector<8x8xf32>, vector<8x8xf32> -> vector<8x8xf32>
    %128 = vector.extract_strided_slice %105 {offsets = [8, 0], sizes = [8, 8], strides = [1, 1]} : vector<16x8xf32> to vector<8x8xf32>
    %129 = vector.extract_strided_slice %108 {offsets = [8, 0], sizes = [8, 8], strides = [1, 1]} : vector<16x8xf32> to vector<8x8xf32>
    %cst_86 = arith.constant dense<0.000000e+00> : vector<8x8xf32>
    %130 = tpu.matmul %128, %129, %cst_86 {dimension_numbers = #tpu.dot_dimension_numbers<[1], [1], [0], [0], [0, 0, 1, 0], [], []>} : vector<8x8xf32>, vector<8x8xf32>, vector<8x8xf32> -> vector<8x8xf32>
    %cst_87 = arith.constant 5.65685415 : f32
    %131 = vector.broadcast %cst_87 : f32 to vector<8x8xf32>
    %132 = arith.divf %130, %131 : vector<8x8xf32>
    %cst_88 = arith.constant dense<0xFF800000> : vector<8xf32>
    %133 = vector.multi_reduction <maximumf>, %132, %cst_88 [1] : vector<8x8xf32> to vector<8xf32>
    %134 = vector.shape_cast %133 : vector<8xf32> to vector<8x1xf32>
    %135 = vector.broadcast %134 : vector<8x1xf32> to vector<8x8xf32>
    %136 = arith.subf %132, %135 : vector<8x8xf32>
    %137 = math.exp %136 : vector<8x8xf32>
    %cst_89 = arith.constant dense<0.000000e+00> : vector<8xf32>
    %138 = vector.multi_reduction <add>, %137, %cst_89 [1] : vector<8x8xf32> to vector<8xf32>
    %139 = vector.shape_cast %138 : vector<8xf32> to vector<8x1xf32>
    %140 = vector.broadcast %139 : vector<8x1xf32> to vector<8x8xf32>
    %141 = arith.divf %137, %140 : vector<8x8xf32>
    %142 = vector.extract_strided_slice %111 {offsets = [8, 0], sizes = [8, 8], strides = [1, 1]} : vector<16x8xf32> to vector<8x8xf32>
    %cst_90 = arith.constant dense<0.000000e+00> : vector<8x8xf32>
    %143 = tpu.matmul %141, %142, %cst_90 {dimension_numbers = #tpu.dot_dimension_numbers<[1], [0], [0], [1], [0, 0, 1, 1], [], []>} : vector<8x8xf32>, vector<8x8xf32>, vector<8x8xf32> -> vector<8x8xf32>
    %144 = tpu.concatenate %127, %143 in 0 : vector<8x8xf32>, vector<8x8xf32> -> vector<16x8xf32>
    %c0_91 = arith.constant 0 : index
    %c2_92 = arith.constant 2 : index
    %c0_93 = arith.constant 0 : index
    %c0_94 = arith.constant 0 : index
    %145 = vector.load %arg8[%c0_91, %c2_92, %c0_93, %c0_94] : memref<2x4x8x32xf32, #tpu.memory_space<vmem>>, vector<1x1x8x32xf32>
    %146 = vector.shape_cast %145 : vector<1x1x8x32xf32> to vector<8x32xf32>
    %cst_95 = arith.constant dense<0.000000e+00> : vector<16x32xf32>
    %147 = tpu.matmul %144, %146, %cst_95 {dimension_numbers = #tpu.dot_dimension_numbers<[1], [0], [0], [1], [0, 0, 1, 1], [], []>} : vector<16x8xf32>, vector<8x32xf32>, vector<16x32xf32> -> vector<16x32xf32>
    %148 = arith.addf %102, %147 : vector<16x32xf32>
    %c0_96 = arith.constant 0 : index
    %c3 = arith.constant 3 : index
    %c0_97 = arith.constant 0 : index
    %c0_98 = arith.constant 0 : index
    %149 = vector.load %arg5[%c0_96, %c3, %c0_97, %c0_98] : memref<2x4x32x8xf32, #tpu.memory_space<vmem>>, vector<1x1x32x8xf32>
    %150 = vector.shape_cast %149 : vector<1x1x32x8xf32> to vector<32x8xf32>
    %cst_99 = arith.constant dense<0.000000e+00> : vector<16x8xf32>
    %151 = tpu.matmul %9, %150, %cst_99 {dimension_numbers = #tpu.dot_dimension_numbers<[1], [0], [0], [1], [0, 0, 1, 1], [], []>} : vector<16x32xf32>, vector<32x8xf32>, vector<16x8xf32> -> vector<16x8xf32>
    %c0_100 = arith.constant 0 : index
    %c3_101 = arith.constant 3 : index
    %c0_102 = arith.constant 0 : index
    %c0_103 = arith.constant 0 : index
    %152 = vector.load %arg6[%c0_100, %c3_101, %c0_102, %c0_103] : memref<2x4x32x8xf32, #tpu.memory_space<vmem>>, vector<1x1x32x8xf32>
    %153 = vector.shape_cast %152 : vector<1x1x32x8xf32> to vector<32x8xf32>
    %cst_104 = arith.constant dense<0.000000e+00> : vector<16x8xf32>
    %154 = tpu.matmul %9, %153, %cst_104 {dimension_numbers = #tpu.dot_dimension_numbers<[1], [0], [0], [1], [0, 0, 1, 1], [], []>} : vector<16x32xf32>, vector<32x8xf32>, vector<16x8xf32> -> vector<16x8xf32>
    %c0_105 = arith.constant 0 : index
    %c3_106 = arith.constant 3 : index
    %c0_107 = arith.constant 0 : index
    %c0_108 = arith.constant 0 : index
    %155 = vector.load %arg7[%c0_105, %c3_106, %c0_107, %c0_108] : memref<2x4x32x8xf32, #tpu.memory_space<vmem>>, vector<1x1x32x8xf32>
    %156 = vector.shape_cast %155 : vector<1x1x32x8xf32> to vector<32x8xf32>
    %cst_109 = arith.constant dense<0.000000e+00> : vector<16x8xf32>
    %157 = tpu.matmul %9, %156, %cst_109 {dimension_numbers = #tpu.dot_dimension_numbers<[1], [0], [0], [1], [0, 0, 1, 1], [], []>} : vector<16x32xf32>, vector<32x8xf32>, vector<16x8xf32> -> vector<16x8xf32>
    %158 = vector.extract_strided_slice %151 {offsets = [0, 0], sizes = [8, 8], strides = [1, 1]} : vector<16x8xf32> to vector<8x8xf32>
    %159 = vector.extract_strided_slice %154 {offsets = [0, 0], sizes = [8, 8], strides = [1, 1]} : vector<16x8xf32> to vector<8x8xf32>
    %cst_110 = arith.constant dense<0.000000e+00> : vector<8x8xf32>
    %160 = tpu.matmul %158, %159, %cst_110 {dimension_numbers = #tpu.dot_dimension_numbers<[1], [1], [0], [0], [0, 0, 1, 0], [], []>} : vector<8x8xf32>, vector<8x8xf32>, vector<8x8xf32> -> vector<8x8xf32>
    %cst_111 = arith.constant 5.65685415 : f32
    %161 = vector.broadcast %cst_111 : f32 to vector<8x8xf32>
    %162 = arith.divf %160, %161 : vector<8x8xf32>
    %cst_112 = arith.constant dense<0xFF800000> : vector<8xf32>
    %163 = vector.multi_reduction <maximumf>, %162, %cst_112 [1] : vector<8x8xf32> to vector<8xf32>
    %164 = vector.shape_cast %163 : vector<8xf32> to vector<8x1xf32>
    %165 = vector.broadcast %164 : vector<8x1xf32> to vector<8x8xf32>
    %166 = arith.subf %162, %165 : vector<8x8xf32>
    %167 = math.exp %166 : vector<8x8xf32>
    %cst_113 = arith.constant dense<0.000000e+00> : vector<8xf32>
    %168 = vector.multi_reduction <add>, %167, %cst_113 [1] : vector<8x8xf32> to vector<8xf32>
    %169 = vector.shape_cast %168 : vector<8xf32> to vector<8x1xf32>
    %170 = vector.broadcast %169 : vector<8x1xf32> to vector<8x8xf32>
    %171 = arith.divf %167, %170 : vector<8x8xf32>
    %172 = vector.extract_strided_slice %157 {offsets = [0, 0], sizes = [8, 8], strides = [1, 1]} : vector<16x8xf32> to vector<8x8xf32>
    %cst_114 = arith.constant dense<0.000000e+00> : vector<8x8xf32>
    %173 = tpu.matmul %171, %172, %cst_114 {dimension_numbers = #tpu.dot_dimension_numbers<[1], [0], [0], [1], [0, 0, 1, 1], [], []>} : vector<8x8xf32>, vector<8x8xf32>, vector<8x8xf32> -> vector<8x8xf32>
    %174 = vector.extract_strided_slice %151 {offsets = [8, 0], sizes = [8, 8], strides = [1, 1]} : vector<16x8xf32> to vector<8x8xf32>
    %175 = vector.extract_strided_slice %154 {offsets = [8, 0], sizes = [8, 8], strides = [1, 1]} : vector<16x8xf32> to vector<8x8xf32>
    %cst_115 = arith.constant dense<0.000000e+00> : vector<8x8xf32>
    %176 = tpu.matmul %174, %175, %cst_115 {dimension_numbers = #tpu.dot_dimension_numbers<[1], [1], [0], [0], [0, 0, 1, 0], [], []>} : vector<8x8xf32>, vector<8x8xf32>, vector<8x8xf32> -> vector<8x8xf32>
    %cst_116 = arith.constant 5.65685415 : f32
    %177 = vector.broadcast %cst_116 : f32 to vector<8x8xf32>
    %178 = arith.divf %176, %177 : vector<8x8xf32>
    %cst_117 = arith.constant dense<0xFF800000> : vector<8xf32>
    %179 = vector.multi_reduction <maximumf>, %178, %cst_117 [1] : vector<8x8xf32> to vector<8xf32>
    %180 = vector.shape_cast %179 : vector<8xf32> to vector<8x1xf32>
    %181 = vector.broadcast %180 : vector<8x1xf32> to vector<8x8xf32>
    %182 = arith.subf %178, %181 : vector<8x8xf32>
    %183 = math.exp %182 : vector<8x8xf32>
    %cst_118 = arith.constant dense<0.000000e+00> : vector<8xf32>
    %184 = vector.multi_reduction <add>, %183, %cst_118 [1] : vector<8x8xf32> to vector<8xf32>
    %185 = vector.shape_cast %184 : vector<8xf32> to vector<8x1xf32>
    %186 = vector.broadcast %185 : vector<8x1xf32> to vector<8x8xf32>
    %187 = arith.divf %183, %186 : vector<8x8xf32>
    %188 = vector.extract_strided_slice %157 {offsets = [8, 0], sizes = [8, 8], strides = [1, 1]} : vector<16x8xf32> to vector<8x8xf32>
    %cst_119 = arith.constant dense<0.000000e+00> : vector<8x8xf32>
    %189 = tpu.matmul %187, %188, %cst_119 {dimension_numbers = #tpu.dot_dimension_numbers<[1], [0], [0], [1], [0, 0, 1, 1], [], []>} : vector<8x8xf32>, vector<8x8xf32>, vector<8x8xf32> -> vector<8x8xf32>
    %190 = tpu.concatenate %173, %189 in 0 : vector<8x8xf32>, vector<8x8xf32> -> vector<16x8xf32>
    %c0_120 = arith.constant 0 : index
    %c3_121 = arith.constant 3 : index
    %c0_122 = arith.constant 0 : index
    %c0_123 = arith.constant 0 : index
    %191 = vector.load %arg8[%c0_120, %c3_121, %c0_122, %c0_123] : memref<2x4x8x32xf32, #tpu.memory_space<vmem>>, vector<1x1x8x32xf32>
    %192 = vector.shape_cast %191 : vector<1x1x8x32xf32> to vector<8x32xf32>
    %cst_124 = arith.constant dense<0.000000e+00> : vector<16x32xf32>
    %193 = tpu.matmul %190, %192, %cst_124 {dimension_numbers = #tpu.dot_dimension_numbers<[1], [0], [0], [1], [0, 0, 1, 1], [], []>} : vector<16x8xf32>, vector<8x32xf32>, vector<16x32xf32> -> vector<16x32xf32>
    %194 = arith.addf %148, %193 : vector<16x32xf32>
    %195 = arith.addf %194, %9 : vector<16x32xf32>
    %c0_125 = arith.constant 0 : index
    %c0_126 = arith.constant 0 : index
    %c0_127 = arith.constant 0 : index
    %196 = vector.load %arg9[%c0_125, %c0_126, %c0_127] : memref<2x1x32xf32, #tpu.memory_space<vmem>>, vector<1x1x32xf32>
    %197 = vector.shape_cast %196 : vector<1x1x32xf32> to vector<1x32xf32>
    %c0_128 = arith.constant 0 : index
    %c0_129 = arith.constant 0 : index
    %c0_130 = arith.constant 0 : index
    %198 = vector.load %arg10[%c0_128, %c0_129, %c0_130] : memref<2x1x32xf32, #tpu.memory_space<vmem>>, vector<1x1x32xf32>
    %199 = vector.shape_cast %198 : vector<1x1x32xf32> to vector<1x32xf32>
    %cst_131 = arith.constant dense<0.000000e+00> : vector<16xf32>
    %200 = vector.multi_reduction <add>, %195, %cst_131 [1] : vector<16x32xf32> to vector<16xf32>
    %201 = vector.shape_cast %200 : vector<16xf32> to vector<16x1xf32>
    %cst_132 = arith.constant 3.200000e+01 : f32
    %202 = vector.broadcast %cst_132 : f32 to vector<16x1xf32>
    %203 = arith.divf %201, %202 : vector<16x1xf32>
    %204 = vector.broadcast %203 : vector<16x1xf32> to vector<16x32xf32>
    %205 = arith.subf %195, %204 : vector<16x32xf32>
    %206 = arith.mulf %205, %205 : vector<16x32xf32>
    %cst_133 = arith.constant dense<0.000000e+00> : vector<16xf32>
    %207 = vector.multi_reduction <add>, %206, %cst_133 [1] : vector<16x32xf32> to vector<16xf32>
    %208 = vector.shape_cast %207 : vector<16xf32> to vector<16x1xf32>
    %cst_134 = arith.constant 3.200000e+01 : f32
    %209 = vector.broadcast %cst_134 : f32 to vector<16x1xf32>
    %210 = arith.divf %208, %209 : vector<16x1xf32>
    %211 = vector.broadcast %203 : vector<16x1xf32> to vector<16x32xf32>
    %212 = arith.subf %195, %211 : vector<16x32xf32>
    %cst_135 = arith.constant 9.99999974E-6 : f32
    %213 = vector.broadcast %cst_135 : f32 to vector<16x1xf32>
    %214 = arith.addf %210, %213 : vector<16x1xf32>
    %215 = math.rsqrt %214 : vector<16x1xf32>
    %216 = vector.broadcast %215 : vector<16x1xf32> to vector<16x32xf32>
    %217 = arith.mulf %212, %216 : vector<16x32xf32>
    %218 = vector.broadcast %197 : vector<1x32xf32> to vector<16x32xf32>
    %219 = arith.mulf %217, %218 : vector<16x32xf32>
    %220 = vector.broadcast %199 : vector<1x32xf32> to vector<16x32xf32>
    %221 = arith.addf %219, %220 : vector<16x32xf32>
    %c0_136 = arith.constant 0 : index
    %c0_137 = arith.constant 0 : index
    %c0_138 = arith.constant 0 : index
    %222 = vector.load %arg11[%c0_136, %c0_137, %c0_138] : memref<2x32x64xf32, #tpu.memory_space<vmem>>, vector<1x32x64xf32>
    %223 = vector.shape_cast %222 : vector<1x32x64xf32> to vector<32x64xf32>
    %cst_139 = arith.constant dense<0.000000e+00> : vector<16x64xf32>
    %224 = tpu.matmul %221, %223, %cst_139 {dimension_numbers = #tpu.dot_dimension_numbers<[1], [0], [0], [1], [0, 0, 1, 1], [], []>} : vector<16x32xf32>, vector<32x64xf32>, vector<16x64xf32> -> vector<16x64xf32>
    %c0_140 = arith.constant 0 : index
    %c0_141 = arith.constant 0 : index
    %c0_142 = arith.constant 0 : index
    %225 = vector.load %arg12[%c0_140, %c0_141, %c0_142] : memref<2x1x64xf32, #tpu.memory_space<vmem>>, vector<1x1x64xf32>
    %226 = vector.shape_cast %225 : vector<1x1x64xf32> to vector<1x64xf32>
    %227 = vector.broadcast %226 : vector<1x64xf32> to vector<16x64xf32>
    %228 = arith.addf %224, %227 : vector<16x64xf32>
    %cst_143 = arith.constant 0.000000e+00 : f32
    %229 = vector.broadcast %cst_143 : f32 to vector<16x64xf32>
    %230 = arith.maximumf %228, %229 : vector<16x64xf32>
    %c0_144 = arith.constant 0 : index
    %c0_145 = arith.constant 0 : index
    %c0_146 = arith.constant 0 : index
    %231 = vector.load %arg13[%c0_144, %c0_145, %c0_146] : memref<2x64x32xf32, #tpu.memory_space<vmem>>, vector<1x64x32xf32>
    %232 = vector.shape_cast %231 : vector<1x64x32xf32> to vector<64x32xf32>
    %cst_147 = arith.constant dense<0.000000e+00> : vector<16x32xf32>
    %233 = tpu.matmul %230, %232, %cst_147 {dimension_numbers = #tpu.dot_dimension_numbers<[1], [0], [0], [1], [0, 0, 1, 1], [], []>} : vector<16x64xf32>, vector<64x32xf32>, vector<16x32xf32> -> vector<16x32xf32>
    %c0_148 = arith.constant 0 : index
    %c0_149 = arith.constant 0 : index
    %c0_150 = arith.constant 0 : index
    %234 = vector.load %arg14[%c0_148, %c0_149, %c0_150] : memref<2x1x32xf32, #tpu.memory_space<vmem>>, vector<1x1x32xf32>
    %235 = vector.shape_cast %234 : vector<1x1x32xf32> to vector<1x32xf32>
    %236 = vector.broadcast %235 : vector<1x32xf32> to vector<16x32xf32>
    %237 = arith.addf %233, %236 : vector<16x32xf32>
    %238 = arith.addf %221, %237 : vector<16x32xf32>
    %c0_151 = arith.constant 0 : index
    %c0_152 = arith.constant 0 : index
    %c0_153 = arith.constant 0 : index
    %239 = vector.load %arg15[%c0_151, %c0_152, %c0_153] : memref<2x1x32xf32, #tpu.memory_space<vmem>>, vector<1x1x32xf32>
    %240 = vector.shape_cast %239 : vector<1x1x32xf32> to vector<1x32xf32>
    %c0_154 = arith.constant 0 : index
    %c0_155 = arith.constant 0 : index
    %c0_156 = arith.constant 0 : index
    %241 = vector.load %arg16[%c0_154, %c0_155, %c0_156] : memref<2x1x32xf32, #tpu.memory_space<vmem>>, vector<1x1x32xf32>
    %242 = vector.shape_cast %241 : vector<1x1x32xf32> to vector<1x32xf32>
    %cst_157 = arith.constant dense<0.000000e+00> : vector<16xf32>
    %243 = vector.multi_reduction <add>, %238, %cst_157 [1] : vector<16x32xf32> to vector<16xf32>
    %244 = vector.shape_cast %243 : vector<16xf32> to vector<16x1xf32>
    %cst_158 = arith.constant 3.200000e+01 : f32
    %245 = vector.broadcast %cst_158 : f32 to vector<16x1xf32>
    %246 = arith.divf %244, %245 : vector<16x1xf32>
    %247 = vector.broadcast %246 : vector<16x1xf32> to vector<16x32xf32>
    %248 = arith.subf %238, %247 : vector<16x32xf32>
    %249 = arith.mulf %248, %248 : vector<16x32xf32>
    %cst_159 = arith.constant dense<0.000000e+00> : vector<16xf32>
    %250 = vector.multi_reduction <add>, %249, %cst_159 [1] : vector<16x32xf32> to vector<16xf32>
    %251 = vector.shape_cast %250 : vector<16xf32> to vector<16x1xf32>
    %cst_160 = arith.constant 3.200000e+01 : f32
    %252 = vector.broadcast %cst_160 : f32 to vector<16x1xf32>
    %253 = arith.divf %251, %252 : vector<16x1xf32>
    %254 = vector.broadcast %246 : vector<16x1xf32> to vector<16x32xf32>
    %255 = arith.subf %238, %254 : vector<16x32xf32>
    %cst_161 = arith.constant 9.99999974E-6 : f32
    %256 = vector.broadcast %cst_161 : f32 to vector<16x1xf32>
    %257 = arith.addf %253, %256 : vector<16x1xf32>
    %258 = math.rsqrt %257 : vector<16x1xf32>
    %259 = vector.broadcast %258 : vector<16x1xf32> to vector<16x32xf32>
    %260 = arith.mulf %255, %259 : vector<16x32xf32>
    %261 = vector.broadcast %240 : vector<1x32xf32> to vector<16x32xf32>
    %262 = arith.mulf %260, %261 : vector<16x32xf32>
    %263 = vector.broadcast %242 : vector<1x32xf32> to vector<16x32xf32>
    %264 = arith.addf %262, %263 : vector<16x32xf32>
    %cst_162 = arith.constant 0.000000e+00 : f32
    %265 = vector.broadcast %cst_162 : f32 to vector<16x32xf32>
    %c1_163 = arith.constant 1 : index
    %c0_164 = arith.constant 0 : index
    %c0_165 = arith.constant 0 : index
    %c0_166 = arith.constant 0 : index
    %266 = vector.load %arg5[%c1_163, %c0_164, %c0_165, %c0_166] : memref<2x4x32x8xf32, #tpu.memory_space<vmem>>, vector<1x1x32x8xf32>
    %267 = vector.shape_cast %266 : vector<1x1x32x8xf32> to vector<32x8xf32>
    %cst_167 = arith.constant dense<0.000000e+00> : vector<16x8xf32>
    %268 = tpu.matmul %264, %267, %cst_167 {dimension_numbers = #tpu.dot_dimension_numbers<[1], [0], [0], [1], [0, 0, 1, 1], [], []>} : vector<16x32xf32>, vector<32x8xf32>, vector<16x8xf32> -> vector<16x8xf32>
    %c1_168 = arith.constant 1 : index
    %c0_169 = arith.constant 0 : index
    %c0_170 = arith.constant 0 : index
    %c0_171 = arith.constant 0 : index
    %269 = vector.load %arg6[%c1_168, %c0_169, %c0_170, %c0_171] : memref<2x4x32x8xf32, #tpu.memory_space<vmem>>, vector<1x1x32x8xf32>
    %270 = vector.shape_cast %269 : vector<1x1x32x8xf32> to vector<32x8xf32>
    %cst_172 = arith.constant dense<0.000000e+00> : vector<16x8xf32>
    %271 = tpu.matmul %264, %270, %cst_172 {dimension_numbers = #tpu.dot_dimension_numbers<[1], [0], [0], [1], [0, 0, 1, 1], [], []>} : vector<16x32xf32>, vector<32x8xf32>, vector<16x8xf32> -> vector<16x8xf32>
    %c1_173 = arith.constant 1 : index
    %c0_174 = arith.constant 0 : index
    %c0_175 = arith.constant 0 : index
    %c0_176 = arith.constant 0 : index
    %272 = vector.load %arg7[%c1_173, %c0_174, %c0_175, %c0_176] : memref<2x4x32x8xf32, #tpu.memory_space<vmem>>, vector<1x1x32x8xf32>
    %273 = vector.shape_cast %272 : vector<1x1x32x8xf32> to vector<32x8xf32>
    %cst_177 = arith.constant dense<0.000000e+00> : vector<16x8xf32>
    %274 = tpu.matmul %264, %273, %cst_177 {dimension_numbers = #tpu.dot_dimension_numbers<[1], [0], [0], [1], [0, 0, 1, 1], [], []>} : vector<16x32xf32>, vector<32x8xf32>, vector<16x8xf32> -> vector<16x8xf32>
    %275 = vector.extract_strided_slice %268 {offsets = [0, 0], sizes = [8, 8], strides = [1, 1]} : vector<16x8xf32> to vector<8x8xf32>
    %276 = vector.extract_strided_slice %271 {offsets = [0, 0], sizes = [8, 8], strides = [1, 1]} : vector<16x8xf32> to vector<8x8xf32>
    %cst_178 = arith.constant dense<0.000000e+00> : vector<8x8xf32>
    %277 = tpu.matmul %275, %276, %cst_178 {dimension_numbers = #tpu.dot_dimension_numbers<[1], [1], [0], [0], [0, 0, 1, 0], [], []>} : vector<8x8xf32>, vector<8x8xf32>, vector<8x8xf32> -> vector<8x8xf32>
    %cst_179 = arith.constant 5.65685415 : f32
    %278 = vector.broadcast %cst_179 : f32 to vector<8x8xf32>
    %279 = arith.divf %277, %278 : vector<8x8xf32>
    %cst_180 = arith.constant dense<0xFF800000> : vector<8xf32>
    %280 = vector.multi_reduction <maximumf>, %279, %cst_180 [1] : vector<8x8xf32> to vector<8xf32>
    %281 = vector.shape_cast %280 : vector<8xf32> to vector<8x1xf32>
    %282 = vector.broadcast %281 : vector<8x1xf32> to vector<8x8xf32>
    %283 = arith.subf %279, %282 : vector<8x8xf32>
    %284 = math.exp %283 : vector<8x8xf32>
    %cst_181 = arith.constant dense<0.000000e+00> : vector<8xf32>
    %285 = vector.multi_reduction <add>, %284, %cst_181 [1] : vector<8x8xf32> to vector<8xf32>
    %286 = vector.shape_cast %285 : vector<8xf32> to vector<8x1xf32>
    %287 = vector.broadcast %286 : vector<8x1xf32> to vector<8x8xf32>
    %288 = arith.divf %284, %287 : vector<8x8xf32>
    %289 = vector.extract_strided_slice %274 {offsets = [0, 0], sizes = [8, 8], strides = [1, 1]} : vector<16x8xf32> to vector<8x8xf32>
    %cst_182 = arith.constant dense<0.000000e+00> : vector<8x8xf32>
    %290 = tpu.matmul %288, %289, %cst_182 {dimension_numbers = #tpu.dot_dimension_numbers<[1], [0], [0], [1], [0, 0, 1, 1], [], []>} : vector<8x8xf32>, vector<8x8xf32>, vector<8x8xf32> -> vector<8x8xf32>
    %291 = vector.extract_strided_slice %268 {offsets = [8, 0], sizes = [8, 8], strides = [1, 1]} : vector<16x8xf32> to vector<8x8xf32>
    %292 = vector.extract_strided_slice %271 {offsets = [8, 0], sizes = [8, 8], strides = [1, 1]} : vector<16x8xf32> to vector<8x8xf32>
    %cst_183 = arith.constant dense<0.000000e+00> : vector<8x8xf32>
    %293 = tpu.matmul %291, %292, %cst_183 {dimension_numbers = #tpu.dot_dimension_numbers<[1], [1], [0], [0], [0, 0, 1, 0], [], []>} : vector<8x8xf32>, vector<8x8xf32>, vector<8x8xf32> -> vector<8x8xf32>
    %cst_184 = arith.constant 5.65685415 : f32
    %294 = vector.broadcast %cst_184 : f32 to vector<8x8xf32>
    %295 = arith.divf %293, %294 : vector<8x8xf32>
    %cst_185 = arith.constant dense<0xFF800000> : vector<8xf32>
    %296 = vector.multi_reduction <maximumf>, %295, %cst_185 [1] : vector<8x8xf32> to vector<8xf32>
    %297 = vector.shape_cast %296 : vector<8xf32> to vector<8x1xf32>
    %298 = vector.broadcast %297 : vector<8x1xf32> to vector<8x8xf32>
    %299 = arith.subf %295, %298 : vector<8x8xf32>
    %300 = math.exp %299 : vector<8x8xf32>
    %cst_186 = arith.constant dense<0.000000e+00> : vector<8xf32>
    %301 = vector.multi_reduction <add>, %300, %cst_186 [1] : vector<8x8xf32> to vector<8xf32>
    %302 = vector.shape_cast %301 : vector<8xf32> to vector<8x1xf32>
    %303 = vector.broadcast %302 : vector<8x1xf32> to vector<8x8xf32>
    %304 = arith.divf %300, %303 : vector<8x8xf32>
    %305 = vector.extract_strided_slice %274 {offsets = [8, 0], sizes = [8, 8], strides = [1, 1]} : vector<16x8xf32> to vector<8x8xf32>
    %cst_187 = arith.constant dense<0.000000e+00> : vector<8x8xf32>
    %306 = tpu.matmul %304, %305, %cst_187 {dimension_numbers = #tpu.dot_dimension_numbers<[1], [0], [0], [1], [0, 0, 1, 1], [], []>} : vector<8x8xf32>, vector<8x8xf32>, vector<8x8xf32> -> vector<8x8xf32>
    %307 = tpu.concatenate %290, %306 in 0 : vector<8x8xf32>, vector<8x8xf32> -> vector<16x8xf32>
    %c1_188 = arith.constant 1 : index
    %c0_189 = arith.constant 0 : index
    %c0_190 = arith.constant 0 : index
    %c0_191 = arith.constant 0 : index
    %308 = vector.load %arg8[%c1_188, %c0_189, %c0_190, %c0_191] : memref<2x4x8x32xf32, #tpu.memory_space<vmem>>, vector<1x1x8x32xf32>
    %309 = vector.shape_cast %308 : vector<1x1x8x32xf32> to vector<8x32xf32>
    %cst_192 = arith.constant dense<0.000000e+00> : vector<16x32xf32>
    %310 = tpu.matmul %307, %309, %cst_192 {dimension_numbers = #tpu.dot_dimension_numbers<[1], [0], [0], [1], [0, 0, 1, 1], [], []>} : vector<16x8xf32>, vector<8x32xf32>, vector<16x32xf32> -> vector<16x32xf32>
    %311 = arith.addf %265, %310 : vector<16x32xf32>
    %c1_193 = arith.constant 1 : index
    %c1_194 = arith.constant 1 : index
    %c0_195 = arith.constant 0 : index
    %c0_196 = arith.constant 0 : index
    %312 = vector.load %arg5[%c1_193, %c1_194, %c0_195, %c0_196] : memref<2x4x32x8xf32, #tpu.memory_space<vmem>>, vector<1x1x32x8xf32>
    %313 = vector.shape_cast %312 : vector<1x1x32x8xf32> to vector<32x8xf32>
    %cst_197 = arith.constant dense<0.000000e+00> : vector<16x8xf32>
    %314 = tpu.matmul %264, %313, %cst_197 {dimension_numbers = #tpu.dot_dimension_numbers<[1], [0], [0], [1], [0, 0, 1, 1], [], []>} : vector<16x32xf32>, vector<32x8xf32>, vector<16x8xf32> -> vector<16x8xf32>
    %c1_198 = arith.constant 1 : index
    %c1_199 = arith.constant 1 : index
    %c0_200 = arith.constant 0 : index
    %c0_201 = arith.constant 0 : index
    %315 = vector.load %arg6[%c1_198, %c1_199, %c0_200, %c0_201] : memref<2x4x32x8xf32, #tpu.memory_space<vmem>>, vector<1x1x32x8xf32>
    %316 = vector.shape_cast %315 : vector<1x1x32x8xf32> to vector<32x8xf32>
    %cst_202 = arith.constant dense<0.000000e+00> : vector<16x8xf32>
    %317 = tpu.matmul %264, %316, %cst_202 {dimension_numbers = #tpu.dot_dimension_numbers<[1], [0], [0], [1], [0, 0, 1, 1], [], []>} : vector<16x32xf32>, vector<32x8xf32>, vector<16x8xf32> -> vector<16x8xf32>
    %c1_203 = arith.constant 1 : index
    %c1_204 = arith.constant 1 : index
    %c0_205 = arith.constant 0 : index
    %c0_206 = arith.constant 0 : index
    %318 = vector.load %arg7[%c1_203, %c1_204, %c0_205, %c0_206] : memref<2x4x32x8xf32, #tpu.memory_space<vmem>>, vector<1x1x32x8xf32>
    %319 = vector.shape_cast %318 : vector<1x1x32x8xf32> to vector<32x8xf32>
    %cst_207 = arith.constant dense<0.000000e+00> : vector<16x8xf32>
    %320 = tpu.matmul %264, %319, %cst_207 {dimension_numbers = #tpu.dot_dimension_numbers<[1], [0], [0], [1], [0, 0, 1, 1], [], []>} : vector<16x32xf32>, vector<32x8xf32>, vector<16x8xf32> -> vector<16x8xf32>
    %321 = vector.extract_strided_slice %314 {offsets = [0, 0], sizes = [8, 8], strides = [1, 1]} : vector<16x8xf32> to vector<8x8xf32>
    %322 = vector.extract_strided_slice %317 {offsets = [0, 0], sizes = [8, 8], strides = [1, 1]} : vector<16x8xf32> to vector<8x8xf32>
    %cst_208 = arith.constant dense<0.000000e+00> : vector<8x8xf32>
    %323 = tpu.matmul %321, %322, %cst_208 {dimension_numbers = #tpu.dot_dimension_numbers<[1], [1], [0], [0], [0, 0, 1, 0], [], []>} : vector<8x8xf32>, vector<8x8xf32>, vector<8x8xf32> -> vector<8x8xf32>
    %cst_209 = arith.constant 5.65685415 : f32
    %324 = vector.broadcast %cst_209 : f32 to vector<8x8xf32>
    %325 = arith.divf %323, %324 : vector<8x8xf32>
    %cst_210 = arith.constant dense<0xFF800000> : vector<8xf32>
    %326 = vector.multi_reduction <maximumf>, %325, %cst_210 [1] : vector<8x8xf32> to vector<8xf32>
    %327 = vector.shape_cast %326 : vector<8xf32> to vector<8x1xf32>
    %328 = vector.broadcast %327 : vector<8x1xf32> to vector<8x8xf32>
    %329 = arith.subf %325, %328 : vector<8x8xf32>
    %330 = math.exp %329 : vector<8x8xf32>
    %cst_211 = arith.constant dense<0.000000e+00> : vector<8xf32>
    %331 = vector.multi_reduction <add>, %330, %cst_211 [1] : vector<8x8xf32> to vector<8xf32>
    %332 = vector.shape_cast %331 : vector<8xf32> to vector<8x1xf32>
    %333 = vector.broadcast %332 : vector<8x1xf32> to vector<8x8xf32>
    %334 = arith.divf %330, %333 : vector<8x8xf32>
    %335 = vector.extract_strided_slice %320 {offsets = [0, 0], sizes = [8, 8], strides = [1, 1]} : vector<16x8xf32> to vector<8x8xf32>
    %cst_212 = arith.constant dense<0.000000e+00> : vector<8x8xf32>
    %336 = tpu.matmul %334, %335, %cst_212 {dimension_numbers = #tpu.dot_dimension_numbers<[1], [0], [0], [1], [0, 0, 1, 1], [], []>} : vector<8x8xf32>, vector<8x8xf32>, vector<8x8xf32> -> vector<8x8xf32>
    %337 = vector.extract_strided_slice %314 {offsets = [8, 0], sizes = [8, 8], strides = [1, 1]} : vector<16x8xf32> to vector<8x8xf32>
    %338 = vector.extract_strided_slice %317 {offsets = [8, 0], sizes = [8, 8], strides = [1, 1]} : vector<16x8xf32> to vector<8x8xf32>
    %cst_213 = arith.constant dense<0.000000e+00> : vector<8x8xf32>
    %339 = tpu.matmul %337, %338, %cst_213 {dimension_numbers = #tpu.dot_dimension_numbers<[1], [1], [0], [0], [0, 0, 1, 0], [], []>} : vector<8x8xf32>, vector<8x8xf32>, vector<8x8xf32> -> vector<8x8xf32>
    %cst_214 = arith.constant 5.65685415 : f32
    %340 = vector.broadcast %cst_214 : f32 to vector<8x8xf32>
    %341 = arith.divf %339, %340 : vector<8x8xf32>
    %cst_215 = arith.constant dense<0xFF800000> : vector<8xf32>
    %342 = vector.multi_reduction <maximumf>, %341, %cst_215 [1] : vector<8x8xf32> to vector<8xf32>
    %343 = vector.shape_cast %342 : vector<8xf32> to vector<8x1xf32>
    %344 = vector.broadcast %343 : vector<8x1xf32> to vector<8x8xf32>
    %345 = arith.subf %341, %344 : vector<8x8xf32>
    %346 = math.exp %345 : vector<8x8xf32>
    %cst_216 = arith.constant dense<0.000000e+00> : vector<8xf32>
    %347 = vector.multi_reduction <add>, %346, %cst_216 [1] : vector<8x8xf32> to vector<8xf32>
    %348 = vector.shape_cast %347 : vector<8xf32> to vector<8x1xf32>
    %349 = vector.broadcast %348 : vector<8x1xf32> to vector<8x8xf32>
    %350 = arith.divf %346, %349 : vector<8x8xf32>
    %351 = vector.extract_strided_slice %320 {offsets = [8, 0], sizes = [8, 8], strides = [1, 1]} : vector<16x8xf32> to vector<8x8xf32>
    %cst_217 = arith.constant dense<0.000000e+00> : vector<8x8xf32>
    %352 = tpu.matmul %350, %351, %cst_217 {dimension_numbers = #tpu.dot_dimension_numbers<[1], [0], [0], [1], [0, 0, 1, 1], [], []>} : vector<8x8xf32>, vector<8x8xf32>, vector<8x8xf32> -> vector<8x8xf32>
    %353 = tpu.concatenate %336, %352 in 0 : vector<8x8xf32>, vector<8x8xf32> -> vector<16x8xf32>
    %c1_218 = arith.constant 1 : index
    %c1_219 = arith.constant 1 : index
    %c0_220 = arith.constant 0 : index
    %c0_221 = arith.constant 0 : index
    %354 = vector.load %arg8[%c1_218, %c1_219, %c0_220, %c0_221] : memref<2x4x8x32xf32, #tpu.memory_space<vmem>>, vector<1x1x8x32xf32>
    %355 = vector.shape_cast %354 : vector<1x1x8x32xf32> to vector<8x32xf32>
    %cst_222 = arith.constant dense<0.000000e+00> : vector<16x32xf32>
    %356 = tpu.matmul %353, %355, %cst_222 {dimension_numbers = #tpu.dot_dimension_numbers<[1], [0], [0], [1], [0, 0, 1, 1], [], []>} : vector<16x8xf32>, vector<8x32xf32>, vector<16x32xf32> -> vector<16x32xf32>
    %357 = arith.addf %311, %356 : vector<16x32xf32>
    %c1_223 = arith.constant 1 : index
    %c2_224 = arith.constant 2 : index
    %c0_225 = arith.constant 0 : index
    %c0_226 = arith.constant 0 : index
    %358 = vector.load %arg5[%c1_223, %c2_224, %c0_225, %c0_226] : memref<2x4x32x8xf32, #tpu.memory_space<vmem>>, vector<1x1x32x8xf32>
    %359 = vector.shape_cast %358 : vector<1x1x32x8xf32> to vector<32x8xf32>
    %cst_227 = arith.constant dense<0.000000e+00> : vector<16x8xf32>
    %360 = tpu.matmul %264, %359, %cst_227 {dimension_numbers = #tpu.dot_dimension_numbers<[1], [0], [0], [1], [0, 0, 1, 1], [], []>} : vector<16x32xf32>, vector<32x8xf32>, vector<16x8xf32> -> vector<16x8xf32>
    %c1_228 = arith.constant 1 : index
    %c2_229 = arith.constant 2 : index
    %c0_230 = arith.constant 0 : index
    %c0_231 = arith.constant 0 : index
    %361 = vector.load %arg6[%c1_228, %c2_229, %c0_230, %c0_231] : memref<2x4x32x8xf32, #tpu.memory_space<vmem>>, vector<1x1x32x8xf32>
    %362 = vector.shape_cast %361 : vector<1x1x32x8xf32> to vector<32x8xf32>
    %cst_232 = arith.constant dense<0.000000e+00> : vector<16x8xf32>
    %363 = tpu.matmul %264, %362, %cst_232 {dimension_numbers = #tpu.dot_dimension_numbers<[1], [0], [0], [1], [0, 0, 1, 1], [], []>} : vector<16x32xf32>, vector<32x8xf32>, vector<16x8xf32> -> vector<16x8xf32>
    %c1_233 = arith.constant 1 : index
    %c2_234 = arith.constant 2 : index
    %c0_235 = arith.constant 0 : index
    %c0_236 = arith.constant 0 : index
    %364 = vector.load %arg7[%c1_233, %c2_234, %c0_235, %c0_236] : memref<2x4x32x8xf32, #tpu.memory_space<vmem>>, vector<1x1x32x8xf32>
    %365 = vector.shape_cast %364 : vector<1x1x32x8xf32> to vector<32x8xf32>
    %cst_237 = arith.constant dense<0.000000e+00> : vector<16x8xf32>
    %366 = tpu.matmul %264, %365, %cst_237 {dimension_numbers = #tpu.dot_dimension_numbers<[1], [0], [0], [1], [0, 0, 1, 1], [], []>} : vector<16x32xf32>, vector<32x8xf32>, vector<16x8xf32> -> vector<16x8xf32>
    %367 = vector.extract_strided_slice %360 {offsets = [0, 0], sizes = [8, 8], strides = [1, 1]} : vector<16x8xf32> to vector<8x8xf32>
    %368 = vector.extract_strided_slice %363 {offsets = [0, 0], sizes = [8, 8], strides = [1, 1]} : vector<16x8xf32> to vector<8x8xf32>
    %cst_238 = arith.constant dense<0.000000e+00> : vector<8x8xf32>
    %369 = tpu.matmul %367, %368, %cst_238 {dimension_numbers = #tpu.dot_dimension_numbers<[1], [1], [0], [0], [0, 0, 1, 0], [], []>} : vector<8x8xf32>, vector<8x8xf32>, vector<8x8xf32> -> vector<8x8xf32>
    %cst_239 = arith.constant 5.65685415 : f32
    %370 = vector.broadcast %cst_239 : f32 to vector<8x8xf32>
    %371 = arith.divf %369, %370 : vector<8x8xf32>
    %cst_240 = arith.constant dense<0xFF800000> : vector<8xf32>
    %372 = vector.multi_reduction <maximumf>, %371, %cst_240 [1] : vector<8x8xf32> to vector<8xf32>
    %373 = vector.shape_cast %372 : vector<8xf32> to vector<8x1xf32>
    %374 = vector.broadcast %373 : vector<8x1xf32> to vector<8x8xf32>
    %375 = arith.subf %371, %374 : vector<8x8xf32>
    %376 = math.exp %375 : vector<8x8xf32>
    %cst_241 = arith.constant dense<0.000000e+00> : vector<8xf32>
    %377 = vector.multi_reduction <add>, %376, %cst_241 [1] : vector<8x8xf32> to vector<8xf32>
    %378 = vector.shape_cast %377 : vector<8xf32> to vector<8x1xf32>
    %379 = vector.broadcast %378 : vector<8x1xf32> to vector<8x8xf32>
    %380 = arith.divf %376, %379 : vector<8x8xf32>
    %381 = vector.extract_strided_slice %366 {offsets = [0, 0], sizes = [8, 8], strides = [1, 1]} : vector<16x8xf32> to vector<8x8xf32>
    %cst_242 = arith.constant dense<0.000000e+00> : vector<8x8xf32>
    %382 = tpu.matmul %380, %381, %cst_242 {dimension_numbers = #tpu.dot_dimension_numbers<[1], [0], [0], [1], [0, 0, 1, 1], [], []>} : vector<8x8xf32>, vector<8x8xf32>, vector<8x8xf32> -> vector<8x8xf32>
    %383 = vector.extract_strided_slice %360 {offsets = [8, 0], sizes = [8, 8], strides = [1, 1]} : vector<16x8xf32> to vector<8x8xf32>
    %384 = vector.extract_strided_slice %363 {offsets = [8, 0], sizes = [8, 8], strides = [1, 1]} : vector<16x8xf32> to vector<8x8xf32>
    %cst_243 = arith.constant dense<0.000000e+00> : vector<8x8xf32>
    %385 = tpu.matmul %383, %384, %cst_243 {dimension_numbers = #tpu.dot_dimension_numbers<[1], [1], [0], [0], [0, 0, 1, 0], [], []>} : vector<8x8xf32>, vector<8x8xf32>, vector<8x8xf32> -> vector<8x8xf32>
    %cst_244 = arith.constant 5.65685415 : f32
    %386 = vector.broadcast %cst_244 : f32 to vector<8x8xf32>
    %387 = arith.divf %385, %386 : vector<8x8xf32>
    %cst_245 = arith.constant dense<0xFF800000> : vector<8xf32>
    %388 = vector.multi_reduction <maximumf>, %387, %cst_245 [1] : vector<8x8xf32> to vector<8xf32>
    %389 = vector.shape_cast %388 : vector<8xf32> to vector<8x1xf32>
    %390 = vector.broadcast %389 : vector<8x1xf32> to vector<8x8xf32>
    %391 = arith.subf %387, %390 : vector<8x8xf32>
    %392 = math.exp %391 : vector<8x8xf32>
    %cst_246 = arith.constant dense<0.000000e+00> : vector<8xf32>
    %393 = vector.multi_reduction <add>, %392, %cst_246 [1] : vector<8x8xf32> to vector<8xf32>
    %394 = vector.shape_cast %393 : vector<8xf32> to vector<8x1xf32>
    %395 = vector.broadcast %394 : vector<8x1xf32> to vector<8x8xf32>
    %396 = arith.divf %392, %395 : vector<8x8xf32>
    %397 = vector.extract_strided_slice %366 {offsets = [8, 0], sizes = [8, 8], strides = [1, 1]} : vector<16x8xf32> to vector<8x8xf32>
    %cst_247 = arith.constant dense<0.000000e+00> : vector<8x8xf32>
    %398 = tpu.matmul %396, %397, %cst_247 {dimension_numbers = #tpu.dot_dimension_numbers<[1], [0], [0], [1], [0, 0, 1, 1], [], []>} : vector<8x8xf32>, vector<8x8xf32>, vector<8x8xf32> -> vector<8x8xf32>
    %399 = tpu.concatenate %382, %398 in 0 : vector<8x8xf32>, vector<8x8xf32> -> vector<16x8xf32>
    %c1_248 = arith.constant 1 : index
    %c2_249 = arith.constant 2 : index
    %c0_250 = arith.constant 0 : index
    %c0_251 = arith.constant 0 : index
    %400 = vector.load %arg8[%c1_248, %c2_249, %c0_250, %c0_251] : memref<2x4x8x32xf32, #tpu.memory_space<vmem>>, vector<1x1x8x32xf32>
    %401 = vector.shape_cast %400 : vector<1x1x8x32xf32> to vector<8x32xf32>
    %cst_252 = arith.constant dense<0.000000e+00> : vector<16x32xf32>
    %402 = tpu.matmul %399, %401, %cst_252 {dimension_numbers = #tpu.dot_dimension_numbers<[1], [0], [0], [1], [0, 0, 1, 1], [], []>} : vector<16x8xf32>, vector<8x32xf32>, vector<16x32xf32> -> vector<16x32xf32>
    %403 = arith.addf %357, %402 : vector<16x32xf32>
    %c1_253 = arith.constant 1 : index
    %c3_254 = arith.constant 3 : index
    %c0_255 = arith.constant 0 : index
    %c0_256 = arith.constant 0 : index
    %404 = vector.load %arg5[%c1_253, %c3_254, %c0_255, %c0_256] : memref<2x4x32x8xf32, #tpu.memory_space<vmem>>, vector<1x1x32x8xf32>
    %405 = vector.shape_cast %404 : vector<1x1x32x8xf32> to vector<32x8xf32>
    %cst_257 = arith.constant dense<0.000000e+00> : vector<16x8xf32>
    %406 = tpu.matmul %264, %405, %cst_257 {dimension_numbers = #tpu.dot_dimension_numbers<[1], [0], [0], [1], [0, 0, 1, 1], [], []>} : vector<16x32xf32>, vector<32x8xf32>, vector<16x8xf32> -> vector<16x8xf32>
    %c1_258 = arith.constant 1 : index
    %c3_259 = arith.constant 3 : index
    %c0_260 = arith.constant 0 : index
    %c0_261 = arith.constant 0 : index
    %407 = vector.load %arg6[%c1_258, %c3_259, %c0_260, %c0_261] : memref<2x4x32x8xf32, #tpu.memory_space<vmem>>, vector<1x1x32x8xf32>
    %408 = vector.shape_cast %407 : vector<1x1x32x8xf32> to vector<32x8xf32>
    %cst_262 = arith.constant dense<0.000000e+00> : vector<16x8xf32>
    %409 = tpu.matmul %264, %408, %cst_262 {dimension_numbers = #tpu.dot_dimension_numbers<[1], [0], [0], [1], [0, 0, 1, 1], [], []>} : vector<16x32xf32>, vector<32x8xf32>, vector<16x8xf32> -> vector<16x8xf32>
    %c1_263 = arith.constant 1 : index
    %c3_264 = arith.constant 3 : index
    %c0_265 = arith.constant 0 : index
    %c0_266 = arith.constant 0 : index
    %410 = vector.load %arg7[%c1_263, %c3_264, %c0_265, %c0_266] : memref<2x4x32x8xf32, #tpu.memory_space<vmem>>, vector<1x1x32x8xf32>
    %411 = vector.shape_cast %410 : vector<1x1x32x8xf32> to vector<32x8xf32>
    %cst_267 = arith.constant dense<0.000000e+00> : vector<16x8xf32>
    %412 = tpu.matmul %264, %411, %cst_267 {dimension_numbers = #tpu.dot_dimension_numbers<[1], [0], [0], [1], [0, 0, 1, 1], [], []>} : vector<16x32xf32>, vector<32x8xf32>, vector<16x8xf32> -> vector<16x8xf32>
    %413 = vector.extract_strided_slice %406 {offsets = [0, 0], sizes = [8, 8], strides = [1, 1]} : vector<16x8xf32> to vector<8x8xf32>
    %414 = vector.extract_strided_slice %409 {offsets = [0, 0], sizes = [8, 8], strides = [1, 1]} : vector<16x8xf32> to vector<8x8xf32>
    %cst_268 = arith.constant dense<0.000000e+00> : vector<8x8xf32>
    %415 = tpu.matmul %413, %414, %cst_268 {dimension_numbers = #tpu.dot_dimension_numbers<[1], [1], [0], [0], [0, 0, 1, 0], [], []>} : vector<8x8xf32>, vector<8x8xf32>, vector<8x8xf32> -> vector<8x8xf32>
    %cst_269 = arith.constant 5.65685415 : f32
    %416 = vector.broadcast %cst_269 : f32 to vector<8x8xf32>
    %417 = arith.divf %415, %416 : vector<8x8xf32>
    %cst_270 = arith.constant dense<0xFF800000> : vector<8xf32>
    %418 = vector.multi_reduction <maximumf>, %417, %cst_270 [1] : vector<8x8xf32> to vector<8xf32>
    %419 = vector.shape_cast %418 : vector<8xf32> to vector<8x1xf32>
    %420 = vector.broadcast %419 : vector<8x1xf32> to vector<8x8xf32>
    %421 = arith.subf %417, %420 : vector<8x8xf32>
    %422 = math.exp %421 : vector<8x8xf32>
    %cst_271 = arith.constant dense<0.000000e+00> : vector<8xf32>
    %423 = vector.multi_reduction <add>, %422, %cst_271 [1] : vector<8x8xf32> to vector<8xf32>
    %424 = vector.shape_cast %423 : vector<8xf32> to vector<8x1xf32>
    %425 = vector.broadcast %424 : vector<8x1xf32> to vector<8x8xf32>
    %426 = arith.divf %422, %425 : vector<8x8xf32>
    %427 = vector.extract_strided_slice %412 {offsets = [0, 0], sizes = [8, 8], strides = [1, 1]} : vector<16x8xf32> to vector<8x8xf32>
    %cst_272 = arith.constant dense<0.000000e+00> : vector<8x8xf32>
    %428 = tpu.matmul %426, %427, %cst_272 {dimension_numbers = #tpu.dot_dimension_numbers<[1], [0], [0], [1], [0, 0, 1, 1], [], []>} : vector<8x8xf32>, vector<8x8xf32>, vector<8x8xf32> -> vector<8x8xf32>
    %429 = vector.extract_strided_slice %406 {offsets = [8, 0], sizes = [8, 8], strides = [1, 1]} : vector<16x8xf32> to vector<8x8xf32>
    %430 = vector.extract_strided_slice %409 {offsets = [8, 0], sizes = [8, 8], strides = [1, 1]} : vector<16x8xf32> to vector<8x8xf32>
    %cst_273 = arith.constant dense<0.000000e+00> : vector<8x8xf32>
    %431 = tpu.matmul %429, %430, %cst_273 {dimension_numbers = #tpu.dot_dimension_numbers<[1], [1], [0], [0], [0, 0, 1, 0], [], []>} : vector<8x8xf32>, vector<8x8xf32>, vector<8x8xf32> -> vector<8x8xf32>
    %cst_274 = arith.constant 5.65685415 : f32
    %432 = vector.broadcast %cst_274 : f32 to vector<8x8xf32>
    %433 = arith.divf %431, %432 : vector<8x8xf32>
    %cst_275 = arith.constant dense<0xFF800000> : vector<8xf32>
    %434 = vector.multi_reduction <maximumf>, %433, %cst_275 [1] : vector<8x8xf32> to vector<8xf32>
    %435 = vector.shape_cast %434 : vector<8xf32> to vector<8x1xf32>
    %436 = vector.broadcast %435 : vector<8x1xf32> to vector<8x8xf32>
    %437 = arith.subf %433, %436 : vector<8x8xf32>
    %438 = math.exp %437 : vector<8x8xf32>
    %cst_276 = arith.constant dense<0.000000e+00> : vector<8xf32>
    %439 = vector.multi_reduction <add>, %438, %cst_276 [1] : vector<8x8xf32> to vector<8xf32>
    %440 = vector.shape_cast %439 : vector<8xf32> to vector<8x1xf32>
    %441 = vector.broadcast %440 : vector<8x1xf32> to vector<8x8xf32>
    %442 = arith.divf %438, %441 : vector<8x8xf32>
    %443 = vector.extract_strided_slice %412 {offsets = [8, 0], sizes = [8, 8], strides = [1, 1]} : vector<16x8xf32> to vector<8x8xf32>
    %cst_277 = arith.constant dense<0.000000e+00> : vector<8x8xf32>
    %444 = tpu.matmul %442, %443, %cst_277 {dimension_numbers = #tpu.dot_dimension_numbers<[1], [0], [0], [1], [0, 0, 1, 1], [], []>} : vector<8x8xf32>, vector<8x8xf32>, vector<8x8xf32> -> vector<8x8xf32>
    %445 = tpu.concatenate %428, %444 in 0 : vector<8x8xf32>, vector<8x8xf32> -> vector<16x8xf32>
    %c1_278 = arith.constant 1 : index
    %c3_279 = arith.constant 3 : index
    %c0_280 = arith.constant 0 : index
    %c0_281 = arith.constant 0 : index
    %446 = vector.load %arg8[%c1_278, %c3_279, %c0_280, %c0_281] : memref<2x4x8x32xf32, #tpu.memory_space<vmem>>, vector<1x1x8x32xf32>
    %447 = vector.shape_cast %446 : vector<1x1x8x32xf32> to vector<8x32xf32>
    %cst_282 = arith.constant dense<0.000000e+00> : vector<16x32xf32>
    %448 = tpu.matmul %445, %447, %cst_282 {dimension_numbers = #tpu.dot_dimension_numbers<[1], [0], [0], [1], [0, 0, 1, 1], [], []>} : vector<16x8xf32>, vector<8x32xf32>, vector<16x32xf32> -> vector<16x32xf32>
    %449 = arith.addf %403, %448 : vector<16x32xf32>
    %450 = arith.addf %449, %264 : vector<16x32xf32>
    %c1_283 = arith.constant 1 : index
    %c0_284 = arith.constant 0 : index
    %c0_285 = arith.constant 0 : index
    %451 = vector.load %arg9[%c1_283, %c0_284, %c0_285] : memref<2x1x32xf32, #tpu.memory_space<vmem>>, vector<1x1x32xf32>
    %452 = vector.shape_cast %451 : vector<1x1x32xf32> to vector<1x32xf32>
    %c1_286 = arith.constant 1 : index
    %c0_287 = arith.constant 0 : index
    %c0_288 = arith.constant 0 : index
    %453 = vector.load %arg10[%c1_286, %c0_287, %c0_288] : memref<2x1x32xf32, #tpu.memory_space<vmem>>, vector<1x1x32xf32>
    %454 = vector.shape_cast %453 : vector<1x1x32xf32> to vector<1x32xf32>
    %cst_289 = arith.constant dense<0.000000e+00> : vector<16xf32>
    %455 = vector.multi_reduction <add>, %450, %cst_289 [1] : vector<16x32xf32> to vector<16xf32>
    %456 = vector.shape_cast %455 : vector<16xf32> to vector<16x1xf32>
    %cst_290 = arith.constant 3.200000e+01 : f32
    %457 = vector.broadcast %cst_290 : f32 to vector<16x1xf32>
    %458 = arith.divf %456, %457 : vector<16x1xf32>
    %459 = vector.broadcast %458 : vector<16x1xf32> to vector<16x32xf32>
    %460 = arith.subf %450, %459 : vector<16x32xf32>
    %461 = arith.mulf %460, %460 : vector<16x32xf32>
    %cst_291 = arith.constant dense<0.000000e+00> : vector<16xf32>
    %462 = vector.multi_reduction <add>, %461, %cst_291 [1] : vector<16x32xf32> to vector<16xf32>
    %463 = vector.shape_cast %462 : vector<16xf32> to vector<16x1xf32>
    %cst_292 = arith.constant 3.200000e+01 : f32
    %464 = vector.broadcast %cst_292 : f32 to vector<16x1xf32>
    %465 = arith.divf %463, %464 : vector<16x1xf32>
    %466 = vector.broadcast %458 : vector<16x1xf32> to vector<16x32xf32>
    %467 = arith.subf %450, %466 : vector<16x32xf32>
    %cst_293 = arith.constant 9.99999974E-6 : f32
    %468 = vector.broadcast %cst_293 : f32 to vector<16x1xf32>
    %469 = arith.addf %465, %468 : vector<16x1xf32>
    %470 = math.rsqrt %469 : vector<16x1xf32>
    %471 = vector.broadcast %470 : vector<16x1xf32> to vector<16x32xf32>
    %472 = arith.mulf %467, %471 : vector<16x32xf32>
    %473 = vector.broadcast %452 : vector<1x32xf32> to vector<16x32xf32>
    %474 = arith.mulf %472, %473 : vector<16x32xf32>
    %475 = vector.broadcast %454 : vector<1x32xf32> to vector<16x32xf32>
    %476 = arith.addf %474, %475 : vector<16x32xf32>
    %c1_294 = arith.constant 1 : index
    %c0_295 = arith.constant 0 : index
    %c0_296 = arith.constant 0 : index
    %477 = vector.load %arg11[%c1_294, %c0_295, %c0_296] : memref<2x32x64xf32, #tpu.memory_space<vmem>>, vector<1x32x64xf32>
    %478 = vector.shape_cast %477 : vector<1x32x64xf32> to vector<32x64xf32>
    %cst_297 = arith.constant dense<0.000000e+00> : vector<16x64xf32>
    %479 = tpu.matmul %476, %478, %cst_297 {dimension_numbers = #tpu.dot_dimension_numbers<[1], [0], [0], [1], [0, 0, 1, 1], [], []>} : vector<16x32xf32>, vector<32x64xf32>, vector<16x64xf32> -> vector<16x64xf32>
    %c1_298 = arith.constant 1 : index
    %c0_299 = arith.constant 0 : index
    %c0_300 = arith.constant 0 : index
    %480 = vector.load %arg12[%c1_298, %c0_299, %c0_300] : memref<2x1x64xf32, #tpu.memory_space<vmem>>, vector<1x1x64xf32>
    %481 = vector.shape_cast %480 : vector<1x1x64xf32> to vector<1x64xf32>
    %482 = vector.broadcast %481 : vector<1x64xf32> to vector<16x64xf32>
    %483 = arith.addf %479, %482 : vector<16x64xf32>
    %cst_301 = arith.constant 0.000000e+00 : f32
    %484 = vector.broadcast %cst_301 : f32 to vector<16x64xf32>
    %485 = arith.maximumf %483, %484 : vector<16x64xf32>
    %c1_302 = arith.constant 1 : index
    %c0_303 = arith.constant 0 : index
    %c0_304 = arith.constant 0 : index
    %486 = vector.load %arg13[%c1_302, %c0_303, %c0_304] : memref<2x64x32xf32, #tpu.memory_space<vmem>>, vector<1x64x32xf32>
    %487 = vector.shape_cast %486 : vector<1x64x32xf32> to vector<64x32xf32>
    %cst_305 = arith.constant dense<0.000000e+00> : vector<16x32xf32>
    %488 = tpu.matmul %485, %487, %cst_305 {dimension_numbers = #tpu.dot_dimension_numbers<[1], [0], [0], [1], [0, 0, 1, 1], [], []>} : vector<16x64xf32>, vector<64x32xf32>, vector<16x32xf32> -> vector<16x32xf32>
    %c1_306 = arith.constant 1 : index
    %c0_307 = arith.constant 0 : index
    %c0_308 = arith.constant 0 : index
    %489 = vector.load %arg14[%c1_306, %c0_307, %c0_308] : memref<2x1x32xf32, #tpu.memory_space<vmem>>, vector<1x1x32xf32>
    %490 = vector.shape_cast %489 : vector<1x1x32xf32> to vector<1x32xf32>
    %491 = vector.broadcast %490 : vector<1x32xf32> to vector<16x32xf32>
    %492 = arith.addf %488, %491 : vector<16x32xf32>
    %493 = arith.addf %476, %492 : vector<16x32xf32>
    %c1_309 = arith.constant 1 : index
    %c0_310 = arith.constant 0 : index
    %c0_311 = arith.constant 0 : index
    %494 = vector.load %arg15[%c1_309, %c0_310, %c0_311] : memref<2x1x32xf32, #tpu.memory_space<vmem>>, vector<1x1x32xf32>
    %495 = vector.shape_cast %494 : vector<1x1x32xf32> to vector<1x32xf32>
    %c1_312 = arith.constant 1 : index
    %c0_313 = arith.constant 0 : index
    %c0_314 = arith.constant 0 : index
    %496 = vector.load %arg16[%c1_312, %c0_313, %c0_314] : memref<2x1x32xf32, #tpu.memory_space<vmem>>, vector<1x1x32xf32>
    %497 = vector.shape_cast %496 : vector<1x1x32xf32> to vector<1x32xf32>
    %cst_315 = arith.constant dense<0.000000e+00> : vector<16xf32>
    %498 = vector.multi_reduction <add>, %493, %cst_315 [1] : vector<16x32xf32> to vector<16xf32>
    %499 = vector.shape_cast %498 : vector<16xf32> to vector<16x1xf32>
    %cst_316 = arith.constant 3.200000e+01 : f32
    %500 = vector.broadcast %cst_316 : f32 to vector<16x1xf32>
    %501 = arith.divf %499, %500 : vector<16x1xf32>
    %502 = vector.broadcast %501 : vector<16x1xf32> to vector<16x32xf32>
    %503 = arith.subf %493, %502 : vector<16x32xf32>
    %504 = arith.mulf %503, %503 : vector<16x32xf32>
    %cst_317 = arith.constant dense<0.000000e+00> : vector<16xf32>
    %505 = vector.multi_reduction <add>, %504, %cst_317 [1] : vector<16x32xf32> to vector<16xf32>
    %506 = vector.shape_cast %505 : vector<16xf32> to vector<16x1xf32>
    %cst_318 = arith.constant 3.200000e+01 : f32
    %507 = vector.broadcast %cst_318 : f32 to vector<16x1xf32>
    %508 = arith.divf %506, %507 : vector<16x1xf32>
    %509 = vector.broadcast %501 : vector<16x1xf32> to vector<16x32xf32>
    %510 = arith.subf %493, %509 : vector<16x32xf32>
    %cst_319 = arith.constant 9.99999974E-6 : f32
    %511 = vector.broadcast %cst_319 : f32 to vector<16x1xf32>
    %512 = arith.addf %508, %511 : vector<16x1xf32>
    %513 = math.rsqrt %512 : vector<16x1xf32>
    %514 = vector.broadcast %513 : vector<16x1xf32> to vector<16x32xf32>
    %515 = arith.mulf %510, %514 : vector<16x32xf32>
    %516 = vector.broadcast %495 : vector<1x32xf32> to vector<16x32xf32>
    %517 = arith.mulf %515, %516 : vector<16x32xf32>
    %518 = vector.broadcast %497 : vector<1x32xf32> to vector<16x32xf32>
    %519 = arith.addf %517, %518 : vector<16x32xf32>
    %520 = vector.extract_strided_slice %519 {offsets = [0, 0], sizes = [8, 32], strides = [1, 1]} : vector<16x32xf32> to vector<8x32xf32>
    %cst_320 = arith.constant dense<0.000000e+00> : vector<32xf32>
    %521 = vector.multi_reduction <add>, %520, %cst_320 [0] : vector<8x32xf32> to vector<32xf32>
    %522 = vector.shape_cast %521 : vector<32xf32> to vector<1x32xf32>
    %cst_321 = arith.constant 8.000000e+00 : f32
    %523 = vector.broadcast %cst_321 : f32 to vector<1x32xf32>
    %524 = arith.divf %522, %523 : vector<1x32xf32>
    %c0_322 = arith.constant 0 : index
    %c0_323 = arith.constant 0 : index
    %c0_324 = arith.constant 0 : index
    %525 = vector.load %arg17[%c0_322, %c0_323, %c0_324] : memref<1x2x32xf32, #tpu.memory_space<vmem>>, vector<1x1x32xf32>
    %526 = vector.shape_cast %525 : vector<1x1x32xf32> to vector<1x32xf32>
    %527 = vector.shape_cast %524 : vector<1x32xf32> to vector<1x1x32xf32>
    tpu.vector_store %arg17[%c0_322, %c0_323, %c0_324], %527 {strides = array<i32>} : memref<1x2x32xf32, #tpu.memory_space<vmem>>, vector<1x1x32xf32>,
    %528 = vector.extract_strided_slice %519 {offsets = [8, 0], sizes = [8, 32], strides = [1, 1]} : vector<16x32xf32> to vector<8x32xf32>
    %cst_325 = arith.constant dense<0.000000e+00> : vector<32xf32>
    %529 = vector.multi_reduction <add>, %528, %cst_325 [0] : vector<8x32xf32> to vector<32xf32>
    %530 = vector.shape_cast %529 : vector<32xf32> to vector<1x32xf32>
    %cst_326 = arith.constant 8.000000e+00 : f32
    %531 = vector.broadcast %cst_326 : f32 to vector<1x32xf32>
    %532 = arith.divf %530, %531 : vector<1x32xf32>
    %c0_327 = arith.constant 0 : index
    %c1_328 = arith.constant 1 : index
    %c0_329 = arith.constant 0 : index
    %533 = vector.load %arg17[%c0_327, %c1_328, %c0_329] : memref<1x2x32xf32, #tpu.memory_space<vmem>>, vector<1x1x32xf32>
    %534 = vector.shape_cast %533 : vector<1x1x32xf32> to vector<1x32xf32>
    %535 = vector.shape_cast %532 : vector<1x32xf32> to vector<1x1x32xf32>
    tpu.vector_store %arg17[%c0_327, %c1_328, %c0_329], %535 {strides = array<i32>} : memref<1x2x32xf32, #tpu.memory_space<vmem>>, vector<1x1x32xf32>,
    return
  }
  func.func @transform_0(%arg0: i32) -> (i32, i32) {
    %c0_i32 = arith.constant 0 : i32
    %c0_i32_0 = arith.constant 0 : i32
    return %arg0, %c0_i32 : i32, i32
  }
  func.func @transform_1(%arg0: i32) -> (i32, i32) {
    %c0_i32 = arith.constant 0 : i32
    %c0_i32_0 = arith.constant 0 : i32
    %c0_i32_1 = arith.constant 0 : i32
    return %c0_i32, %c0_i32_0 : i32, i32
  }
  func.func @transform_2(%arg0: i32) -> (i32, i32) {
    %c0_i32 = arith.constant 0 : i32
    %c0_i32_0 = arith.constant 0 : i32
    %c0_i32_1 = arith.constant 0 : i32
    return %c0_i32, %c0_i32_0 : i32, i32
  }
  func.func @transform_3(%arg0: i32) -> (i32, i32) {
    %c0_i32 = arith.constant 0 : i32
    %c0_i32_0 = arith.constant 0 : i32
    %c0_i32_1 = arith.constant 0 : i32
    return %c0_i32, %c0_i32_0 : i32, i32
  }
  func.func @transform_4(%arg0: i32) -> (i32, i32, i32, i32) {
    %c0_i32 = arith.constant 0 : i32
    %c0_i32_0 = arith.constant 0 : i32
    %c0_i32_1 = arith.constant 0 : i32
    %c0_i32_2 = arith.constant 0 : i32
    %c0_i32_3 = arith.constant 0 : i32
    return %c0_i32, %c0_i32_0, %c0_i32_1, %c0_i32_2 : i32, i32, i32, i32
  }
  func.func @transform_5(%arg0: i32) -> (i32, i32, i32, i32) {
    %c0_i32 = arith.constant 0 : i32
    %c0_i32_0 = arith.constant 0 : i32
    %c0_i32_1 = arith.constant 0 : i32
    %c0_i32_2 = arith.constant 0 : i32
    %c0_i32_3 = arith.constant 0 : i32
    return %c0_i32, %c0_i32_0, %c0_i32_1, %c0_i32_2 : i32, i32, i32, i32
  }
  func.func @transform_6(%arg0: i32) -> (i32, i32, i32, i32) {
    %c0_i32 = arith.constant 0 : i32
    %c0_i32_0 = arith.constant 0 : i32
    %c0_i32_1 = arith.constant 0 : i32
    %c0_i32_2 = arith.constant 0 : i32
    %c0_i32_3 = arith.constant 0 : i32
    return %c0_i32, %c0_i32_0, %c0_i32_1, %c0_i32_2 : i32, i32, i32, i32
  }
  func.func @transform_7(%arg0: i32) -> (i32, i32, i32, i32) {
    %c0_i32 = arith.constant 0 : i32
    %c0_i32_0 = arith.constant 0 : i32
    %c0_i32_1 = arith.constant 0 : i32
    %c0_i32_2 = arith.constant 0 : i32
    %c0_i32_3 = arith.constant 0 : i32
    return %c0_i32, %c0_i32_0, %c0_i32_1, %c0_i32_2 : i32, i32, i32, i32
  }
  func.func @transform_8(%arg0: i32) -> (i32, i32, i32) {
    %c0_i32 = arith.constant 0 : i32
    %c0_i32_0 = arith.constant 0 : i32
    %c0_i32_1 = arith.constant 0 : i32
    %c0_i32_2 = arith.constant 0 : i32
    return %c0_i32, %c0_i32_0, %c0_i32_1 : i32, i32, i32
  }
  func.func @transform_9(%arg0: i32) -> (i32, i32, i32) {
    %c0_i32 = arith.constant 0 : i32
    %c0_i32_0 = arith.constant 0 : i32
    %c0_i32_1 = arith.constant 0 : i32
    %c0_i32_2 = arith.constant 0 : i32
    return %c0_i32, %c0_i32_0, %c0_i32_1 : i32, i32, i32
  }
  func.func @transform_10(%arg0: i32) -> (i32, i32, i32) {
    %c0_i32 = arith.constant 0 : i32
    %c0_i32_0 = arith.constant 0 : i32
    %c0_i32_1 = arith.constant 0 : i32
    %c0_i32_2 = arith.constant 0 : i32
    return %c0_i32, %c0_i32_0, %c0_i32_1 : i32, i32, i32
  }
  func.func @transform_11(%arg0: i32) -> (i32, i32, i32) {
    %c0_i32 = arith.constant 0 : i32
    %c0_i32_0 = arith.constant 0 : i32
    %c0_i32_1 = arith.constant 0 : i32
    %c0_i32_2 = arith.constant 0 : i32
    return %c0_i32, %c0_i32_0, %c0_i32_1 : i32, i32, i32
  }
  func.func @transform_12(%arg0: i32) -> (i32, i32, i32) {
    %c0_i32 = arith.constant 0 : i32
    %c0_i32_0 = arith.constant 0 : i32
    %c0_i32_1 = arith.constant 0 : i32
    %c0_i32_2 = arith.constant 0 : i32
    return %c0_i32, %c0_i32_0, %c0_i32_1 : i32, i32, i32
  }
  func.func @transform_13(%arg0: i32) -> (i32, i32, i32) {
    %c0_i32 = arith.constant 0 : i32
    %c0_i32_0 = arith.constant 0 : i32
    %c0_i32_1 = arith.constant 0 : i32
    %c0_i32_2 = arith.constant 0 : i32
    return %c0_i32, %c0_i32_0, %c0_i32_1 : i32, i32, i32
  }
  func.func @transform_14(%arg0: i32) -> (i32, i32, i32) {
    %c0_i32 = arith.constant 0 : i32
    %c0_i32_0 = arith.constant 0 : i32
    %c0_i32_1 = arith.constant 0 : i32
    %c0_i32_2 = arith.constant 0 : i32
    return %c0_i32, %c0_i32_0, %c0_i32_1 : i32, i32, i32
  }
  func.func @transform_15(%arg0: i32) -> (i32, i32, i32) {
    %c0_i32 = arith.constant 0 : i32
    %c0_i32_0 = arith.constant 0 : i32
    %c0_i32_1 = arith.constant 0 : i32
    %c0_i32_2 = arith.constant 0 : i32
    return %c0_i32, %c0_i32_0, %c0_i32_1 : i32, i32, i32
  }
  func.func @transform_16(%arg0: i32) -> (i32, i32, i32) {
    %c0_i32 = arith.constant 0 : i32
    %c0_i32_0 = arith.constant 0 : i32
    %c0_i32_1 = arith.constant 0 : i32
    return %arg0, %c0_i32, %c0_i32_0 : i32, i32, i32
  }
}

</mosaic_0001>

<bundles_post_ra>
// kernel: encoder_forward.1
= control target key start
LH: loop header
LB: loop body
LE: loop exit
PB: predicated region body
PF: predicated region fallthrough
CT: control target
= control target key end

     0   :  { %s4820_s0 = inlined_call_operand.vmem [shape: f32[32,768], index: 0, kind: input, shape index: {}]   ;;  %s4821_s1 = inlined_call_operand.vmem [shape: f32[32,768], index: 1, kind: input, shape index: {}]   ;;  %s4822_s2 = inlined_call_operand.vmem [shape: f32[1,32], index: 2, kind: input, shape index: {}]   ;;  %s4823_s3 = inlined_call_operand.vmem [shape: f32[16,32], index: 3, kind: input, shape index: {}]   ;;  %s4824_s4 = inlined_call_operand.vmem [shape: f32[2,4,32,8], index: 4, kind: input, shape index: {}]   ;;  %s4825_s5 = inlined_call_operand.vmem [shape: f32[2,4,32,8], index: 5, kind: input, shape index: {}]   ;;  %s4826_s6 = inlined_call_operand.vmem [shape: f32[2,4,32,8], index: 6, kind: input, shape index: {}]   ;;  %s4827_s7 = inlined_call_operand.vmem [shape: f32[2,4,8,32], index: 7, kind: input, shape index: {}]   ;;  %s4828_s8 = inlined_call_operand.vmem [shape: f32[2,1,32], index: 8, kind: input, shape index: {}]   ;;  %s4829_s9 = inlined_call_operand.vmem [shape: f32[2,1,32], index: 9, kind: input, shape index: {}]   ;;  %s4830_s10 = inlined_call_operand.vmem [shape: f32[2,32,64], index: 10, kind: input, shape index: {}]   ;;  %s4831_s11 = inlined_call_operand.vmem [shape: f32[2,1,64], index: 11, kind: input, shape index: {}]   ;;  %s4832_s12 = inlined_call_operand.vmem [shape: f32[2,64,32], index: 12, kind: input, shape index: {}]   ;;  %s4833_s13 = inlined_call_operand.vmem [shape: f32[2,1,32], index: 13, kind: input, shape index: {}]   ;;  %s4834_s14 = inlined_call_operand.vmem [shape: f32[2,1,32], index: 14, kind: input, shape index: {}]   ;;  %s4835_s15 = inlined_call_operand.vmem [shape: f32[2,1,32], index: 15, kind: input, shape index: {}]   ;;  %s4836_s16 = inlined_call_operand.hbm [shape: f32[2,2,32], index: 16, kind: output, shape index: {}]  }
   0x1   :  { %4844 = sst [smem:[#allocation11_spill]] %s4820_s0 }
   0x2   :  { %4845 = sst [smem:[#allocation12_spill]] %s4821_s1 }
   0x3   :  { %4846 = sst [smem:[#allocation13_spill]] %s4836_s16 }
   0x4   :  { %21 = vsyncpa [#allocation3], 0 }
   0x5   :  { %23 = vsyncpa [#allocation3 + $0x1], 0  ;;  %s3893_s21 = smov 0   ;;  %s3895_s22 = smov 0  }
   0x6   :  { %s3897_s23 = smov 0   ;;  %s3899_s24 = smov 0  }
   0x7 LB: > { %4847 = sst [smem:[#allocation5_spill]] %s3791_s21  ;;  %s3348_s25 = sadd.s32 4294967295, %s3803_s24   ;;  %s3803_s24 = sphi %s3899_s24, %s4862_s24   ;;  %s3799_s23 = sphi %s3897_s23, %s4864_s23   ;;  %s3795_s22 = sphi %s3895_s22, %s4866_s22   ;;  %s3791_s21 = sphi %s3893_s21, %s4865_s21  }
   0x8   : > { %4848 = sst [smem:[#allocation6_spill]] %s3799_s23  ;;  %s3349_s26 = sadd.s32 4294967294, %s3803_s24  }
   0x9   : > { %4849 = sst [smem:[#allocation7_spill]] %s3803_s24  ;;  %s3916_s27 = sadd.s32 1, %s3803_s24  }
   0xa   : > { %4850 = sst [smem:[#allocation8_spill]] %s3916_s27  ;;  %s377_s28 = sadd.s32 1, %s3799_s23 }
   0xb   : > { %s374_s29 = ssub.s32 %s3803_s24, %s3916_s27  ;;  %p387_p0 = scmp.ne.s32.totalorder %s3799_s23, %s3795_s22 }
   0xc   : > { %p375_p1 = scmp.eq.s32.totalorder %s374_s29, 0  ;;  %p388_p2 = scmp.eq.s32.totalorder %s3348_s25, 1 }
   0xd   : > { %p393_p3 = scmp.ne.s32.totalorder %s3795_s22, %s3791_s21  ;;  %p394_p4 = scmp.eq.s32.totalorder %s3349_s26, 1 }
   0xe   : > { %s3926_s30 = scalar_select %p375_p1, %s3799_s23, %s377_s28  }
   0xf   : > { %p3928_p5 = por %p388_p2, %p387_p0  ;;  %p3932_p6 = por %p394_p4, %p393_p3 }
  0x10   : > { %4851 = sst [smem:[#allocation9_spill]] %s3926_s30  ;;  %p3352_p7 = scmp.ge.s32.totalorder %s3803_s24, 1 }
  0x11   : > { %s4853_s17 = scalar_select %p3932_p6, 1, 0 }
  0x12   : > { %p467_p8 = scmp.lt.s32.totalorder %s3803_s24, 3 }
  0x13   : > { %4854 = sst [smem:[#allocation10_spill]] %s4853_s17 }
  0x14   : > { %p468_p9 = pnand %p3352_p7, %p467_p8 }
  0x15   : > { %s4855_s1 = sld [smem:[#allocation12_spill]] (!%p468_p9)  ;;  %s3947_s30 = sshll.u32 (!%p468_p9), %s3348_s25, 1 }
  0x16   : > { %471 = sbr.rel (%p468_p9) target bundleno = 6657 (0x1a01), region = 84  ;;  %p519_p10 = scmp.lt.s32.totalorder (!%p468_p9), %s3947_s30, 3 }
  0x17   : > { %s4856_s24 = sld [smem:[#allocation11_spill]] (!%p468_p9)  ;;  %s515_s18 = sand.u32 (!%p468_p9), 1, %s3795_s22  }
  0x18   : > { %s3353_s19 = sshll.u32 (!%p468_p9), %s515_s18, 1  ;;  %s4857_s21 = sld [smem:[#allocation13_spill]] (!%p468_p9) }
  0x19   : > { %s517_s20 = scalar_lea.vmem (!%p468_p9), [#allocation2], %s3353_s19  ;;  %s3275_s17 = scalar_lea.sflag (!%p468_p9), [#allocation3], %s515_s18 }
  0x1b   : > { %v555_v0 = vld [vmem:[%s4855_s1 + $0x90] sm:$0xff]  ;;  %v557_v1 = vld [vmem:[%s4855_s1 + $0xa0] sm:$0xff]  ;;  %v556_v2 = vld [vmem:[%s4855_s1 + $0x98] sm:$0xff]  ;;  %s520_s23 = scalar_select %p519_p10, %s3947_s30, 3  ;;  %vm715_vm1 = vcmask 261120   ;;  %vm799_vm3 = vcmask 64512  }
  0x1c   : > { %577 = vmatpush.xpose.msra.mxu0 %v555_v0  ;;  %623 = vmatpush.xpose.msra.mxu2 %v557_v1  ;;  %v558_v3 = vld [vmem:[%s4855_s1 + $0xa8] sm:$0xff]  ;;  %v549_v4 = vld [vmem:[%s4855_s1 + $0x60] sm:$0xff]  ;;  %v551_v5 = vld [vmem:[%s4855_s1 + $0x70] sm:$0xff] }
  0x1d   : > { %600 = vmatpush.xpose.msra.mxu1 %v556_v2  ;;  %646 = vmatpush.xpose.msra.mxu3 %v558_v3  ;;  %v550_v6 = vld [vmem:[%s4855_s1 + $0x68] sm:$0xff]  ;;  %v552_v7 = vld [vmem:[%s4855_s1 + $0x78] sm:$0xff]  ;;  %s3589_s27 = smul.u32 48, %s520_s23  ;;  %v543_v8 = vld [vmem:[%s4855_s1 + $0x30] sm:$0xff] }
  0x1e   : > { %v545_v9 = vld [vmem:[%s4855_s1 + $0x40] sm:$0xff]  ;;  %v544_v10 = vld [vmem:[%s4855_s1 + $0x38] sm:$0xff]  ;;  %v546_v11 = vld [vmem:[%s4855_s1 + $0x48] sm:$0xff] }
  0x1f   : > { %s3981_s16 = scalar_lea.vmem %s4856_s24, %s3589_s27  ;;  %v537_v12 = vld [vmem:[%s4855_s1] sm:$0xff]  ;;  %v539_v13 = vld [vmem:[%s4855_s1 + $0x10] sm:$0xff]  ;;  %v538_v14 = vld [vmem:[%s4855_s1 + $0x8] sm:$0xff]  ;;  %s4858_s27 = smov %s4857_s21 }
  0x20   : > { %578 = vmatpush.xpose.msra.mxu0 %v549_v4  ;;  %624 = vmatpush.xpose.msra.mxu2 %v551_v5  ;;  %v540_v15 = vld [vmem:[%s4855_s1 + $0x18] sm:$0xff]  ;;  %v559_v16 = vld [vmem:[%s4855_s1 + $0xb0] sm:$0xff]  ;;  %v525_v17 = vld [vmem:[%s3981_s16] sm:$0xff]  ;;  %s3285_s24 = scalar_lea.hbm %s4857_s21, %s3947_s30  ;;  %s3761_s30 = scalar_lea.hbm %s4858_s27, 4 }
  0x21   : > { %601 = vmatpush.xpose.msra.mxu1 %v550_v6  ;;  %647 = vmatpush.xpose.msra.mxu3 %v552_v7  ;;  %v527_v18 = vld [vmem:[%s3981_s16 + $0x10] sm:$0xff]  ;;  %v560_v19 = vld [vmem:[%s4855_s1 + $0xb8] sm:$0xff]  ;;  %v526_v20 = vld [vmem:[%s3981_s16 + $0x8] sm:$0xff]  ;;  %s3289_s28 = sshll.u32 %s3285_s24, 4  ;;  %s3290_s28 = int_to_ptr.hbm [resolvable:$true] %s3289_s28 }
  0x22   : > { %v528_v21 = vld [vmem:[%s3981_s16 + $0x18] sm:$0xff]  ;;  %v553_v22 = vld [vmem:[%s4855_s1 + $0x80] sm:$0xff]  ;;  %v554_v23 = vld [vmem:[%s4855_s1 + $0x88] sm:$0xff]  ;;  %s3755_s29 = sshra.s32 %s3290_s28, 4  ;;  %s3756_s29 = int_to_ptr.hbm [resolvable:$true] %s3755_s29 }
  0x23   : > { %v547_v24 = vld [vmem:[%s4855_s1 + $0x50] sm:$0xff]  ;;  %v548_v25 = vld [vmem:[%s4855_s1 + $0x58] sm:$0xff]  ;;  %v533_v27 = vld [vmem:[%s3981_s16 + $0x40] sm:$0xff]  ;;  %s3757_s23 = scalar_lea.hbm %s3756_s29, 2  ;;  %p3762_p0 = scmp.lt.s32.totalorder %s3756_s29, %s4858_s27 }
  0x24   : > { %579 = vmatpush.xpose.msra.mxu0 %v543_v8  ;;  %625 = vmatpush.xpose.msra.mxu2 %v545_v9  ;;  %v531_v26 = vld [vmem:[%s3981_s16 + $0x30] sm:$0xff]  ;;  %v532_v28 = vld [vmem:[%s3981_s16 + $0x38] sm:$0xff]  ;;  %v534_v29 = vld [vmem:[%s3981_s16 + $0x48] sm:$0xff]  ;;  %p3758_p11 = scmp.ne.s32.totalorder %s3756_s29, %s3757_s23  ;;  %p3763_p1 = scmp.lt.s32.totalorder %s3761_s30, %s3757_s23 }
  0x25   : > { %602 = vmatpush.xpose.msra.mxu1 %v544_v10  ;;  %648 = vmatpush.xpose.msra.mxu3 %v546_v11  ;;  %v541_v30 = vld [vmem:[%s4855_s1 + $0x20] sm:$0xff]  ;;  %v542_v31 = vld [vmem:[%s4855_s1 + $0x28] sm:$0xff]  ;;  %v535_v34 = vld [vmem:[%s3981_s16 + $0x50] sm:$0xff] }
  0x26   : > { %v529_v32 = vld [vmem:[%s3981_s16 + $0x20] sm:$0xff]  ;;  %v530_v33 = vld [vmem:[%s3981_s16 + $0x28] sm:$0xff]  ;;  %v536_v35 = vld [vmem:[%s3981_s16 + $0x58] sm:$0xff]  ;;  %s3287_s16 = sshll.u32 %s517_s20, 4  ;;  %p3759_p12 = pnand %p3758_p11, %p3928_p5  ;;  %s3288_s16 = int_to_ptr.vmem [resolvable:$true] %s3287_s16 }
  0x27   : > { %v714_v36 = vld [vmem:[%s4824_s4 + $0x18] sm:$0xff]  ;;  %v713_v39 = vld [vmem:[%s4824_s4 + $0x10] sm:$0xff]  ;;  %v712_v42 = vld [vmem:[%s4824_s4 + $0x8] sm:$0xff]  ;;  %p3764_p2 = por %p3763_p1, %p3762_p0 }
  0x28   : > { %580 = vmatpush.xpose.msra.mxu0 %v537_v12  ;;  %626 = vmatpush.xpose.msra.mxu2 %v539_v13  ;;  %v748_v37 = vld [vmem:[%s4825_s5 + $0x18] sm:$0xff]  ;;  %v747_v40 = vld [vmem:[%s4825_s5 + $0x10] sm:$0xff]  ;;  %v746_v43 = vld [vmem:[%s4825_s5 + $0x8] sm:$0xff]  ;;  %p3760_p13 = pneg %p3759_p12 }
  0x29   : > { %603 = vmatpush.xpose.msra.mxu1 %v538_v14  ;;  %649 = vmatpush.xpose.msra.mxu3 %v540_v15  ;;  %v775_v38 = vld [vmem:[%s4826_s6 + $0x18] sm:$0xff]  ;;  %v774_v41 = vld [vmem:[%s4826_s6 + $0x10] sm:$0xff]  ;;  %v773_v44 = vld [vmem:[%s4826_s6 + $0x8] sm:$0xff] }
  0x2a   : > { %v711_v45 = vld [vmem:[%s4824_s4] sm:$0xff]  ;;  %v3383_v53 = vld [vmem:[%s4826_s6 + $0x38] sm:$0xff]  ;;  %v3382_v54 = vld [vmem:[%s4826_s6 + $0x30] sm:$0xff]  ;;  %p3765_p3 = pnand %p3764_p2, %p3760_p13 }
  0x2b   : > { %581 = vmatmul.f32.vlgmr.msra.gmra.mxu0 %v525_v17  ;;  %627 = vmatmul.f32.vlgmr.msra.gmra.mxu2 %v527_v18  ;;  %v745_v46 = vld [vmem:[%s4825_s5] sm:$0xff]  ;;  %v3381_v58 = vld [vmem:[%s4826_s6 + $0x28] sm:$0xff] }
  0x2c   : > { %669 = vmatpush.xpose.msrb.mxu0 %v559_v16  ;;  %604 = vmatmul.f32.vlgmr.msra.gmra.mxu1 %v526_v20  ;;  %v772_v47 = vld [vmem:[%s4826_s6] sm:$0xff] }
  0x2d   : > { %692 = vmatpush.xpose.msrb.mxu1 %v560_v19  ;;  %650 = vmatmul.f32.vlgmr.msra.gmra.mxu3 %v528_v21  ;;  %v3642_v49 = vld [vmem:[%s4822_s2] ss:$0 sm:$0xff] }
  0x2e   : > { %734 = vmatpush.msrb.mxu2 %v714_v36  ;;  %761 = vmatpush.msrb.mxu3 %v748_v37  ;;  %v3380_v61 = vld [vmem:[%s4826_s6 + $0x20] sm:$0xff]  ;;  %v3375_v36 = vld [vmem:[%s4825_s5 + $0x28] sm:$0xff] }
  0x2f   : > { %v707_v14 = vld [vmem:[%s4823_s3] sm:$0xff] }
  0x30   : > { %670 = vmatpush.xpose.msrb.mxu0 %v553_v22  ;;  %735 = vmatpush.msrb.mxu2 %v713_v39  ;;  %v3374_v37 = vld [vmem:[%s4825_s5 + $0x20] sm:$0xff]  ;;  %v3805_v39 = vmov 5.656854  }
  0x31   : > { %693 = vmatpush.xpose.msrb.mxu1 %v554_v23  ;;  %762 = vmatpush.msrb.mxu3 %v747_v40  ;;  %3655 = vrcp.f32 %v3805_v39 }
  0x32   : > { %736 = vmatpush.msrb.mxu2 %v712_v42 }
  0x33   : > { %584 = vmatmul.f32.gmra.mxu0 %v531_v26  ;;  %630 = vmatmul.f32.gmra.mxu2 %v533_v27 }
  0x34   : > { %671 = vmatpush.xpose.msrb.mxu0 %v547_v24  ;;  %607 = vmatmul.f32.gmra.mxu1 %v532_v28  ;;  %v708_v24 = vld [vmem:[%s4823_s3 + $0x8] sm:$0xff] }
  0x35   : > { %694 = vmatpush.xpose.msrb.mxu1 %v548_v25  ;;  %653 = vmatmul.f32.gmra.mxu3 %v534_v29 }
  0x36   : > { %763 = vmatpush.msrb.mxu3 %v746_v43  ;;  %737 = vmatpush.msrb.mxu2 %v711_v45 }
  0x37   : > { %v3656_v40 = vpop.eup %3655 }
  0x38   : > { %672 = vmatpush.xpose.msrb.mxu0 %v541_v30  ;;  %764 = vmatpush.msrb.mxu3 %v745_v46  ;;  %vm831_vm4 = vweird.f32 %v3656_v40 }
  0x39   : > { %695 = vmatpush.xpose.msrb.mxu1 %v542_v31  ;;  %v3377_v31 = vld [vmem:[%s4825_s5 + $0x38] sm:$0xff] }
  0x3b   : > { %673 = vmatmul.f32.vlgmr.msrb.gmra.mxu0 %v529_v32 }
  0x3c   : > { %696 = vmatmul.f32.vlgmr.msrb.gmra.mxu1 %v530_v33  ;;  %788 = vmatpush.msra.mxu0 %v775_v38  ;;  %v3376_v33 = vld [vmem:[%s4825_s5 + $0x30] sm:$0xff] }
  0x3e   : > { %789 = vmatpush.msra.mxu0 %v774_v41  ;;  %v827_v41 = vmul.f32 5.656854, %v3656_v40 }
  0x40   : > { %790 = vmatpush.msra.mxu0 %v773_v44  ;;  %v828_v42 = vsub.f32 1.0, %v827_v41 }
  0x42   : > { %791 = vmatpush.msra.mxu0 %v772_v47  ;;  %v829_v43 = vmul.f32 %v3656_v40, %v828_v42 }
  0x43   : > { %676 = vmatmul.f32.gmra.mxu0 %v535_v34 }
  0x44   : > { %699 = vmatmul.f32.gmra.mxu1 %v536_v35  ;;  %1029 = vmatpush.msrb.mxu0 %v3383_v53  ;;  %v830_v44 = vadd.f32 %v3656_v40, %v829_v43 }
  0x46   : > { %1030 = vmatpush.msrb.mxu0 %v3382_v54  ;;  %v4130_v45 = vsel %vm831_vm4, %v3656_v40, %v830_v44 }
  0x48   : > { %1031 = vmatpush.msrb.mxu0 %v3381_v58 }
  0x4a   : > { %1032 = vmatpush.msrb.mxu0 %v3380_v61 }
  0xa8   : > { %v582_v48 = vpop.f32.mrf.mxu0 }
  0xa9   : > { %v605_v50 = vpop.f32.mrf.mxu1  ;;  %v583_v51 = vadd.f32 %v3642_v49, %v582_v48 }
  0xab   : > { %v606_v56 = vadd.f32 %v605_v50, %v583_v51 }
  0xae   : > { %v628_v52 = vpop.f32.mrf.mxu2 }
  0xaf   : > { %v629_v60 = vadd.f32 %v628_v52, %v606_v56 }
  0xb0   : > { %v585_v55 = vpop.f32.mrf.mxu0  ;;  %v651_v59 = vpop.f32.mrf.mxu3 }
  0xb1   : > { %v608_v57 = vpop.f32.mrf.mxu1  ;;  %v586_v62 = vadd.f32 %v3642_v49, %v585_v55  ;;  %v652_v63 = vadd.f32 %v651_v59, %v629_v60 }
  0xb3   : > { %v609_v2 = vadd.f32 %v608_v57, %v586_v62 }
  0xb6   : > { %v631_v0 = vpop.f32.mrf.mxu2 }
  0xb7   : > { %v632_v5 = vadd.f32 %v631_v0, %v609_v2  ;;  %v3370_v0 = vld [vmem:[%s4824_s4 + $0x30] sm:$0xff]  ;;  %v3368_v2 = vld [vmem:[%s4824_s4 + $0x20] sm:$0xff] }
  0xb8   : > { %v674_v1 = vpop.f32.mrf.mxu0  ;;  %v654_v7 = vpop.f32.mrf.mxu3 }
  0xb9   : > { %v675_v3 = vadd.f32 %v674_v1, %v652_v63  ;;  %v697_v4 = vpop.f32.mrf.mxu1  ;;  %v655_v10 = vadd.f32 %v654_v7, %v632_v5  ;;  %v3371_v63 = vld [vmem:[%s4824_s4 + $0x38] sm:$0xff]  ;;  %v3369_v1 = vld [vmem:[%s4824_s4 + $0x28] sm:$0xff] }
  0xbb   : > { %v698_v6 = vadd.f32 %v697_v4, %v675_v3 }
  0xbd   : > { %vm3590_vm0 = vcmp.lt.s32.totalorder %v698_v6, 0  ;;  %v3591_v8 = vceil.f32 %v698_v6  ;;  %v3592_v9 = vfloor.f32 %v698_v6 }
  0xbf   : > { %v3593_v11 = vsel %vm3590_vm0, %v3591_v8, %v3592_v9 }
  0xc0   : > { %v3594_v12 = vcvt.f32.s32 %v3593_v11  ;;  %v677_v13 = vpop.f32.mrf.mxu0 }
  0xc1   : > { %v678_v15 = vadd.f32 %v677_v13, %v655_v10  ;;  %v700_v16 = vpop.f32.mrf.mxu1 }
  0xc2   : > { %v705_v17 = vcvt.s32.f32 %v3594_v12 }
  0xc3   : > { %v701_v18 = vadd.f32 %v700_v16, %v678_v15 }
  0xc4   : > { %v4085_v19 = vadd.f32 %v707_v14, %v705_v17 }
  0xc5   : > { %vm3595_vm2 = vcmp.lt.s32.totalorder %v701_v18, 0  ;;  %v3596_v20 = vceil.f32 %v701_v18  ;;  %v3597_v21 = vfloor.f32 %v701_v18 }
  0xc6   : > { %3356 = vmatmul.msk.f32.vlgmr.msrb.gmra.mxu2 %vm715_vm1, %v4085_v19  ;;  %3358 = vmatmul.msk.f32.vlgmr.msrb.gmra.mxu3 %vm715_vm1, %v4085_v19 }
  0xc7   : > { %v3598_v22 = vsel %vm3595_vm2, %v3596_v20, %v3597_v21  ;;  %3360 = vmatmul.msk.f32.vlgmr.msra.gmra.mxu0 %vm715_vm1, %v4085_v19 }
  0xc8   : > { %v3599_v23 = vcvt.f32.s32 %v3598_v22 }
  0xca   : > { %v706_v25 = vcvt.s32.f32 %v3599_v23 }
  0xcc   : > { %v4096_v26 = vadd.f32 %v708_v24, %v706_v25 }
  0xce   : > { %3357 = vmatmul.msk.f32.gmra.mxu2 %vm715_vm1, %v4096_v26  ;;  %3359 = vmatmul.msk.f32.gmra.mxu3 %vm715_vm1, %v4096_v26 }
  0xcf   : > { %3361 = vmatmul.msk.f32.gmra.mxu0 %vm715_vm1, %v4096_v26 }
  0xd7   : > { %3384 = vmatmul.msk.f32.vlgmr.msrb.gmra.mxu0 %vm715_vm1, %v4085_v19 }
  0xdf   : > { %3385 = vmatmul.msk.f32.gmra.mxu0 %vm715_vm1, %v4096_v26 }
 0x144   : > { %v793_v27 = vpop.f32.mrf.mxu0 }
 0x145   : > { %876 = vmatpush.msra.mxu2 %v793_v27 }
 0x147   : > { %973 = vmatpush.msrb.mxu2 %v3371_v63 }
 0x149   : > { %v766_v28 = vpop.f32.mrf.mxu3  ;;  %v739_v29 = vpop.f32.mrf.mxu2  ;;  %974 = vmatpush.msrb.mxu2 %v3370_v0 }
 0x14a   : > { %3362 = vmatpush.xpose.msk.msra.mxu1 %vm799_vm3, %v766_v28 }
 0x14b   : > { %975 = vmatpush.msrb.mxu2 %v3369_v1 }
 0x14c   : > { %v796_v30 = vpop.f32.mrf.mxu0 }
 0x14d   : > { %3363 = vmatmul.msk.f32.vlgmr.msra.gmra.mxu1 %vm799_vm3, %v739_v29  ;;  %976 = vmatpush.msrb.mxu2 %v3368_v2 }
 0x14e   : > { %950 = vmatpush.msrb.mxu1 %v796_v30  ;;  %v3400_v30 = vld [vmem:[%s4824_s4 + $0x58] sm:$0xff] }
 0x151   : > { %v769_v32 = vpop.f32.mrf.mxu3  ;;  %v742_v34 = vpop.f32.mrf.mxu2 }
 0x152   : > { %3365 = vmatpush.xpose.msk.msra.mxu3 %vm799_vm3, %v769_v32  ;;  %v3398_v32 = vld [vmem:[%s4824_s4 + $0x48] sm:$0xff] }
 0x154   : > { %v4117_v35 = vpop.f32.mrf.mxu0 }
 0x155   : > { %3366 = vmatmul.msk.f32.vlgmr.msra.gmra.mxu3 %vm799_vm3, %v742_v34 }
 0x156   : > { %1001 = vmatpush.msrb.mxu3 %v3377_v31  ;;  %v3399_v31 = vld [vmem:[%s4824_s4 + $0x50] sm:$0xff] }
 0x158   : > { %1002 = vmatpush.msrb.mxu3 %v3376_v33  ;;  %v3397_v33 = vld [vmem:[%s4824_s4 + $0x40] sm:$0xff] }
 0x15a   : > { %1003 = vmatpush.msrb.mxu3 %v3375_v36 }
 0x15c   : > { %1004 = vmatpush.msrb.mxu3 %v3374_v37  ;;  %v1037_v38 = vpop.f32.mrf.mxu0 }
 0x15d   : > { %3378 = vmatmul.msk.f32.vlgmr.msrb.gmra.mxu3 %vm715_vm1, %v4085_v19 }
 0x15e   : > { %1183 = vmatpush.msra.mxu3 %v1037_v38 }
 0x165   : > { %3379 = vmatmul.msk.f32.gmra.mxu3 %vm715_vm1, %v4096_v26 }
 0x1ca   : > { %v823_v46 = vpop.f32.mrf.mxu1 }
 0x1cb   : > { %v833_v47 = vmul.f32 %v4130_v45, %v823_v46 }
 0x1cd   : > { %v834_v48 = vsel %vm799_vm3, %v833_v47, -inf }
 0x1ce   : > { %835 = vmax.xlane.f32.xlu0 %v834_v48 }
 0x1d8   : > { %v904_v49 = vpop.f32.mrf.mxu3 }
 0x1d9   : > { %v907_v50 = vmul.f32 %v904_v49, %v4130_v45 }
 0x1db   : > { %v908_v51 = vsel %vm799_vm3, %v907_v50, -inf }
 0x1dc   : > { %909 = vmax.xlane.f32.xlu1 %v908_v51 }
 0x1e0   : > { %v1006_v52 = vpop.f32.mrf.mxu3 }
 0x1e1   : > { %3386 = vmatpush.xpose.msk.msra.mxu1 %vm799_vm3, %v1006_v52 }
 0x1e8   : > { %v1009_v17 = vpop.f32.mrf.mxu3 }
 0x241   : > { %v836_v53 = vpop.xlane.xlu0 %835 }
 0x242   : > { %v837_v54 = vsub.f32 %v833_v47, %v836_v53 }
 0x244   : > { %v838_v55 = vmul.f32 1.442695, %v837_v54 }
 0x246   : > { %3657 = vpow2.f32 %v838_v55  ;;  %v955_v55 = vld [vmem:[%s4827_s7] sm:$0xff] }
 0x24c   : > { %v3658_v56 = vpop.eup %3657 }
 0x24d   : > { %v840_v57 = vsel %vm799_vm3, %v3658_v56, 0.0 }
 0x24e   : > { %841 = vadd.xlane.f32.xlu0 %v840_v57  ;;  %v3406_v57 = vld [vmem:[%s4825_s5 + $0x58] sm:$0xff] }
 0x24f   : > { %v910_v58 = vpop.xlane.xlu1 %909  ;;  %1293 = vmatpush.msrb.mxu3 %v3406_v57 }
 0x250   : > { %v911_v59 = vsub.f32 %v907_v50, %v910_v58  ;;  %v3405_v58 = vld [vmem:[%s4825_s5 + $0x50] sm:$0xff] }
 0x251   : > { %1294 = vmatpush.msrb.mxu3 %v3405_v58 }
 0x252   : > { %v912_v60 = vmul.f32 1.442695, %v911_v59  ;;  %v3404_v59 = vld [vmem:[%s4825_s5 + $0x48] sm:$0xff] }
 0x253   : > { %1295 = vmatpush.msrb.mxu3 %v3404_v59 }
 0x254   : > { %3659 = vpow2.f32 %v912_v60  ;;  %v3403_v60 = vld [vmem:[%s4825_s5 + $0x40] sm:$0xff] }
 0x255   : > { %1296 = vmatpush.msrb.mxu3 %v3403_v60 }
 0x25a   : > { %v3660_v61 = vpop.eup %3659 }
 0x25b   : > { %v914_v62 = vsel %vm799_vm3, %v3660_v61, 0.0 }
 0x25c   : > { %915 = vadd.xlane.f32.xlu1 %v914_v62 }
 0x2c1   : > { %v842_v3 = vpop.xlane.xlu0 %841 }
 0x2c2   : > { %3661 = vrcp.f32 %v842_v3  ;;  %v854_v7 = vand.u32 2147483648, %v842_v3  ;;  %v852_v9 = vand.u32 2147483647, %v842_v3  ;;  %vm848_vm6 = vweird.f32 %v842_v3 }
 0x2c4   : > { %v855_v12 = vor.u32 1.1754944e-38, %v854_v7  ;;  %vm853_vm8 = vcmp.eq.f32.partialorder %v852_v9, 8.507059e+37 }
 0x2c8   : > { %v3662_v4 = vpop.eup %3661 }
 0x2c9   : > { %v844_v5 = vmul.f32 %v3662_v4, %v842_v3  ;;  %vm849_vm5 = vweird.f32 %v3662_v4 }
 0x2ca   : > { %vm850_vm7 = vmor %vm848_vm6, %vm849_vm5 }
 0x2cb   : > { %v845_v6 = vsub.f32 1.0, %v844_v5 }
 0x2cd   : > { %v846_v8 = vmul.f32 %v3662_v4, %v845_v6 }
 0x2cf   : > { %v916_v10 = vpop.xlane.xlu1 %915  ;;  %v847_v11 = vadd.f32 %v3662_v4, %v846_v8 }
 0x2d0   : > { %3663 = vrcp.f32 %v916_v10  ;;  %v928_v21 = vand.u32 2147483648, %v916_v10  ;;  %v926_v23 = vand.u32 2147483647, %v916_v10  ;;  %vm922_vm10 = vweird.f32 %v916_v10 }
 0x2d1   : > { %v851_v13 = vsel %vm850_vm7, %v3662_v4, %v847_v11 }
 0x2d2   : > { %v856_v14 = vsel %vm853_vm8, %v855_v12, %v851_v13  ;;  %v929_v25 = vor.u32 1.1754944e-38, %v928_v21  ;;  %vm927_vm12 = vcmp.eq.f32.partialorder %v926_v23, 8.507059e+37  ;;  %v3392_v21 = vld [vmem:[%s4827_s7 + $0x8] sm:$0xff]  ;;  %v3411_v23 = vld [vmem:[%s4826_s6 + $0x50] sm:$0xff] }
 0x2d3   : > { %v857_v15 = vmul.f32 %v3658_v56, %v856_v14  ;;  %1211 = vmatpush.msra.mxu0 %v3392_v21 }
 0x2d5   : > { %3364 = vmatmul.msk.f32.vlgmr.msra.gmra.mxu2 %vm799_vm3, %v857_v15 }
 0x2d6   : > { %v3664_v16 = vpop.eup %3663  ;;  %3389 = vmatpush.xpose.msk.msra.mxu2 %vm799_vm3, %v1009_v17 }
 0x2d7   : > { %v918_v18 = vmul.f32 %v3664_v16, %v916_v10  ;;  %vm923_vm9 = vweird.f32 %v3664_v16 }
 0x2d8   : > { %vm924_vm11 = vmor %vm922_vm10, %vm923_vm9 }
 0x2d9   : > { %v919_v20 = vsub.f32 1.0, %v918_v18 }
 0x2db   : > { %v920_v22 = vmul.f32 %v3664_v16, %v919_v20 }
 0x2dd   : > { %v921_v24 = vadd.f32 %v3664_v16, %v920_v22  ;;  %3372 = vmatmul.msk.f32.vlgmr.msrb.gmra.mxu2 %vm715_vm1, %v4085_v19  ;;  %v3412_v22 = vld [vmem:[%s4826_s6 + $0x58] sm:$0xff] }
 0x2de   : > { %1265 = vmatpush.msrb.mxu2 %v3400_v30  ;;  %1321 = vmatpush.msrb.mxu0 %v3412_v22  ;;  %v3431_v30 = vld [vmem:[%s4825_s5 + $0x68] sm:$0xff] }
 0x2df   : > { %v925_v27 = vsel %vm924_vm11, %v3664_v16, %v921_v24  ;;  %v3410_v24 = vld [vmem:[%s4826_s6 + $0x48] sm:$0xff] }
 0x2e0   : > { %v930_v28 = vsel %vm927_vm12, %v929_v25, %v925_v27  ;;  %1266 = vmatpush.msrb.mxu2 %v3399_v31  ;;  %1322 = vmatpush.msrb.mxu0 %v3411_v23  ;;  %v3409_v25 = vld [vmem:[%s4826_s6 + $0x40] sm:$0xff] }
 0x2e1   : > { %v931_v29 = vmul.f32 %v3660_v61, %v930_v28  ;;  %v3433_v28 = vld [vmem:[%s4825_s5 + $0x78] sm:$0xff]  ;;  %v3430_v31 = vld [vmem:[%s4825_s5 + $0x60] sm:$0xff] }
 0x2e2   : > { %1267 = vmatpush.msrb.mxu2 %v3398_v32  ;;  %1323 = vmatpush.msrb.mxu0 %v3410_v24 }
 0x2e3   : > { %3367 = vmatmul.msk.f32.vlgmr.msrb.gmra.mxu1 %vm799_vm3, %v931_v29  ;;  %v3432_v29 = vld [vmem:[%s4825_s5 + $0x70] sm:$0xff] }
 0x2e4   : > { %1109 = vmatpush.msrb.mxu1 %v4117_v35  ;;  %1268 = vmatpush.msrb.mxu2 %v3397_v33 }
 0x2e5   : > { %3373 = vmatmul.msk.f32.gmra.mxu2 %vm715_vm1, %v4096_v26  ;;  %1324 = vmatpush.msrb.mxu0 %v3409_v25 }
 0x358   : > { %v4171_v34 = vpop.f32.mrf.mxu2 }
 0x360   : > { %v978_v35 = vpop.f32.mrf.mxu2  ;;  %v4179_v37 = vpop.f32.mrf.mxu1 }
 0x361   : > { %3387 = vmatmul.msk.f32.vlgmr.msra.gmra.mxu1 %vm799_vm3, %v978_v35  ;;  %v3427_v35 = vld [vmem:[%s4824_s4 + $0x78] sm:$0xff] }
 0x362   : > { %1240 = vmatpush.msra.mxu1 %v955_v55 }
 0x368   : > { %v981_v36 = vpop.f32.mrf.mxu2 }
 0x369   : > { %3390 = vmatmul.msk.f32.vlgmr.msra.gmra.mxu2 %vm799_vm3, %v981_v36 }
 0x371   : > { %3401 = vmatmul.msk.f32.vlgmr.msrb.gmra.mxu2 %vm715_vm1, %v4085_v19 }
 0x379   : > { %3402 = vmatmul.msk.f32.gmra.mxu2 %vm715_vm1, %v4096_v26 }
 0x3de   : > { %v1063_v38 = vpop.f32.mrf.mxu1 }
 0x3df   : > { %v1066_v39 = vmul.f32 %v1063_v38, %v4130_v45 }
 0x3e1   : > { %v1067_v40 = vsel %vm799_vm3, %v1066_v39, -inf }
 0x3e2   : > { %1068 = vmax.xlane.f32.xlu0 %v1067_v40  ;;  %v3424_v40 = vld [vmem:[%s4824_s4 + $0x60] sm:$0xff] }
 0x3ec   : > { %v1137_v41 = vpop.f32.mrf.mxu2 }
 0x3ed   : > { %v1140_v42 = vmul.f32 %v1137_v41, %v4130_v45 }
 0x3ef   : > { %v1141_v43 = vsel %vm799_vm3, %v1140_v42, -inf }
 0x3f0   : > { %1142 = vmax.xlane.f32.xlu2 %v1141_v43 }
 0x455   : > { %v1069_v44 = vpop.xlane.xlu0 %1068 }
 0x456   : > { %v1070_v46 = vsub.f32 %v1066_v39, %v1069_v44  ;;  %v3425_v39 = vld [vmem:[%s4824_s4 + $0x68] sm:$0xff] }
 0x458   : > { %v1071_v47 = vmul.f32 1.442695, %v1070_v46 }
 0x45a   : > { %3665 = vpow2.f32 %v1071_v47 }
 0x460   : > { %v3666_v48 = vpop.eup %3665 }
 0x461   : > { %v1073_v49 = vsel %vm799_vm3, %v3666_v48, 0.0 }
 0x462   : > { %1074 = vadd.xlane.f32.xlu1 %v1073_v49 }
 0x463   : > { %v1143_v50 = vpop.xlane.xlu2 %1142 }
 0x464   : > { %v1144_v51 = vsub.f32 %v1140_v42, %v1143_v50 }
 0x466   : > { %v1145_v52 = vmul.f32 1.442695, %v1144_v51 }
 0x468   : > { %3667 = vpow2.f32 %v1145_v52 }
 0x46e   : > { %v3668_v53 = vpop.eup %3667 }
 0x46f   : > { %v1147_v54 = vsel %vm799_vm3, %v3668_v53, 0.0 }
 0x470   : > { %1148 = vadd.xlane.f32.xlu2 %v1147_v54 }
 0x4d5   : > { %v1075_v56 = vpop.xlane.xlu1 %1074 }
 0x4d6   : > { %3669 = vrcp.f32 %v1075_v56  ;;  %v1087_v0 = vand.u32 2147483648, %v1075_v56  ;;  %v1085_v2 = vand.u32 2147483647, %v1075_v56  ;;  %vm1081_vm14 = vweird.f32 %v1075_v56 }
 0x4d8   : > { %v1088_v5 = vor.u32 1.1754944e-38, %v1087_v0  ;;  %vm1086_vm0 = vcmp.eq.f32.partialorder %v1085_v2, 8.507059e+37 }
 0x4dc   : > { %v3670_v61 = vpop.eup %3669 }
 0x4dd   : > { %v1077_v62 = vmul.f32 %v3670_v61, %v1075_v56  ;;  %vm1082_vm13 = vweird.f32 %v3670_v61 }
 0x4de   : > { %vm1083_vm15 = vmor %vm1081_vm14, %vm1082_vm13 }
 0x4df   : > { %v1078_v63 = vsub.f32 1.0, %v1077_v62 }
 0x4e1   : > { %v1079_v1 = vmul.f32 %v3670_v61, %v1078_v63 }
 0x4e3   : > { %v1080_v3 = vadd.f32 %v3670_v61, %v1079_v1  ;;  %v1149_v4 = vpop.xlane.xlu2 %1148 }
 0x4e4   : > { %3671 = vrcp.f32 %v1149_v4  ;;  %v1161_v12 = vand.u32 2147483648, %v1149_v4  ;;  %v1159_v14 = vand.u32 2147483647, %v1149_v4  ;;  %vm1155_vm4 = vweird.f32 %v1149_v4 }
 0x4e5   : > { %v1084_v6 = vsel %vm1083_vm15, %v3670_v61, %v1080_v3 }
 0x4e6   : > { %v1089_v7 = vsel %vm1086_vm0, %v1088_v5, %v1084_v6  ;;  %v1162_v16 = vor.u32 1.1754944e-38, %v1161_v12  ;;  %vm1160_vm6 = vcmp.eq.f32.partialorder %v1159_v14, 8.507059e+37  ;;  %v3437_v12 = vld [vmem:[%s4826_s6 + $0x68] sm:$0xff] }
 0x4e7   : > { %v1090_v8 = vmul.f32 %v3666_v48, %v1089_v7 }
 0x4e9   : > { %3388 = vmatmul.msk.f32.vlgmr.msrb.gmra.mxu1 %vm799_vm3, %v1090_v8  ;;  %v3421_v8 = vld [vmem:[%s4827_s7 + $0x10] sm:$0xff] }
 0x4ea   : > { %v3672_v9 = vpop.eup %3671 }
 0x4eb   : > { %v1151_v10 = vmul.f32 %v3672_v9, %v1149_v4  ;;  %vm1156_vm2 = vweird.f32 %v3672_v9 }
 0x4ec   : > { %vm1157_vm5 = vmor %vm1155_vm4, %vm1156_vm2 }
 0x4ed   : > { %v1152_v11 = vsub.f32 1.0, %v1151_v10  ;;  %v3439_v10 = vld [vmem:[%s4826_s6 + $0x78] sm:$0xff] }
 0x4ef   : > { %v1153_v13 = vmul.f32 %v3672_v9, %v1152_v11  ;;  %v3438_v11 = vld [vmem:[%s4826_s6 + $0x70] sm:$0xff] }
 0x4f1   : > { %v1154_v15 = vadd.f32 %v3672_v9, %v1153_v13  ;;  %3395 = vmatmul.msk.f32.vlgmr.msra.gmra.mxu1 %vm799_vm3, %v4171_v34  ;;  %v1270_v34 = vpop.f32.mrf.mxu2  ;;  %v3436_v13 = vld [vmem:[%s4826_s6 + $0x60] sm:$0xff] }
 0x4f3   : > { %v1158_v17 = vsel %vm1157_vm5, %v3672_v9, %v1154_v15 }
 0x4f4   : > { %v1163_v18 = vsel %vm1160_vm6, %v1162_v16, %v1158_v17 }
 0x4f5   : > { %v1164_v20 = vmul.f32 %v3668_v53, %v1163_v18 }
 0x4f7   : > { %3391 = vmatmul.msk.f32.vlgmr.msra.gmra.mxu3 %vm799_vm3, %v1164_v20 }
 0x4f9   : > { %3396 = vmatmul.msk.f32.gmra.mxu1 %vm799_vm3, %v4179_v37  ;;  %v3426_v37 = vld [vmem:[%s4824_s4 + $0x70] sm:$0xff]  ;;  %v1273_v38 = vpop.f32.mrf.mxu2 }
 0x4ff   : > { %3407 = vmatmul.msk.f32.vlgmr.msrb.gmra.mxu3 %vm715_vm1, %v4085_v19 }
 0x507   : > { %3408 = vmatmul.msk.f32.gmra.mxu3 %vm715_vm1, %v4096_v26 }
 0x566   : > { %v1111_v27 = vpop.f32.mrf.mxu1 }
 0x567   : > { %3393 = vmatmul.msk.f32.vlgmr.msra.gmra.mxu0 %vm799_vm3, %v1111_v27 }
 0x568   : > { %1558 = vmatpush.msra.mxu0 %v3433_v28 }
 0x56a   : > { %1559 = vmatpush.msra.mxu0 %v3432_v29 }
 0x56c   : > { %1560 = vmatpush.msra.mxu0 %v3431_v30 }
 0x56e   : > { %1561 = vmatpush.msra.mxu0 %v3430_v31  ;;  %v4269_v41 = vpop.f32.mrf.mxu1 }
 0x576   : > { %v1245_v43 = vpop.f32.mrf.mxu1 }
 0x57a   : > { %v1185_v32 = vpop.f32.mrf.mxu3 }
 0x57b   : > { %3394 = vmatmul.msk.f32.gmra.mxu0 %vm799_vm3, %v1185_v32 }
 0x582   : > { %v1298_v33 = vpop.f32.mrf.mxu3 }
 0x583   : > { %3413 = vmatmul.msk.f32.vlgmr.msrb.gmra.mxu0 %vm715_vm1, %v4085_v19  ;;  %3415 = vmatpush.xpose.msk.msrb.mxu1 %vm799_vm3, %v1298_v33 }
 0x586   : > { %3416 = vmatmul.msk.f32.vlgmr.msrb.gmra.mxu1 %vm799_vm3, %v1270_v34 }
 0x58a   : > { %v1301_v36 = vpop.f32.mrf.mxu3 }
 0x58b   : > { %3414 = vmatmul.msk.f32.gmra.mxu0 %vm715_vm1, %v4096_v26  ;;  %3418 = vmatpush.xpose.msk.msra.mxu3 %vm799_vm3, %v1301_v36 }
 0x58e   : > { %3419 = vmatmul.msk.f32.vlgmr.msra.gmra.mxu3 %vm799_vm3, %v1273_v38 }
 0x58f   : > { %1530 = vmatpush.msrb.mxu3 %v3427_v35 }
 0x591   : > { %1531 = vmatpush.msrb.mxu3 %v3426_v37 }
 0x593   : > { %1532 = vmatpush.msrb.mxu3 %v3425_v39  ;;  %3434 = vmatmul.msk.f32.vlgmr.msra.gmra.mxu0 %vm715_vm1, %v4085_v19 }
 0x595   : > { %1533 = vmatpush.msrb.mxu3 %v3424_v40 }
 0x596   : > { %3428 = vmatmul.msk.f32.vlgmr.msrb.gmra.mxu3 %vm715_vm1, %v4085_v19 }
 0x59b   : > { %3435 = vmatmul.msk.f32.gmra.mxu0 %vm715_vm1, %v4096_v26 }
 0x59e   : > { %3429 = vmatmul.msk.f32.gmra.mxu3 %vm715_vm1, %v4096_v26 }
 0x5e4   : > { %v4271_v42 = vpop.f32.mrf.mxu0 }
 0x5f8   : > { %v1216_v44 = vpop.f32.mrf.mxu0 }
 0x5f9   : > { %v4273_v46 = vadd.f32 %v1245_v43, %v1216_v44 }
 0x600   : > { %v1326_v47 = vpop.f32.mrf.mxu0 }
 0x601   : > { %1401 = vmatpush.msra.mxu2 %v1326_v47  ;;  %v1243_v47 = vadd.f32 %v4269_v41, %v4271_v42 }
 0x603   : > { %v1355_v48 = vpop.f32.mrf.mxu1  ;;  %1503 = vmatpush.msrb.mxu2 %v3421_v8 }
 0x604   : > { %v1358_v49 = vmul.f32 %v1355_v48, %v4130_v45 }
 0x606   : > { %v1359_v50 = vsel %vm799_vm3, %v1358_v49, -inf }
 0x607   : > { %1360 = vmax.xlane.f32.xlu2 %v1359_v50 }
 0x608   : > { %v1329_v51 = vpop.f32.mrf.mxu0 }
 0x609   : > { %1475 = vmatpush.msra.mxu1 %v1329_v51 }
 0x60b   : > { %1586 = vmatpush.msrb.mxu1 %v3439_v10 }
 0x60d   : > { %1587 = vmatpush.msrb.mxu1 %v3438_v11 }
 0x60f   : > { %1588 = vmatpush.msrb.mxu1 %v3437_v12 }
 0x610   : > { %v1563_v52 = vpop.f32.mrf.mxu0 }
 0x611   : > { %v1429_v53 = vpop.f32.mrf.mxu3  ;;  %1589 = vmatpush.msrb.mxu1 %v3436_v13 }
 0x612   : > { %v1432_v54 = vmul.f32 %v1429_v53, %v4130_v45 }
 0x614   : > { %v1433_v55 = vsel %vm799_vm3, %v1432_v54, -inf }
 0x615   : > { %1434 = vmax.xlane.f32.xlu0 %v1433_v55 }
 0x618   : > { %v1566_v56 = vpop.f32.mrf.mxu0 }
 0x619   : > { %v4279_v57 = vpop.f32.mrf.mxu3  ;;  %3445 = vmatpush.xpose.msk.msrb.mxu0 %vm799_vm3, %v1566_v56 }
 0x621   : > { %v1538_v58 = vpop.f32.mrf.mxu3 }
 0x622   : > { %3446 = vmatmul.msk.f32.vlgmr.msrb.gmra.mxu0 %vm799_vm3, %v1538_v58 }
 0x67a   : > { %v1361_v59 = vpop.xlane.xlu2 %1360 }
 0x67b   : > { %v1362_v60 = vsub.f32 %v1358_v49, %v1361_v59 }
 0x67d   : > { %v1363_v61 = vmul.f32 1.442695, %v1362_v60 }
 0x67f   : > { %3673 = vpow2.f32 %v1363_v61 }
 0x685   : > { %v3674_v62 = vpop.eup %3673 }
 0x686   : > { %v1365_v63 = vsel %vm799_vm3, %v3674_v62, 0.0 }
 0x687   : > { %1366 = vadd.xlane.f32.xlu1 %v1365_v63 }
 0x688   : > { %v1435_v0 = vpop.xlane.xlu0 %1434 }
 0x689   : > { %v1436_v1 = vsub.f32 %v1432_v54, %v1435_v0 }
 0x68b   : > { %v1437_v2 = vmul.f32 1.442695, %v1436_v1 }
 0x68d   : > { %3675 = vpow2.f32 %v1437_v2 }
 0x693   : > { %v3676_v3 = vpop.eup %3675 }
 0x694   : > { %v1439_v4 = vsel %vm799_vm3, %v3676_v3, 0.0 }
 0x695   : > { %1440 = vadd.xlane.f32.xlu2 %v1439_v4 }
 0x69f   : > { %v1694_v5 = vpop.f32.mrf.mxu0 }
 0x6a0   : > { %v4286_v6 = vmul.f32 %v1694_v5, %v4130_v45 }
 0x6a2   : > { %v1698_v7 = vsel %vm799_vm3, %v4286_v6, -inf }
 0x6a3   : > { %1699 = vmax.xlane.f32.xlu2 %v1698_v7 }
 0x6fa   : > { %v1367_v9 = vpop.xlane.xlu1 %1366 }
 0x6fb   : > { %3677 = vrcp.f32 %v1367_v9  ;;  %v1379_v17 = vand.u32 2147483648, %v1367_v9  ;;  %v1377_v20 = vand.u32 2147483647, %v1367_v9  ;;  %vm1373_vm8 = vweird.f32 %v1367_v9 }
 0x6fd   : > { %v1380_v23 = vor.u32 1.1754944e-38, %v1379_v17  ;;  %vm1378_vm10 = vcmp.eq.f32.partialorder %v1377_v20, 8.507059e+37 }
 0x701   : > { %v3678_v14 = vpop.eup %3677 }
 0x702   : > { %v1369_v15 = vmul.f32 %v3678_v14, %v1367_v9  ;;  %vm1374_vm7 = vweird.f32 %v3678_v14 }
 0x703   : > { %vm1375_vm9 = vmor %vm1373_vm8, %vm1374_vm7 }
 0x704   : > { %v1370_v16 = vsub.f32 1.0, %v1369_v15 }
 0x706   : > { %v1371_v18 = vmul.f32 %v3678_v14, %v1370_v16 }
 0x708   : > { %v1372_v21 = vadd.f32 %v3678_v14, %v1371_v18  ;;  %v1441_v22 = vpop.xlane.xlu2 %1440 }
 0x709   : > { %3679 = vrcp.f32 %v1441_v22  ;;  %v1453_v31 = vand.u32 2147483648, %v1441_v22  ;;  %v1451_v33 = vand.u32 2147483647, %v1441_v22  ;;  %vm1447_vm12 = vweird.f32 %v1441_v22 }
 0x70a   : > { %v1376_v24 = vsel %vm1375_vm9, %v3678_v14, %v1372_v21 }
 0x70b   : > { %v1381_v25 = vsel %vm1378_vm10, %v1380_v23, %v1376_v24  ;;  %v1454_v35 = vor.u32 1.1754944e-38, %v1453_v31  ;;  %vm1452_vm14 = vcmp.eq.f32.partialorder %v1451_v33, 8.507059e+37  ;;  %v3448_v23 = vld [vmem:[%s4827_s7 + $0x18] sm:$0xff] }
 0x70c   : > { %v1382_v27 = vmul.f32 %v3674_v62, %v1381_v25 }
 0x70e   : > { %3417 = vmatmul.msk.f32.vlgmr.msra.gmra.mxu2 %vm799_vm3, %v1382_v27 }
 0x70f   : > { %v3680_v28 = vpop.eup %3679  ;;  %3442 = vmatpush.xpose.msk.msra.mxu2 %vm799_vm3, %v1563_v52 }
 0x710   : > { %v1443_v29 = vmul.f32 %v3680_v28, %v1441_v22  ;;  %vm1448_vm11 = vweird.f32 %v3680_v28 }
 0x711   : > { %vm1449_vm13 = vmor %vm1447_vm12, %vm1448_vm11 }
 0x712   : > { %v1444_v30 = vsub.f32 1.0, %v1443_v29 }
 0x714   : > { %v1445_v32 = vmul.f32 %v3680_v28, %v1444_v30 }
 0x716   : > { %v1446_v34 = vadd.f32 %v3680_v28, %v1445_v32  ;;  %v1700_v50 = vpop.xlane.xlu2 %1699 }
 0x717   : > { %v1701_v53 = vsub.f32 %v4286_v6, %v1700_v50 }
 0x718   : > { %v1450_v36 = vsel %vm1449_vm13, %v3680_v28, %v1446_v34 }
 0x719   : > { %v1455_v37 = vsel %vm1452_vm14, %v1454_v35, %v1450_v36  ;;  %v1702_v54 = vmul.f32 1.442695, %v1701_v53  ;;  %v3806_v35 = vmov 32.0  }
 0x71a   : > { %v1456_v38 = vmul.f32 %v3676_v3, %v1455_v37 }
 0x71b   : > { %3681 = vpow2.f32 %v1702_v54  ;;  %v1846_v54 = vld [vmem:[%s4830_s10 + $0x18] sm:$0xff] }
 0x71c   : > { %3420 = vmatmul.msk.f32.vlgmr.msra.gmra.mxu1 %vm799_vm3, %v1456_v38 }
 0x721   : > { %v3682_v58 = vpop.eup %3681 }
 0x722   : > { %v1704_v41 = vsel %vm799_vm3, %v3682_v58, 0.0 }
 0x724   : > { %3440 = vmatmul.msk.f32.vlgmr.msrb.gmra.mxu1 %vm715_vm1, %v4085_v19 }
 0x72c   : > { %3441 = vmatmul.msk.f32.gmra.mxu1 %vm715_vm1, %v4096_v26 }
 0x791   : > { %v1403_v39 = vpop.f32.mrf.mxu2 }
 0x792   : > { %3422 = vmatmul.msk.f32.vlgmr.msrb.gmra.mxu2 %vm799_vm3, %v1403_v39 }
 0x793   : > { %1768 = vmatpush.msrb.mxu2 %v3448_v23 }
 0x799   : > { %v1477_v40 = vpop.f32.mrf.mxu1 }
 0x79a   : > { %3423 = vmatmul.msk.f32.gmra.mxu2 %vm799_vm3, %v1477_v40 }
 0x7a1   : > { %v1591_v43 = vpop.f32.mrf.mxu1 }
 0x7a2   : > { %3443 = vmatmul.msk.f32.vlgmr.msra.gmra.mxu2 %vm799_vm3, %v4279_v57  ;;  %1666 = vmatpush.msra.mxu3 %v1591_v43 }
 0x7a4   : > { %1869 = vmatpush.msrb.mxu3 %v1846_v54 }
 0x7a9   : > { %v1594_v44 = vpop.f32.mrf.mxu1 }
 0x7aa   : > { %1740 = vmatpush.msra.mxu1 %v1594_v44 }
 0x815   : > { %v1505_v48 = vpop.f32.mrf.mxu2 }
 0x816   : > { %v4318_v49 = vadd.f32 %v1505_v48, %v1243_v47 }
 0x81d   : > { %v1508_v51 = vpop.f32.mrf.mxu2 }
 0x81e   : > { %v4321_v52 = vadd.f32 %v1508_v51, %v4273_v46 }
 0x825   : > { %v1620_v55 = vpop.f32.mrf.mxu2 }
 0x826   : > { %v1623_v56 = vmul.f32 %v1620_v55, %v4130_v45  ;;  %v1845_v55 = vld [vmem:[%s4830_s10 + $0x10] sm:$0xff] }
 0x827   : > { %1870 = vmatpush.msrb.mxu3 %v1845_v55 }
 0x828   : > { %v1624_v57 = vsel %vm799_vm3, %v1623_v56, -inf }
 0x829   : > { %1625 = vmax.xlane.f32.xlu0 %v1624_v57  ;;  %v1843_v57 = vld [vmem:[%s4830_s10] sm:$0xff] }
 0x831   : > { %1705 = vadd.xlane.f32.xlu0 %v1704_v41 }
 0x89c   : > { %v1626_v42 = vpop.xlane.xlu0 %1625 }
 0x89d   : > { %v1627_v59 = vsub.f32 %v1623_v56, %v1626_v42  ;;  %v1844_v56 = vld [vmem:[%s4830_s10 + $0x8] sm:$0xff] }
 0x89e   : > { %1871 = vmatpush.msrb.mxu3 %v1844_v56 }
 0x89f   : > { %v1628_v60 = vmul.f32 1.442695, %v1627_v59  ;;  %v1889_v59 = vld [vmem:[%s4832_s12 + $0x38] sm:$0xff] }
 0x8a0   : > { %1872 = vmatpush.msrb.mxu3 %v1843_v57  ;;  %1909 = vmatpush.msra.mxu0 %v1889_v59  ;;  %v3457_v59 = vld [vmem:[%s4824_s4 + $0x90] sm:$0xff] }
 0x8a1   : > { %3683 = vpow2.f32 %v1628_v60  ;;  %v1888_v60 = vld [vmem:[%s4832_s12 + $0x30] sm:$0xff] }
 0x8a2   : > { %1910 = vmatpush.msra.mxu0 %v1888_v60  ;;  %v3463_v60 = vld [vmem:[%s4825_s5 + $0x90] sm:$0xff] }
 0x8a4   : > { %v1706_v46 = vpop.xlane.xlu0 %1705 }
 0x8a5   : > { %3685 = vrcp.f32 %v1706_v46  ;;  %v1718_v2 = vand.u32 2147483648, %v1706_v46  ;;  %v1716_v4 = vand.u32 2147483647, %v1706_v46  ;;  %vm1712_vm0 = vweird.f32 %v1706_v46 }
 0x8a7   : > { %v3684_v61 = vpop.eup %3683  ;;  %v1719_v6 = vor.u32 1.1754944e-38, %v1718_v2  ;;  %vm1717_vm4 = vcmp.eq.f32.partialorder %v1716_v4, 8.507059e+37  ;;  %v1885_v2 = vld [vmem:[%s4832_s12 + $0x18] sm:$0xff] }
 0x8a8   : > { %v1630_v62 = vsel %vm799_vm3, %v3684_v61, 0.0 }
 0x8a9   : > { %1631 = vadd.xlane.f32.xlu1 %v1630_v62 }
 0x8ab   : > { %v3686_v63 = vpop.eup %3685 }
 0x8ac   : > { %v1708_v0 = vmul.f32 %v3686_v63, %v1706_v46  ;;  %vm1713_vm15 = vweird.f32 %v3686_v63  ;;  %v1887_v46 = vld [vmem:[%s4832_s12 + $0x28] sm:$0xff] }
 0x8ad   : > { %vm1714_vm2 = vmor %vm1712_vm0, %vm1713_vm15  ;;  %1911 = vmatpush.msra.mxu0 %v1887_v46  ;;  %vm1894_vm0 = vcmask 523264   ;;  %v3469_v46 = vld [vmem:[%s4826_s6 + $0x90] sm:$0xff] }
 0x8ae   : > { %v1709_v1 = vsub.f32 1.0, %v1708_v0 }
 0x8b0   : > { %v1710_v3 = vmul.f32 %v3686_v63, %v1709_v1 }
 0x8b2   : > { %v1711_v5 = vadd.f32 %v3686_v63, %v1710_v3 }
 0x8b4   : > { %v1715_v7 = vsel %vm1714_vm2, %v3686_v63, %v1711_v5  ;;  %v1886_v63 = vld [vmem:[%s4832_s12 + $0x20] sm:$0xff] }
 0x8b5   : > { %v1720_v8 = vsel %vm1717_vm4, %v1719_v6, %v1715_v7  ;;  %1912 = vmatpush.msra.mxu0 %v1886_v63  ;;  %v3468_v63 = vld [vmem:[%s4826_s6 + $0x88] sm:$0xff] }
 0x8b6   : > { %v1721_v9 = vmul.f32 %v3682_v58, %v1720_v8 }
 0x8b7   : > { %1913 = vmatpush.msra.mxu0 %v1885_v2  ;;  %v3467_v2 = vld [vmem:[%s4826_s6 + $0x80] sm:$0xff] }
 0x8b8   : > { %3447 = vmatmul.msk.f32.vlgmr.msra.gmra.mxu1 %vm799_vm3, %v1721_v9 }
 0x91c   : > { %v1632_v10 = vpop.xlane.xlu1 %1631 }
 0x91d   : > { %3687 = vrcp.f32 %v1632_v10  ;;  %v1644_v14 = vand.u32 2147483648, %v1632_v10  ;;  %v1642_v16 = vand.u32 2147483647, %v1632_v10  ;;  %vm1638_vm6 = vweird.f32 %v1632_v10 }
 0x91e   : > { %3689 = vrcp.f32 %v3806_v35 }
 0x91f   : > { %v1645_v18 = vor.u32 1.1754944e-38, %v1644_v14  ;;  %vm1643_vm8 = vcmp.eq.f32.partialorder %v1642_v16, 8.507059e+37  ;;  %v3644_v14 = vld [vmem:[%s4829_s9] ss:$0 sm:$0xff] }
 0x923   : > { %v3688_v11 = vpop.eup %3687 }
 0x924   : > { %v1634_v12 = vmul.f32 %v3688_v11, %v1632_v10  ;;  %vm1639_vm5 = vweird.f32 %v3688_v11  ;;  %v3690_v36 = vpop.eup %3689  ;;  %v3643_v10 = vld [vmem:[%s4828_s8] ss:$0 sm:$0xff] }
 0x925   : > { %vm1640_vm7 = vmor %vm1638_vm6, %vm1639_vm5  ;;  %v1789_v37 = vmul.f32 32.0, %v3690_v36  ;;  %vm1793_vm9 = vweird.f32 %v3690_v36 }
 0x926   : > { %v1635_v13 = vsub.f32 1.0, %v1634_v12 }
 0x927   : > { %v1790_v38 = vsub.f32 1.0, %v1789_v37 }
 0x928   : > { %v1636_v15 = vmul.f32 %v3688_v11, %v1635_v13 }
 0x929   : > { %v1791_v39 = vmul.f32 %v3690_v36, %v1790_v38 }
 0x92a   : > { %v1637_v17 = vadd.f32 %v3688_v11, %v1636_v15 }
 0x92b   : > { %v1792_v40 = vadd.f32 %v3690_v36, %v1791_v39 }
 0x92c   : > { %v1641_v20 = vsel %vm1640_vm7, %v3688_v11, %v1637_v17 }
 0x92d   : > { %v1646_v21 = vsel %vm1643_vm8, %v1645_v18, %v1641_v20 }
 0x92e   : > { %v1647_v22 = vmul.f32 %v3684_v61, %v1646_v21 }
 0x930   : > { %3444 = vmatmul.msk.f32.vlgmr.msra.gmra.mxu3 %vm799_vm3, %v1647_v22 }
 0x935   : > { %v1742_v25 = vpop.f32.mrf.mxu1 }
 0x9b3   : > { %v1668_v24 = vpop.f32.mrf.mxu3 }
 0x9b4   : > { %3449 = vmatmul.msk.f32.vlgmr.msrb.gmra.mxu2 %vm799_vm3, %v1668_v24 }
 0x9bc   : > { %3450 = vmatmul.msk.f32.gmra.mxu2 %vm799_vm3, %v1742_v25  ;;  %v1884_v25 = vld [vmem:[%s4832_s12 + $0x10] sm:$0xff] }
 0x9bd   : > { %1914 = vmatpush.msra.mxu0 %v1884_v25  ;;  %v3648_v25 = vld [vmem:[%s4835_s15] ss:$0 sm:$0xff] }
 0xa37   : > { %v1770_v27 = vpop.f32.mrf.mxu2 }
 0xa38   : > { %v1776_v28 = vadd.f32 %v1770_v27, %v4318_v49  ;;  %v1883_v27 = vld [vmem:[%s4832_s12 + $0x8] sm:$0xff] }
 0xa39   : > { %1915 = vmatpush.msra.mxu0 %v1883_v27 }
 0xa3a   : > { %v1778_v29 = vadd.f32 %v1776_v28, %v4085_v19  ;;  %v4341_v19 = vsel %vm1793_vm9, %v3690_v36, %v1792_v40  ;;  %v1882_v28 = vld [vmem:[%s4832_s12] sm:$0xff] }
 0xa3b   : > { %1916 = vmatpush.msra.mxu0 %v1882_v28  ;;  %v3646_v36 = vld [vmem:[%s4833_s13] ss:$0 sm:$0xff] }
 0xa3c   : > { %v1782_v30 = vsel %vm715_vm1, %v1778_v29, 0.0 }
 0xa3d   : > { %1783 = vadd.xlane.f32.xlu1 %v1782_v30 }
 0xa3f   : > { %v1773_v31 = vpop.f32.mrf.mxu2 }
 0xa40   : > { %v1777_v32 = vadd.f32 %v1773_v31, %v4321_v52 }
 0xa42   : > { %v1779_v33 = vadd.f32 %v1777_v32, %v4096_v26 }
 0xa44   : > { %v1785_v34 = vsel %vm715_vm1, %v1779_v33, 0.0 }
 0xa45   : > { %1786 = vadd.xlane.f32.xlu0 %v1785_v34 }
 0xab0   : > { %v1784_v43 = vpop.xlane.xlu1 %1783 }
 0xab1   : > { %v1795_v44 = vmul.f32 %v4341_v19, %v1784_v43 }
 0xab3   : > { %v1797_v47 = vsub.f32 %v1778_v29, %v1795_v44  ;;  %v3645_v29 = vld [vmem:[%s4831_s11] ss:$0 sm:$0xff] }
 0xab5   : > { %v1799_v48 = vmul.f32 %v1797_v47, %v1797_v47 }
 0xab7   : > { %v1801_v26 = vsel %vm715_vm1, %v1799_v48, 0.0 }
 0xab8   : > { %1802 = vadd.xlane.f32.xlu2 %v1801_v26  ;;  %v1787_v49 = vpop.xlane.xlu0 %1786 }
 0xab9   : > { %v1796_v50 = vmul.f32 %v4341_v19, %v1787_v49 }
 0xabb   : > { %v1798_v51 = vsub.f32 %v1779_v33, %v1796_v50 }
 0xabd   : > { %v1800_v52 = vmul.f32 %v1798_v51, %v1798_v51 }
 0xabf   : > { %v1804_v53 = vsel %vm715_vm1, %v1800_v52, 0.0 }
 0xac0   : > { %1805 = vadd.xlane.f32.xlu1 %v1804_v53 }
 0xb2b   : > { %v1803_v58 = vpop.xlane.xlu2 %1802 }
 0xb2c   : > { %v1807_v41 = vmul.f32 %v1803_v58, %v4341_v19  ;;  %v3458_v58 = vld [vmem:[%s4824_s4 + $0x98] sm:$0xff] }
 0xb2d   : > { %2005 = vmatpush.msrb.mxu1 %v3458_v58 }
 0xb2e   : > { %v1809_v42 = vadd.f32 1e-05, %v1807_v41  ;;  %v3464_v41 = vld [vmem:[%s4825_s5 + $0x98] sm:$0xff] }
 0xb2f   : > { %2033 = vmatpush.msra.mxu2 %v3464_v41  ;;  %2006 = vmatpush.msrb.mxu1 %v3457_v59 }
 0xb30   : > { %3691 = vrsqrt.f32 %v1809_v42  ;;  %vm1817_vm11 = vweird.f32 %v1809_v42 }
 0xb31   : > { %2034 = vmatpush.msra.mxu2 %v3463_v60 }
 0xb33   : > { %v1806_v61 = vpop.xlane.xlu1 %1805 }
 0xb34   : > { %v1808_v62 = vmul.f32 %v1806_v61, %v4341_v19  ;;  %v3456_v61 = vld [vmem:[%s4824_s4 + $0x88] sm:$0xff] }
 0xb35   : > { %2007 = vmatpush.msrb.mxu1 %v3456_v61 }
 0xb36   : > { %v3692_v0 = vpop.eup %3691  ;;  %v1810_v1 = vadd.f32 1e-05, %v1808_v62  ;;  %v3462_v62 = vld [vmem:[%s4825_s5 + $0x88] sm:$0xff] }
 0xb37   : > { %v1812_v3 = vmul.f32 %v3692_v0, %v1809_v42  ;;  %vm1818_vm10 = vweird.f32 %v3692_v0  ;;  %v3470_v42 = vld [vmem:[%s4826_s6 + $0x98] sm:$0xff]  ;;  %2035 = vmatpush.msra.mxu2 %v3462_v62 }
 0xb38   : > { %3693 = vrsqrt.f32 %v1810_v1  ;;  %vm1819_vm12 = vmor %vm1817_vm11, %vm1818_vm10  ;;  %vm1827_vm14 = vweird.f32 %v1810_v1  ;;  %2061 = vmatpush.msra.mxu3 %v3470_v42 }
 0xb39   : > { %v1813_v4 = vmul.f32 %v3692_v0, %v1812_v3 }
 0xb3a   : > { %2062 = vmatpush.msra.mxu3 %v3469_v46 }
 0xb3b   : > { %v1814_v5 = vmul.f32 0.5, %v1813_v4 }
 0xb3c   : > { %2063 = vmatpush.msra.mxu3 %v3468_v63  ;;  %v3489_v63 = vld [vmem:[%s4825_s5 + $0xb8] sm:$0xff] }
 0xb3d   : > { %v1815_v6 = vsub.f32 1.5, %v1814_v5 }
 0xb3e   : > { %v3694_v7 = vpop.eup %3693  ;;  %2064 = vmatpush.msra.mxu3 %v3467_v2  ;;  %v3486_v2 = vld [vmem:[%s4825_s5 + $0xa0] sm:$0xff] }
 0xb3f   : > { %v1816_v8 = vmul.f32 %v3692_v0, %v1815_v6  ;;  %v1822_v9 = vmul.f32 %v3694_v7, %v1810_v1  ;;  %vm1828_vm13 = vweird.f32 %v3694_v7  ;;  %v3461_v1 = vld [vmem:[%s4825_s5 + $0x80] sm:$0xff]  ;;  %v3483_v6 = vld [vmem:[%s4824_s4 + $0xb8] sm:$0xff] }
 0xb40   : > { %vm1829_vm15 = vmor %vm1827_vm14, %vm1828_vm13  ;;  %2036 = vmatpush.msra.mxu2 %v3461_v1  ;;  %v3487_v1 = vld [vmem:[%s4825_s5 + $0xa8] sm:$0xff] }
 0xb41   : > { %v1820_v11 = vsel %vm1819_vm12, %v3692_v0, %v1816_v8  ;;  %v1823_v12 = vmul.f32 %v3694_v7, %v1822_v9  ;;  %v3455_v0 = vld [vmem:[%s4824_s4 + $0x80] sm:$0xff]  ;;  %v3481_v9 = vld [vmem:[%s4824_s4 + $0xa8] sm:$0xff] }
 0xb42   : > { %v1831_v13 = vmul.f32 %v1820_v11, %v1797_v47  ;;  %2008 = vmatpush.msrb.mxu1 %v3455_v0  ;;  %v3480_v11 = vld [vmem:[%s4824_s4 + $0xa0] sm:$0xff]  ;;  %v3488_v0 = vld [vmem:[%s4825_s5 + $0xb0] sm:$0xff] }
 0xb43   : > { %v1824_v15 = vmul.f32 0.5, %v1823_v12 }
 0xb44   : > { %v1836_v16 = vmul.f32 %v3643_v10, %v1831_v13 }
 0xb45   : > { %v1825_v17 = vsub.f32 1.5, %v1824_v15 }
 0xb46   : > { %v1841_v18 = vadd.f32 %v3644_v14, %v1836_v16 }
 0xb47   : > { %v1826_v20 = vmul.f32 %v3694_v7, %v1825_v17 }
 0xb48   : > { %3451 = vmatmul.msk.f32.vlgmr.msrb.gmra.mxu3 %vm715_vm1, %v1841_v18 }
 0xb49   : > { %v1830_v21 = vsel %vm1829_vm15, %v3694_v7, %v1826_v20  ;;  %v3482_v7 = vld [vmem:[%s4824_s4 + $0xb0] sm:$0xff]  ;;  %2239 = vmatpush.msrb.mxu3 %v3483_v6 }
 0xb4a   : > { %v1832_v22 = vmul.f32 %v1830_v21, %v1798_v51 }
 0xb4b   : > { %2240 = vmatpush.msrb.mxu3 %v3482_v7 }
 0xb4c   : > { %v1837_v23 = vmul.f32 %v3643_v10, %v1832_v22  ;;  %v3647_v22 = vld [vmem:[%s4834_s14] ss:$0 sm:$0xff] }
 0xb4d   : > { %2241 = vmatpush.msrb.mxu3 %v3481_v9 }
 0xb4e   : > { %v1842_v24 = vadd.f32 %v3644_v14, %v1837_v23 }
 0xb4f   : > { %2242 = vmatpush.msrb.mxu3 %v3480_v11 }
 0xb50   : > { %3452 = vmatmul.msk.f32.gmra.mxu3 %vm715_vm1, %v1842_v24 }
 0xbcb   : > { %v1874_v30 = vpop.f32.mrf.mxu3 }
 0xbcc   : > { %v1875_v31 = vadd.f32 %v3645_v29, %v1874_v30 }
 0xbce   : > { %v1880_v32 = vmax.f32 %v1875_v31, 0.0 }
 0xbd0   : > { %3453 = vmatmul.msk.f32.vlgmr.msra.gmra.mxu0 %vm1894_vm0, %v1880_v32 }
 0xbd3   : > { %v1877_v33 = vpop.f32.mrf.mxu3 }
 0xbd4   : > { %v1878_v34 = vadd.f32 %v3645_v29, %v1877_v33 }
 0xbd6   : > { %v1881_v35 = vmax.f32 %v1878_v34, 0.0 }
 0xbd8   : > { %3454 = vmatmul.msk.f32.gmra.mxu0 %vm1894_vm0, %v1881_v35 }
 0xc4d   : > { %v1918_v37 = vpop.f32.mrf.mxu0 }
 0xc4e   : > { %v1919_v38 = vadd.f32 %v3646_v36, %v1918_v37 }
 0xc50   : > { %v1924_v39 = vadd.f32 %v1919_v38, %v1841_v18 }
 0xc52   : > { %v1928_v40 = vsel %vm715_vm1, %v1924_v39, 0.0 }
 0xc53   : > { %1929 = vadd.xlane.f32.xlu2 %v1928_v40  ;;  %v3495_v40 = vld [vmem:[%s4826_s6 + $0xb8] sm:$0xff] }
 0xc55   : > { %v1921_v43 = vpop.f32.mrf.mxu0 }
 0xc56   : > { %v1922_v44 = vadd.f32 %v3646_v36, %v1921_v43 }
 0xc58   : > { %v1925_v47 = vadd.f32 %v1922_v44, %v1842_v24 }
 0xc5a   : > { %v1931_v48 = vsel %vm715_vm1, %v1925_v47, 0.0 }
 0xc5b   : > { %1932 = vadd.xlane.f32.xlu1 %v1931_v48 }
 0xcc6   : > { %v1930_v26 = vpop.xlane.xlu2 %1929 }
 0xcc7   : > { %v1934_v49 = vmul.f32 %v1930_v26, %v4341_v19  ;;  %v3493_v26 = vld [vmem:[%s4826_s6 + $0xa8] sm:$0xff] }
 0xcc9   : > { %v4404_v50 = vsub.f32 %v1924_v39, %v1934_v49  ;;  %v3492_v49 = vld [vmem:[%s4826_s6 + $0xa0] sm:$0xff] }
 0xccb   : > { %v1938_v51 = vmul.f32 %v4404_v50, %v4404_v50 }
 0xccd   : > { %v1940_v52 = vsel %vm715_vm1, %v1938_v51, 0.0 }
 0xcce   : > { %1941 = vadd.xlane.f32.xlu0 %v1940_v52  ;;  %v1933_v53 = vpop.xlane.xlu1 %1932 }
 0xccf   : > { %v1935_v54 = vmul.f32 %v1933_v53, %v4341_v19 }
 0xcd1   : > { %v4410_v55 = vsub.f32 %v1925_v47, %v1935_v54  ;;  %v3494_v47 = vld [vmem:[%s4826_s6 + $0xb0] sm:$0xff] }
 0xcd3   : > { %v1939_v56 = vmul.f32 %v4410_v55, %v4410_v55 }
 0xcd5   : > { %v1943_v57 = vsel %vm715_vm1, %v1939_v56, 0.0 }
 0xcd6   : > { %1944 = vadd.xlane.f32.xlu2 %v1943_v57 }
 0xd41   : > { %v1942_v3 = vpop.xlane.xlu0 %1941 }
 0xd42   : > { %v1946_v4 = vmul.f32 %v1942_v3, %v4341_v19 }
 0xd44   : > { %v1948_v5 = vadd.f32 1e-05, %v1946_v4 }
 0xd46   : > { %3695 = vrsqrt.f32 %v1948_v5  ;;  %vm1956_vm4 = vweird.f32 %v1948_v5 }
 0xd49   : > { %v1945_v8 = vpop.xlane.xlu2 %1944 }
 0xd4a   : > { %v1947_v10 = vmul.f32 %v1945_v8, %v4341_v19 }
 0xd4c   : > { %v3696_v12 = vpop.eup %3695  ;;  %v1949_v13 = vadd.f32 1e-05, %v1947_v10 }
 0xd4d   : > { %v1951_v14 = vmul.f32 %v3696_v12, %v1948_v5  ;;  %vm1957_vm2 = vweird.f32 %v3696_v12 }
 0xd4e   : > { %3697 = vrsqrt.f32 %v1949_v13  ;;  %vm1958_vm5 = vmor %vm1956_vm4, %vm1957_vm2  ;;  %vm1966_vm7 = vweird.f32 %v1949_v13 }
 0xd4f   : > { %v1952_v15 = vmul.f32 %v3696_v12, %v1951_v14 }
 0xd51   : > { %v1953_v16 = vmul.f32 0.5, %v1952_v15 }
 0xd53   : > { %v1954_v17 = vsub.f32 1.5, %v1953_v16 }
 0xd54   : > { %v3698_v18 = vpop.eup %3697 }
 0xd55   : > { %v1955_v20 = vmul.f32 %v3696_v12, %v1954_v17  ;;  %v1961_v21 = vmul.f32 %v3698_v18, %v1949_v13  ;;  %vm1967_vm6 = vweird.f32 %v3698_v18 }
 0xd56   : > { %vm1968_vm8 = vmor %vm1966_vm7, %vm1967_vm6 }
 0xd57   : > { %v1959_v23 = vsel %vm1958_vm5, %v3696_v12, %v1955_v20  ;;  %v1962_v24 = vmul.f32 %v3698_v18, %v1961_v21 }
 0xd58   : > { %v1970_v27 = vmul.f32 %v1959_v23, %v4404_v50 }
 0xd59   : > { %v1963_v28 = vmul.f32 0.5, %v1962_v24 }
 0xd5a   : > { %v1975_v29 = vmul.f32 %v3647_v22, %v1970_v27 }
 0xd5b   : > { %v1964_v30 = vsub.f32 1.5, %v1963_v28 }
 0xd5c   : > { %v4472_v31 = vadd.f32 %v3648_v25, %v1975_v29 }
 0xd5d   : > { %v1965_v32 = vmul.f32 %v3698_v18, %v1964_v30 }
 0xd5e   : > { %3459 = vmatmul.msk.f32.vlgmr.msrb.gmra.mxu1 %vm715_vm1, %v4472_v31  ;;  %3465 = vmatmul.msk.f32.vlgmr.msra.gmra.mxu2 %vm715_vm1, %v4472_v31 }
 0xd5f   : > { %v1969_v33 = vsel %vm1968_vm8, %v3698_v18, %v1965_v32  ;;  %3471 = vmatmul.msk.f32.vlgmr.msra.gmra.mxu3 %vm715_vm1, %v4472_v31 }
 0xd60   : > { %v1971_v34 = vmul.f32 %v1969_v33, %v4410_v55 }
 0xd62   : > { %v1976_v35 = vmul.f32 %v3647_v22, %v1971_v34 }
 0xd64   : > { %v4481_v36 = vadd.f32 %v3648_v25, %v1976_v35  ;;  %v3512_v35 = vld [vmem:[%s4824_s4 + $0xd8] sm:$0xff] }
 0xd66   : > { %3460 = vmatmul.msk.f32.gmra.mxu1 %vm715_vm1, %v4481_v36  ;;  %3466 = vmatmul.msk.f32.gmra.mxu2 %vm715_vm1, %v4481_v36 }
 0xd67   : > { %3472 = vmatmul.msk.f32.gmra.mxu3 %vm715_vm1, %v4481_v36 }
 0xd6f   : > { %3484 = vmatmul.msk.f32.vlgmr.msrb.gmra.mxu3 %vm715_vm1, %v4472_v31 }
 0xd77   : > { %3485 = vmatmul.msk.f32.gmra.mxu3 %vm715_vm1, %v4481_v36 }
 0xddb   : > { %v2010_v38 = vpop.f32.mrf.mxu1 }
 0xde1   : > { %v2038_v37 = vpop.f32.mrf.mxu2 }
 0xde2   : > { %v2066_v39 = vpop.f32.mrf.mxu3  ;;  %3473 = vmatpush.xpose.msk.msra.mxu1 %vm799_vm3, %v2038_v37 }
 0xde3   : > { %2141 = vmatpush.msrb.mxu0 %v2066_v39  ;;  %v2013_v48 = vpop.f32.mrf.mxu1 }
 0xde5   : > { %3474 = vmatmul.msk.f32.vlgmr.msra.gmra.mxu1 %vm799_vm3, %v2010_v38  ;;  %2267 = vmatpush.msra.mxu0 %v3489_v63  ;;  %v3511_v38 = vld [vmem:[%s4824_s4 + $0xd0] sm:$0xff] }
 0xde7   : > { %2268 = vmatpush.msra.mxu0 %v3488_v0  ;;  %v3515_v0 = vld [vmem:[%s4825_s5 + $0xc0] sm:$0xff] }
 0xde9   : > { %v2041_v43 = vpop.f32.mrf.mxu2  ;;  %2269 = vmatpush.msra.mxu0 %v3487_v1 }
 0xdea   : > { %v2069_v44 = vpop.f32.mrf.mxu3  ;;  %3476 = vmatpush.xpose.msk.msrb.mxu1 %vm799_vm3, %v2041_v43  ;;  %v3509_v43 = vld [vmem:[%s4824_s4 + $0xc0] sm:$0xff] }
 0xdeb   : > { %2215 = vmatpush.msrb.mxu2 %v2069_v44  ;;  %2270 = vmatpush.msra.mxu0 %v3486_v2 }
 0xded   : > { %3477 = vmatmul.msk.f32.vlgmr.msrb.gmra.mxu1 %vm799_vm3, %v2013_v48 }
 0xdee   : > { %2295 = vmatpush.msra.mxu1 %v3495_v40  ;;  %v3510_v40 = vld [vmem:[%s4824_s4 + $0xc8] sm:$0xff] }
 0xdf0   : > { %2296 = vmatpush.msra.mxu1 %v3494_v47 }
 0xdf2   : > { %2297 = vmatpush.msra.mxu1 %v3493_v26  ;;  %v2244_v34 = vpop.f32.mrf.mxu3 }
 0xdf4   : > { %2298 = vmatpush.msra.mxu1 %v3492_v49 }
 0xdf5   : > { %3496 = vmatmul.msk.f32.vlgmr.msra.gmra.mxu1 %vm715_vm1, %v4472_v31 }
 0xdfa   : > { %v2247_v39 = vpop.f32.mrf.mxu3 }
 0xdfd   : > { %3497 = vmatmul.msk.f32.gmra.mxu1 %vm715_vm1, %v4481_v36 }
 0xe62   : > { %v2095_v50 = vpop.f32.mrf.mxu1 }
 0xe63   : > { %v2098_v51 = vmul.f32 %v2095_v50, %v4130_v45 }
 0xe65   : > { %v2099_v52 = vsel %vm799_vm3, %v2098_v51, -inf }
 0xe66   : > { %2100 = vmax.xlane.f32.xlu0 %v2099_v52 }
 0xe6a   : > { %v2169_v53 = vpop.f32.mrf.mxu1 }
 0xe6b   : > { %v2172_v54 = vmul.f32 %v2169_v53, %v4130_v45 }
 0xe6d   : > { %v2173_v55 = vsel %vm799_vm3, %v2172_v54, -inf }
 0xe6e   : > { %2174 = vmax.xlane.f32.xlu2 %v2173_v55 }
 0xe72   : > { %v2300_v7 = vpop.f32.mrf.mxu1 }
 0xe7a   : > { %v2303_v22 = vpop.f32.mrf.mxu1 }
 0xed9   : > { %v2101_v56 = vpop.xlane.xlu0 %2100 }
 0xeda   : > { %v2102_v57 = vsub.f32 %v2098_v51, %v2101_v56 }
 0xedc   : > { %v2103_v58 = vmul.f32 1.442695, %v2102_v57 }
 0xede   : > { %3699 = vpow2.f32 %v2103_v58 }
 0xee1   : > { %v2175_v41 = vpop.xlane.xlu2 %2174 }
 0xee2   : > { %v2176_v42 = vsub.f32 %v2172_v54, %v2175_v41 }
 0xee4   : > { %v3700_v59 = vpop.eup %3699  ;;  %v2177_v60 = vmul.f32 1.442695, %v2176_v42 }
 0xee5   : > { %v2105_v46 = vsel %vm799_vm3, %v3700_v59, 0.0 }
 0xee6   : > { %3701 = vpow2.f32 %v2177_v60  ;;  %2106 = vadd.xlane.f32.xlu1 %v2105_v46  ;;  %v3479_v60 = vld [vmem:[%s4827_s7 + $0x20] sm:$0xff]  ;;  %v3518_v46 = vld [vmem:[%s4825_s5 + $0xd8] sm:$0xff] }
 0xeec   : > { %v3702_v61 = vpop.eup %3701 }
 0xeed   : > { %v2179_v62 = vsel %vm799_vm3, %v3702_v61, 0.0 }
 0xeee   : > { %2180 = vadd.xlane.f32.xlu0 %v2179_v62  ;;  %v3516_v62 = vld [vmem:[%s4825_s5 + $0xc8] sm:$0xff] }
 0xf59   : > { %v2107_v3 = vpop.xlane.xlu1 %2106 }
 0xf5a   : > { %3703 = vrcp.f32 %v2107_v3  ;;  %v2119_v9 = vand.u32 2147483648, %v2107_v3  ;;  %v2117_v11 = vand.u32 2147483647, %v2107_v3  ;;  %vm2113_vm10 = vweird.f32 %v2107_v3 }
 0xf5c   : > { %v2120_v14 = vor.u32 1.1754944e-38, %v2119_v9  ;;  %vm2118_vm12 = vcmp.eq.f32.partialorder %v2117_v11, 8.507059e+37 }
 0xf60   : > { %v3704_v4 = vpop.eup %3703 }
 0xf61   : > { %v2109_v5 = vmul.f32 %v3704_v4, %v2107_v3  ;;  %v2181_v6 = vpop.xlane.xlu0 %2180  ;;  %vm2114_vm9 = vweird.f32 %v3704_v4 }
 0xf62   : > { %3705 = vrcp.f32 %v2181_v6  ;;  %vm2115_vm11 = vmor %vm2113_vm10, %vm2114_vm9  ;;  %v2193_v21 = vand.u32 2147483648, %v2181_v6  ;;  %v2191_v24 = vand.u32 2147483647, %v2181_v6  ;;  %vm2187_vm14 = vweird.f32 %v2181_v6 }
 0xf63   : > { %v2110_v8 = vsub.f32 1.0, %v2109_v5 }
 0xf64   : > { %v2194_v27 = vor.u32 1.1754944e-38, %v2193_v21  ;;  %vm2192_vm2 = vcmp.eq.f32.partialorder %v2191_v24, 8.507059e+37 }
 0xf65   : > { %v2111_v10 = vmul.f32 %v3704_v4, %v2110_v8 }
 0xf67   : > { %v2112_v12 = vadd.f32 %v3704_v4, %v2111_v10 }
 0xf68   : > { %v3706_v13 = vpop.eup %3705 }
 0xf69   : > { %v2116_v15 = vsel %vm2115_vm11, %v3704_v4, %v2112_v12  ;;  %v2183_v16 = vmul.f32 %v3706_v13, %v2181_v6  ;;  %vm2188_vm13 = vweird.f32 %v3706_v13 }
 0xf6a   : > { %v2121_v17 = vsel %vm2118_vm12, %v2120_v14, %v2116_v15  ;;  %vm2189_vm15 = vmor %vm2187_vm14, %vm2188_vm13 }
 0xf6b   : > { %v2184_v18 = vsub.f32 1.0, %v2183_v16  ;;  %v2122_v20 = vmul.f32 %v3700_v59, %v2121_v17 }
 0xf6d   : > { %v2185_v23 = vmul.f32 %v3706_v13, %v2184_v18  ;;  %3475 = vmatmul.msk.f32.vlgmr.msrb.gmra.mxu0 %vm799_vm3, %v2122_v20 }
 0xf6e   : > { %2449 = vmatpush.msrb.mxu0 %v2303_v22 }
 0xf6f   : > { %v2186_v25 = vadd.f32 %v3706_v13, %v2185_v23 }
 0xf71   : > { %v2190_v28 = vsel %vm2189_vm15, %v3706_v13, %v2186_v25  ;;  %v3504_v25 = vld [vmem:[%s4827_s7 + $0x28] sm:$0xff] }
 0xf72   : > { %v2195_v29 = vsel %vm2192_vm2, %v2194_v27, %v2190_v28  ;;  %2477 = vmatpush.msrb.mxu1 %v3504_v25  ;;  %v3524_v27 = vld [vmem:[%s4826_s6 + $0xd8] sm:$0xff]  ;;  %v3523_v28 = vld [vmem:[%s4826_s6 + $0xd0] sm:$0xff] }
 0xf73   : > { %v2196_v30 = vmul.f32 %v3702_v61, %v2195_v29  ;;  %v3517_v61 = vld [vmem:[%s4825_s5 + $0xd0] sm:$0xff]  ;;  %v3522_v29 = vld [vmem:[%s4826_s6 + $0xc8] sm:$0xff] }
 0xf74   : > { %2587 = vmatpush.msra.mxu1 %v3524_v27 }
 0xf75   : > { %3478 = vmatmul.msk.f32.vlgmr.msrb.gmra.mxu2 %vm799_vm3, %v2196_v30  ;;  %3490 = vmatmul.msk.f32.vlgmr.msra.gmra.mxu0 %vm715_vm1, %v4472_v31  ;;  %v3521_v30 = vld [vmem:[%s4826_s6 + $0xc0] sm:$0xff] }
 0xf76   : > { %2559 = vmatpush.msra.mxu0 %v3518_v46  ;;  %2588 = vmatpush.msra.mxu1 %v3523_v28 }
 0xf78   : > { %2560 = vmatpush.msra.mxu0 %v3517_v61  ;;  %2589 = vmatpush.msra.mxu1 %v3522_v29 }
 0xf7a   : > { %2561 = vmatpush.msra.mxu0 %v3516_v62  ;;  %2590 = vmatpush.msra.mxu1 %v3521_v30 }
 0xf7c   : > { %2562 = vmatpush.msra.mxu0 %v3515_v0 }
 0xf7d   : > { %3491 = vmatmul.msk.f32.gmra.mxu0 %vm715_vm1, %v4481_v36 }
 0xfea   : > { %v4537_v32 = vpop.f32.mrf.mxu0 }
 0xff2   : > { %v2272_v33 = vpop.f32.mrf.mxu0 }
 0xff3   : > { %3498 = vmatpush.xpose.msk.msra.mxu2 %vm799_vm3, %v2272_v33 }
 0xff6   : > { %3499 = vmatmul.msk.f32.vlgmr.msra.gmra.mxu2 %vm799_vm3, %v2244_v34  ;;  %v3544_v34 = vld [vmem:[%s4825_s5 + $0xf0] sm:$0xff] }
 0xff7   : > { %2375 = vmatpush.msrb.mxu2 %v2300_v7 }
 0xff8   : > { %v4559_v44 = vpop.f32.mrf.mxu2 }
 0xff9   : > { %2506 = vmatpush.msra.mxu2 %v3479_v60 }
 0xffa   : > { %v2275_v37 = vpop.f32.mrf.mxu0 }
 0xffb   : > { %3501 = vmatpush.xpose.msk.msra.mxu3 %vm799_vm3, %v2275_v37  ;;  %v3543_v37 = vld [vmem:[%s4825_s5 + $0xe8] sm:$0xff] }
 0xffe   : > { %3502 = vmatmul.msk.f32.vlgmr.msra.gmra.mxu3 %vm799_vm3, %v2247_v39 }
 0xfff   : > { %2531 = vmatpush.msrb.mxu3 %v3512_v35 }
0x1001   : > { %2532 = vmatpush.msrb.mxu3 %v3511_v38  ;;  %v3542_v38 = vld [vmem:[%s4825_s5 + $0xe0] sm:$0xff] }
0x1003   : > { %2533 = vmatpush.msrb.mxu3 %v3510_v40 }
0x1005   : > { %2534 = vmatpush.msrb.mxu3 %v3509_v43  ;;  %v3539_v43 = vld [vmem:[%s4824_s4 + $0xf8] sm:$0xff] }
0x1006   : > { %3513 = vmatmul.msk.f32.vlgmr.msrb.gmra.mxu3 %vm715_vm1, %v4472_v31 }
0x100e   : > { %3514 = vmatmul.msk.f32.gmra.mxu3 %vm715_vm1, %v4481_v36 }
0x1079   : > { %v2329_v47 = vpop.f32.mrf.mxu2 }
0x107a   : > { %v2332_v48 = vmul.f32 %v2329_v47, %v4130_v45  ;;  %v3538_v47 = vld [vmem:[%s4824_s4 + $0xf0] sm:$0xff] }
0x107c   : > { %v2333_v26 = vsel %vm799_vm3, %v2332_v48, -inf }
0x107d   : > { %2334 = vmax.xlane.f32.xlu0 %v2333_v26  ;;  %v3537_v26 = vld [vmem:[%s4824_s4 + $0xe8] sm:$0xff] }
0x1081   : > { %v2403_v49 = vpop.f32.mrf.mxu3 }
0x1082   : > { %v2406_v50 = vmul.f32 %v2403_v49, %v4130_v45  ;;  %v3536_v49 = vld [vmem:[%s4824_s4 + $0xe0] sm:$0xff] }
0x1084   : > { %v2407_v51 = vsel %vm799_vm3, %v2406_v50, -inf }
0x1085   : > { %2408 = vmax.xlane.f32.xlu1 %v2407_v51 }
0x1089   : > { %v2536_v40 = vpop.f32.mrf.mxu3 }
0x10f0   : > { %v2335_v52 = vpop.xlane.xlu0 %2334 }
0x10f1   : > { %v2336_v53 = vsub.f32 %v2332_v48, %v2335_v52  ;;  %v2539_v48 = vpop.f32.mrf.mxu3 }
0x10f3   : > { %v2337_v54 = vmul.f32 1.442695, %v2336_v53 }
0x10f5   : > { %3707 = vpow2.f32 %v2337_v54 }
0x10f8   : > { %v2409_v55 = vpop.xlane.xlu1 %2408 }
0x10f9   : > { %v2410_v56 = vsub.f32 %v2406_v50, %v2409_v55 }
0x10fb   : > { %v3708_v57 = vpop.eup %3707  ;;  %v2411_v58 = vmul.f32 1.442695, %v2410_v56 }
0x10fc   : > { %v2339_v41 = vsel %vm799_vm3, %v3708_v57, 0.0 }
0x10fd   : > { %3709 = vpow2.f32 %v2411_v58  ;;  %2340 = vadd.xlane.f32.xlu1 %v2339_v41 }
0x1103   : > { %v3710_v42 = vpop.eup %3709 }
0x1104   : > { %v2413_v59 = vsel %vm799_vm3, %v3710_v42, 0.0 }
0x1105   : > { %2414 = vadd.xlane.f32.xlu2 %v2413_v59 }
0x1170   : > { %v2341_v63 = vpop.xlane.xlu1 %2340 }
0x1171   : > { %3711 = vrcp.f32 %v2341_v63  ;;  %v2353_v5 = vand.u32 2147483648, %v2341_v63  ;;  %v2351_v7 = vand.u32 2147483647, %v2341_v63  ;;  %vm2347_vm5 = vweird.f32 %v2341_v63 }
0x1173   : > { %v2354_v10 = vor.u32 1.1754944e-38, %v2353_v5  ;;  %vm2352_vm7 = vcmp.eq.f32.partialorder %v2351_v7, 8.507059e+37  ;;  %v3550_v7 = vld [vmem:[%s4826_s6 + $0xf0] sm:$0xff] }
0x1177   : > { %v3712_v1 = vpop.eup %3711 }
0x1178   : > { %v2343_v2 = vmul.f32 %v3712_v1, %v2341_v63  ;;  %v2415_v3 = vpop.xlane.xlu2 %2414  ;;  %vm2348_vm4 = vweird.f32 %v3712_v1 }
0x1179   : > { %3713 = vrcp.f32 %v2415_v3  ;;  %vm2349_vm6 = vmor %vm2347_vm5, %vm2348_vm4  ;;  %v2427_v16 = vand.u32 2147483648, %v2415_v3  ;;  %v2425_v18 = vand.u32 2147483647, %v2415_v3  ;;  %vm2421_vm9 = vweird.f32 %v2415_v3 }
0x117a   : > { %v2344_v4 = vsub.f32 1.0, %v2343_v2 }
0x117b   : > { %v2428_v21 = vor.u32 1.1754944e-38, %v2427_v16  ;;  %vm2426_vm11 = vcmp.eq.f32.partialorder %v2425_v18, 8.507059e+37 }
0x117c   : > { %v2345_v6 = vmul.f32 %v3712_v1, %v2344_v4 }
0x117e   : > { %v2346_v8 = vadd.f32 %v3712_v1, %v2345_v6  ;;  %v3551_v6 = vld [vmem:[%s4826_s6 + $0xf8] sm:$0xff] }
0x117f   : > { %v3714_v9 = vpop.eup %3713 }
0x1180   : > { %v2350_v11 = vsel %vm2349_vm6, %v3712_v1, %v2346_v8  ;;  %v2417_v12 = vmul.f32 %v3714_v9, %v2415_v3  ;;  %vm2422_vm8 = vweird.f32 %v3714_v9  ;;  %v3533_v8 = vld [vmem:[%s4827_s7 + $0x30] sm:$0xff] }
0x1181   : > { %v2355_v13 = vsel %vm2352_vm7, %v2354_v10, %v2350_v11  ;;  %vm2423_vm10 = vmor %vm2421_vm9, %vm2422_vm8  ;;  %v3548_v10 = vld [vmem:[%s4826_s6 + $0xe0] sm:$0xff] }
0x1182   : > { %v2418_v14 = vsub.f32 1.0, %v2417_v12  ;;  %v2356_v15 = vmul.f32 %v3708_v57, %v2355_v13 }
0x1184   : > { %v2419_v17 = vmul.f32 %v3714_v9, %v2418_v14  ;;  %3500 = vmatmul.msk.f32.vlgmr.msrb.gmra.mxu2 %vm799_vm3, %v2356_v15 }
0x1186   : > { %v2420_v20 = vadd.f32 %v3714_v9, %v2419_v17 }
0x1188   : > { %v2424_v22 = vsel %vm2423_vm10, %v3714_v9, %v2420_v20  ;;  %v3549_v9 = vld [vmem:[%s4826_s6 + $0xe8] sm:$0xff] }
0x1189   : > { %v2429_v23 = vsel %vm2426_vm11, %v2428_v21, %v2424_v22 }
0x118a   : > { %v2430_v24 = vmul.f32 %v3710_v42, %v2429_v23 }
0x118c   : > { %3503 = vmatmul.msk.f32.vlgmr.msrb.gmra.mxu0 %vm799_vm3, %v2430_v24  ;;  %3507 = vmatmul.msk.f32.vlgmr.msra.gmra.mxu2 %vm799_vm3, %v4537_v32  ;;  %v3545_v32 = vld [vmem:[%s4825_s5 + $0xf8] sm:$0xff] }
0x1194   : > { %3508 = vmatmul.msk.f32.gmra.mxu2 %vm799_vm3, %v4559_v44  ;;  %3519 = vmatmul.msk.f32.vlgmr.msra.gmra.mxu0 %vm715_vm1, %v4472_v31 }
0x119c   : > { %3520 = vmatmul.msk.f32.gmra.mxu0 %vm715_vm1, %v4481_v36 }
0x1207   : > { %v2377_v33 = vpop.f32.mrf.mxu2 }
0x1208   : > { %3505 = vmatmul.msk.f32.vlgmr.msrb.gmra.mxu1 %vm799_vm3, %v2377_v33 }
0x1209   : > { %v2451_v35 = vpop.f32.mrf.mxu0  ;;  %2824 = vmatpush.msrb.mxu1 %v3545_v32 }
0x120b   : > { %2825 = vmatpush.msrb.mxu1 %v3544_v34 }
0x120d   : > { %2826 = vmatpush.msrb.mxu1 %v3543_v37 }
0x120f   : > { %2827 = vmatpush.msrb.mxu1 %v3542_v38  ;;  %v4649_v50 = vpop.f32.mrf.mxu2 }
0x1210   : > { %3506 = vmatmul.msk.f32.gmra.mxu1 %vm799_vm3, %v2451_v35 }
0x1211   : > { %v2564_v39 = vpop.f32.mrf.mxu0 }
0x1212   : > { %3527 = vmatpush.xpose.msk.msrb.mxu2 %vm799_vm3, %v2564_v39 }
0x1215   : > { %3528 = vmatmul.msk.f32.vlgmr.msrb.gmra.mxu2 %vm799_vm3, %v2536_v40 }
0x1217   : > { %v2511_v52 = vpop.f32.mrf.mxu2 }
0x1218   : > { %3525 = vmatmul.msk.f32.vlgmr.msra.gmra.mxu1 %vm715_vm1, %v4472_v31 }
0x1219   : > { %v2567_v44 = vpop.f32.mrf.mxu0 }
0x121a   : > { %3530 = vmatpush.xpose.msk.msrb.mxu0 %vm799_vm3, %v2567_v44 }
0x121d   : > { %3531 = vmatmul.msk.f32.vlgmr.msrb.gmra.mxu0 %vm799_vm3, %v2539_v48 }
0x121e   : > { %2796 = vmatpush.msra.mxu0 %v3539_v43 }
0x1220   : > { %2797 = vmatpush.msra.mxu0 %v3538_v47  ;;  %3526 = vmatmul.msk.f32.gmra.mxu1 %vm715_vm1, %v4481_v36 }
0x1222   : > { %2798 = vmatpush.msra.mxu0 %v3537_v26 }
0x1224   : > { %2799 = vmatpush.msra.mxu0 %v3536_v49 }
0x1225   : > { %3540 = vmatmul.msk.f32.vlgmr.msra.gmra.mxu0 %vm715_vm1, %v4472_v31 }
0x1228   : > { %3546 = vmatmul.msk.f32.vlgmr.msrb.gmra.mxu1 %vm715_vm1, %v4472_v31 }
0x122d   : > { %3541 = vmatmul.msk.f32.gmra.mxu0 %vm715_vm1, %v4481_v36 }
0x1230   : > { %3547 = vmatmul.msk.f32.gmra.mxu1 %vm715_vm1, %v4481_v36 }
0x1285   : > { %v4651_v51 = vpop.f32.mrf.mxu1 }
0x128d   : > { %v2482_v53 = vpop.f32.mrf.mxu1 }
0x128e   : > { %v4653_v54 = vadd.f32 %v2511_v52, %v2482_v53 }
0x1295   : > { %v2592_v55 = vpop.f32.mrf.mxu1 }
0x1296   : > { %2667 = vmatpush.msra.mxu3 %v2592_v55 }
0x1298   : > { %v2621_v56 = vpop.f32.mrf.mxu2  ;;  %2769 = vmatpush.msrb.mxu3 %v3533_v8 }
0x1299   : > { %v2624_v57 = vmul.f32 %v2621_v56, %v4130_v45  ;;  %v2509_v56 = vadd.f32 %v4649_v50, %v4651_v51 }
0x129a   : > { %v2695_v58 = vpop.f32.mrf.mxu0 }
0x129b   : > { %v2698_v41 = vmul.f32 %v2695_v58, %v4130_v45  ;;  %v2625_v42 = vsel %vm799_vm3, %v2624_v57, -inf }
0x129c   : > { %2626 = vmax.xlane.f32.xlu2 %v2625_v42 }
0x129d   : > { %v2595_v59 = vpop.f32.mrf.mxu1  ;;  %v2699_v60 = vsel %vm799_vm3, %v2698_v41, -inf }
0x129e   : > { %2700 = vmax.xlane.f32.xlu0 %v2699_v60  ;;  %2741 = vmatpush.msra.mxu2 %v2595_v59 }
0x12a0   : > { %2852 = vmatpush.msrb.mxu2 %v3551_v6 }
0x12a2   : > { %2853 = vmatpush.msrb.mxu2 %v3550_v7  ;;  %v2801_v43 = vpop.f32.mrf.mxu0 }
0x12a4   : > { %2854 = vmatpush.msrb.mxu2 %v3549_v9 }
0x12a5   : > { %v2829_v20 = vpop.f32.mrf.mxu1 }
0x12a6   : > { %2855 = vmatpush.msrb.mxu2 %v3548_v10 }
0x12aa   : > { %v2804_v44 = vpop.f32.mrf.mxu0 }
0x12ad   : > { %v2832_v40 = vpop.f32.mrf.mxu1 }
0x130f   : > { %v2627_v46 = vpop.xlane.xlu2 %2626 }
0x1310   : > { %v2628_v61 = vsub.f32 %v2624_v57, %v2627_v46 }
0x1311   : > { %v2701_v62 = vpop.xlane.xlu0 %2700 }
0x1312   : > { %v2629_v63 = vmul.f32 1.442695, %v2628_v61  ;;  %v2702_v0 = vsub.f32 %v2698_v41, %v2701_v62 }
0x1314   : > { %3715 = vpow2.f32 %v2629_v63  ;;  %v2703_v1 = vmul.f32 1.442695, %v2702_v0 }
0x1316   : > { %3717 = vpow2.f32 %v2703_v1 }
0x131a   : > { %v3716_v2 = vpop.eup %3715 }
0x131b   : > { %v2631_v3 = vsel %vm799_vm3, %v3716_v2, 0.0 }
0x131c   : > { %v3718_v4 = vpop.eup %3717  ;;  %2632 = vadd.xlane.f32.xlu1 %v2631_v3 }
0x131d   : > { %v2705_v5 = vsel %vm799_vm3, %v3718_v4, 0.0 }
0x131e   : > { %2706 = vadd.xlane.f32.xlu2 %v2705_v5 }
0x138f   : > { %v2633_v11 = vpop.xlane.xlu1 %2632 }
0x1390   : > { %3719 = vrcp.f32 %v2633_v11  ;;  %v2645_v18 = vand.u32 2147483648, %v2633_v11  ;;  %v2643_v22 = vand.u32 2147483647, %v2633_v11  ;;  %vm2639_vm13 = vweird.f32 %v2633_v11 }
0x1391   : > { %v2707_v12 = vpop.xlane.xlu2 %2706 }
0x1392   : > { %3721 = vrcp.f32 %v2707_v12  ;;  %v2719_v24 = vand.u32 2147483648, %v2707_v12  ;;  %v2717_v28 = vand.u32 2147483647, %v2707_v12  ;;  %v2646_v29 = vor.u32 1.1754944e-38, %v2645_v18 }
0x1393   : > { %vm2644_vm2 = vcmp.eq.f32.partialorder %v2643_v22, 8.507059e+37  ;;  %vm2713_vm4 = vweird.f32 %v2707_v12 }
0x1394   : > { %v2720_v34 = vor.u32 1.1754944e-38, %v2719_v24  ;;  %vm2718_vm6 = vcmp.eq.f32.partialorder %v2717_v28, 8.507059e+37 }
0x1396   : > { %v3720_v13 = vpop.eup %3719 }
0x1397   : > { %v2635_v14 = vmul.f32 %v3720_v13, %v2633_v11  ;;  %vm2640_vm12 = vweird.f32 %v3720_v13 }
0x1398   : > { %v3722_v15 = vpop.eup %3721  ;;  %vm2641_vm15 = vmor %vm2639_vm13, %vm2640_vm12 }
0x1399   : > { %v2636_v16 = vsub.f32 1.0, %v2635_v14  ;;  %v2709_v17 = vmul.f32 %v3722_v15, %v2707_v12  ;;  %vm2714_vm14 = vweird.f32 %v3722_v15 }
0x139a   : > { %vm2715_vm5 = vmor %vm2713_vm4, %vm2714_vm14 }
0x139b   : > { %v2637_v21 = vmul.f32 %v3720_v13, %v2636_v16  ;;  %v2710_v23 = vsub.f32 1.0, %v2709_v17 }
0x139d   : > { %v2638_v25 = vadd.f32 %v3720_v13, %v2637_v21  ;;  %v2711_v27 = vmul.f32 %v3722_v15, %v2710_v23 }
0x139f   : > { %v2642_v30 = vsel %vm2641_vm15, %v3720_v13, %v2638_v25  ;;  %v2712_v32 = vadd.f32 %v3722_v15, %v2711_v27 }
0x13a0   : > { %v2647_v33 = vsel %vm2644_vm2, %v2646_v29, %v2642_v30  ;;  %v3560_v29 = vld [vmem:[%s4827_s7 + $0x38] sm:$0xff] }
0x13a1   : > { %v2716_v35 = vsel %vm2715_vm5, %v3722_v15, %v2712_v32  ;;  %v2648_v37 = vmul.f32 %v3716_v2, %v2647_v33 }
0x13a2   : > { %v2721_v38 = vsel %vm2718_vm6, %v2720_v34, %v2716_v35 }
0x13a3   : > { %v2722_v39 = vmul.f32 %v3718_v4, %v2721_v38  ;;  %3529 = vmatmul.msk.f32.vlgmr.msra.gmra.mxu3 %vm799_vm3, %v2648_v37 }
0x13a4   : > { %3554 = vmatpush.xpose.msk.msra.mxu3 %vm799_vm3, %v2829_v20 }
0x13a5   : > { %3532 = vmatmul.msk.f32.vlgmr.msra.gmra.mxu2 %vm799_vm3, %v2722_v39 }
0x13a6   : > { %3557 = vmatpush.xpose.msk.msra.mxu2 %vm799_vm3, %v2832_v40 }
0x13ad   : > { %3552 = vmatmul.msk.f32.vlgmr.msrb.gmra.mxu2 %vm715_vm1, %v4472_v31 }
0x13b5   : > { %3553 = vmatmul.msk.f32.gmra.mxu2 %vm715_vm1, %v4481_v36 }
0x13bd   : > { %3558 = vmatmul.msk.f32.vlgmr.msra.gmra.mxu2 %vm799_vm3, %v2804_v44 }
0x1426   : > { %v2669_v47 = vpop.f32.mrf.mxu3 }
0x1427   : > { %3534 = vmatmul.msk.f32.vlgmr.msrb.gmra.mxu3 %vm799_vm3, %v2669_v47 }
0x1428   : > { %v2743_v48 = vpop.f32.mrf.mxu2  ;;  %3034 = vmatpush.msrb.mxu3 %v3560_v29 }
0x142f   : > { %3535 = vmatmul.msk.f32.gmra.mxu3 %vm799_vm3, %v2743_v48 }
0x1430   : > { %v2857_v26 = vpop.f32.mrf.mxu2 }
0x1431   : > { %2932 = vmatpush.msrb.mxu0 %v2857_v26 }
0x1437   : > { %3555 = vmatmul.msk.f32.vlgmr.msra.gmra.mxu3 %vm799_vm3, %v2801_v43 }
0x1438   : > { %v2860_v49 = vpop.f32.mrf.mxu2 }
0x1439   : > { %3006 = vmatpush.msrb.mxu2 %v2860_v49 }
0x1440   : > { %v2960_v52 = vpop.f32.mrf.mxu2 }
0x1441   : > { %v2963_v53 = vmul.f32 %v2960_v52, %v4130_v45 }
0x1443   : > { %v2964_v55 = vsel %vm799_vm3, %v2963_v53, -inf }
0x1444   : > { %2965 = vmax.xlane.f32.xlu1 %v2964_v55 }
0x14aa   : > { %v2771_v57 = vpop.f32.mrf.mxu3 }
0x14ab   : > { %v4692_v58 = vadd.f32 %v2771_v57, %v2509_v56  ;;  %v3567_v57 = vld [vmem:[%s4830_s10 + $0x30] sm:$0xff] }
0x14b2   : > { %v2774_v41 = vpop.f32.mrf.mxu3 }
0x14b3   : > { %v4695_v42 = vadd.f32 %v2774_v41, %v4653_v54  ;;  %v3565_v41 = vld [vmem:[%s4830_s10 + $0x20] sm:$0xff] }
0x14b7   : > { %v2966_v59 = vpop.xlane.xlu1 %2965 }
0x14b8   : > { %v2967_v60 = vsub.f32 %v2963_v53, %v2966_v59 }
0x14ba   : > { %v2968_v46 = vmul.f32 1.442695, %v2967_v60  ;;  %v2886_v61 = vpop.f32.mrf.mxu3 }
0x14bb   : > { %v2889_v62 = vmul.f32 %v2886_v61, %v4130_v45  ;;  %v3578_v61 = vld [vmem:[%s4832_s12 + $0x70] sm:$0xff] }
0x14bc   : > { %3723 = vpow2.f32 %v2968_v46  ;;  %v3579_v46 = vld [vmem:[%s4832_s12 + $0x78] sm:$0xff] }
0x14bd   : > { %v2890_v63 = vsel %vm799_vm3, %v2889_v62, -inf  ;;  %3173 = vmatpush.msra.mxu1 %v3579_v46 }
0x14be   : > { %2891 = vmax.xlane.f32.xlu0 %v2890_v63 }
0x14bf   : > { %3174 = vmatpush.msra.mxu1 %v3578_v61 }
0x14c2   : > { %v3724_v0 = vpop.eup %3723 }
0x14c3   : > { %v2970_v50 = vsel %vm799_vm3, %v3724_v0, 0.0 }
0x14c6   : > { %2971 = vadd.xlane.f32.xlu0 %v2970_v50  ;;  %v3576_v50 = vld [vmem:[%s4832_s12 + $0x60] sm:$0xff] }
0x1531   : > { %v2892_v51 = vpop.xlane.xlu0 %2891 }
0x1532   : > { %v2893_v1 = vsub.f32 %v2889_v62, %v2892_v51  ;;  %v3577_v62 = vld [vmem:[%s4832_s12 + $0x68] sm:$0xff] }
0x1533   : > { %3175 = vmatpush.msra.mxu1 %v3577_v62 }
0x1534   : > { %v2894_v2 = vmul.f32 1.442695, %v2893_v1 }
0x1535   : > { %3176 = vmatpush.msra.mxu1 %v3576_v50  ;;  %v3807_v50 = vmov 8.0  }
0x1536   : > { %3725 = vpow2.f32 %v2894_v2  ;;  %v3575_v2 = vld [vmem:[%s4832_s12 + $0x58] sm:$0xff] }
0x1537   : > { %3177 = vmatpush.msra.mxu1 %v3575_v2 }
0x1539   : > { %v2972_v54 = vpop.xlane.xlu0 %2971 }
0x153a   : > { %3727 = vrcp.f32 %v2972_v54  ;;  %v2984_v7 = vand.u32 2147483648, %v2972_v54  ;;  %v2982_v9 = vand.u32 2147483647, %v2972_v54  ;;  %vm2978_vm8 = vweird.f32 %v2972_v54 }
0x153c   : > { %v3726_v3 = vpop.eup %3725  ;;  %v2985_v11 = vor.u32 1.1754944e-38, %v2984_v7  ;;  %vm2983_vm10 = vcmp.eq.f32.partialorder %v2982_v9, 8.507059e+37 }
0x153d   : > { %v2896_v4 = vsel %vm799_vm3, %v3726_v3, 0.0 }
0x153e   : > { %2897 = vadd.xlane.f32.xlu2 %v2896_v4 }
0x1540   : > { %v3728_v5 = vpop.eup %3727 }
0x1541   : > { %v2974_v45 = vmul.f32 %v3728_v5, %v2972_v54  ;;  %vm2979_vm7 = vweird.f32 %v3728_v5 }
0x1542   : > { %vm2980_vm9 = vmor %vm2978_vm8, %vm2979_vm7 }
0x1543   : > { %v2975_v6 = vsub.f32 1.0, %v2974_v45 }
0x1545   : > { %v2976_v8 = vmul.f32 %v3728_v5, %v2975_v6 }
0x1547   : > { %v2977_v10 = vadd.f32 %v3728_v5, %v2976_v8  ;;  %v3649_v8 = vld [vmem:[%s4828_s8 + $0x1] ss:$0 sm:$0xff] }
0x1549   : > { %v2981_v12 = vsel %vm2980_vm9, %v3728_v5, %v2977_v10 }
0x154a   : > { %v2986_v13 = vsel %vm2983_vm10, %v2985_v11, %v2981_v12  ;;  %v3650_v11 = vld [vmem:[%s4829_s9 + $0x1] ss:$0 sm:$0xff] }
0x154b   : > { %v2987_v14 = vmul.f32 %v3724_v0, %v2986_v13 }
0x154d   : > { %3559 = vmatmul.msk.f32.vlgmr.msrb.gmra.mxu2 %vm799_vm3, %v2987_v14 }
0x15b1   : > { %v2898_v15 = vpop.xlane.xlu2 %2897 }
0x15b2   : > { %3729 = vrcp.f32 %v2898_v15  ;;  %v2910_v20 = vand.u32 2147483648, %v2898_v15  ;;  %v2908_v22 = vand.u32 2147483647, %v2898_v15  ;;  %vm2904_vm12 = vweird.f32 %v2898_v15 }
0x15b4   : > { %v2911_v24 = vor.u32 1.1754944e-38, %v2910_v20  ;;  %vm2909_vm14 = vcmp.eq.f32.partialorder %v2908_v22, 8.507059e+37 }
0x15b8   : > { %v3730_v16 = vpop.eup %3729 }
0x15b9   : > { %v2900_v17 = vmul.f32 %v3730_v16, %v2898_v15  ;;  %vm2905_vm11 = vweird.f32 %v3730_v16 }
0x15ba   : > { %vm2906_vm13 = vmor %vm2904_vm12, %vm2905_vm11 }
0x15bb   : > { %v2901_v18 = vsub.f32 1.0, %v2900_v17 }
0x15bd   : > { %v2902_v21 = vmul.f32 %v3730_v16, %v2901_v18 }
0x15bf   : > { %v2903_v23 = vadd.f32 %v3730_v16, %v2902_v21 }
0x15c1   : > { %v2907_v25 = vsel %vm2906_vm13, %v3730_v16, %v2903_v23  ;;  %v3574_v23 = vld [vmem:[%s4832_s12 + $0x50] sm:$0xff]  ;;  %vm3263_vm13 = vcmask 253952  }
0x15c2   : > { %v2912_v27 = vsel %vm2909_vm14, %v2911_v24, %v2907_v25  ;;  %3178 = vmatpush.msra.mxu1 %v3574_v23  ;;  %v3573_v24 = vld [vmem:[%s4832_s12 + $0x48] sm:$0xff]  ;;  %v3572_v25 = vld [vmem:[%s4832_s12 + $0x40] sm:$0xff] }
0x15c3   : > { %v2913_v28 = vmul.f32 %v3726_v3, %v2912_v27  ;;  %v3651_v27 = vld [vmem:[%s4831_s11 + $0x1] ss:$0 sm:$0xff] }
0x15c4   : > { %3179 = vmatpush.msra.mxu1 %v3573_v24 }
0x15c5   : > { %3556 = vmatmul.msk.f32.vlgmr.msrb.gmra.mxu0 %vm799_vm3, %v2913_v28 }
0x15c6   : > { %3180 = vmatpush.msra.mxu1 %v3572_v25 }
0x15d0   : > { %v3008_v32 = vpop.f32.mrf.mxu2 }
0x1642   : > { %v2934_v30 = vpop.f32.mrf.mxu0 }
0x1643   : > { %3561 = vmatmul.msk.f32.vlgmr.msrb.gmra.mxu3 %vm799_vm3, %v2934_v30 }
0x164b   : > { %3562 = vmatmul.msk.f32.gmra.mxu3 %vm799_vm3, %v3008_v32 }
0x16c6   : > { %v3036_v33 = vpop.f32.mrf.mxu3 }
0x16c7   : > { %v3042_v34 = vadd.f32 %v3036_v33, %v4692_v58  ;;  %v3566_v58 = vld [vmem:[%s4830_s10 + $0x28] sm:$0xff] }
0x16c9   : > { %v3044_v35 = vadd.f32 %v3042_v34, %v4472_v31 }
0x16cb   : > { %v3050_v37 = vsel %vm715_vm1, %v3044_v35, 0.0 }
0x16cc   : > { %3051 = vadd.xlane.f32.xlu1 %v3050_v37 }
0x16ce   : > { %v3039_v38 = vpop.f32.mrf.mxu3 }
0x16cf   : > { %v3043_v39 = vadd.f32 %v3039_v38, %v4695_v42 }
0x16d1   : > { %v3045_v40 = vadd.f32 %v3043_v39, %v4481_v36  ;;  %v3568_v36 = vld [vmem:[%s4830_s10 + $0x38] sm:$0xff] }
0x16d2   : > { %3132 = vmatpush.msra.mxu0 %v3568_v36 }
0x16d3   : > { %v3053_v43 = vsel %vm715_vm1, %v3045_v40, 0.0 }
0x16d4   : > { %3054 = vadd.xlane.f32.xlu2 %v3053_v43  ;;  %3133 = vmatpush.msra.mxu0 %v3567_v57 }
0x16d6   : > { %3134 = vmatpush.msra.mxu0 %v3566_v58 }
0x16d8   : > { %3135 = vmatpush.msra.mxu0 %v3565_v41 }
0x173f   : > { %v3052_v44 = vpop.xlane.xlu1 %3051 }
0x1740   : > { %v3056_v47 = vmul.f32 %v3052_v44, %v4341_v19 }
0x1742   : > { %v3058_v48 = vsub.f32 %v3044_v35, %v3056_v47  ;;  %v3652_v35 = vld [vmem:[%s4833_s13 + $0x1] ss:$0 sm:$0xff] }
0x1744   : > { %v3060_v26 = vmul.f32 %v3058_v48, %v3058_v48 }
0x1746   : > { %v3062_v49 = vsel %vm715_vm1, %v3060_v26, 0.0 }
0x1747   : > { %3063 = vadd.xlane.f32.xlu0 %v3062_v49  ;;  %v3055_v31 = vpop.xlane.xlu2 %3054 }
0x1748   : > { %v3057_v52 = vmul.f32 %v3055_v31, %v4341_v19 }
0x174a   : > { %v3059_v53 = vsub.f32 %v3045_v40, %v3057_v52 }
0x174c   : > { %v3061_v55 = vmul.f32 %v3059_v53, %v3059_v53 }
0x174e   : > { %v3065_v56 = vsel %vm715_vm1, %v3061_v55, 0.0 }
0x174f   : > { %3066 = vadd.xlane.f32.xlu1 %v3065_v56 }
0x17ba   : > { %v3064_v42 = vpop.xlane.xlu0 %3063 }
0x17bb   : > { %v3068_v59 = vmul.f32 %v3064_v42, %v4341_v19 }
0x17bd   : > { %v3070_v60 = vadd.f32 1e-05, %v3068_v59 }
0x17bf   : > { %3731 = vrsqrt.f32 %v3070_v60  ;;  %vm3078_vm15 = vweird.f32 %v3070_v60 }
0x17c2   : > { %v3067_v63 = vpop.xlane.xlu1 %3066 }
0x17c3   : > { %v3069_v0 = vmul.f32 %v3067_v63, %v4341_v19 }
0x17c5   : > { %v3732_v51 = vpop.eup %3731  ;;  %v3071_v1 = vadd.f32 1e-05, %v3069_v0 }
0x17c6   : > { %v3073_v54 = vmul.f32 %v3732_v51, %v3070_v60  ;;  %vm3079_vm3 = vweird.f32 %v3732_v51 }
0x17c7   : > { %3733 = vrsqrt.f32 %v3071_v1  ;;  %vm3080_vm2 = vmor %vm3078_vm15, %vm3079_vm3  ;;  %vm3088_vm5 = vweird.f32 %v3071_v1 }
0x17c8   : > { %v3074_v3 = vmul.f32 %v3732_v51, %v3073_v54 }
0x17ca   : > { %v3075_v4 = vmul.f32 0.5, %v3074_v3 }
0x17cc   : > { %v3076_v5 = vsub.f32 1.5, %v3075_v4 }
0x17cd   : > { %v3734_v45 = vpop.eup %3733 }
0x17ce   : > { %v3077_v6 = vmul.f32 %v3732_v51, %v3076_v5  ;;  %v3083_v7 = vmul.f32 %v3734_v45, %v3071_v1  ;;  %vm3089_vm4 = vweird.f32 %v3734_v45  ;;  %v3653_v5 = vld [vmem:[%s4834_s14 + $0x1] ss:$0 sm:$0xff] }
0x17cf   : > { %vm3090_vm6 = vmor %vm3088_vm5, %vm3089_vm4 }
0x17d0   : > { %v3081_v9 = vsel %vm3080_vm2, %v3732_v51, %v3077_v6  ;;  %v3084_v10 = vmul.f32 %v3734_v45, %v3083_v7  ;;  %v3654_v6 = vld [vmem:[%s4835_s15 + $0x1] ss:$0 sm:$0xff] }
0x17d1   : > { %v3092_v12 = vmul.f32 %v3081_v9, %v3058_v48 }
0x17d2   : > { %v3085_v13 = vmul.f32 0.5, %v3084_v10 }
0x17d3   : > { %v3097_v14 = vmul.f32 %v3649_v8, %v3092_v12 }
0x17d4   : > { %v3086_v15 = vsub.f32 1.5, %v3085_v13 }
0x17d5   : > { %v3102_v16 = vadd.f32 %v3650_v11, %v3097_v14 }
0x17d6   : > { %v3087_v17 = vmul.f32 %v3734_v45, %v3086_v15 }
0x17d7   : > { %3570 = vmatmul.msk.f32.vlgmr.msra.gmra.mxu0 %vm715_vm1, %v3102_v16 }
0x17d8   : > { %v3091_v18 = vsel %vm3090_vm6, %v3734_v45, %v3087_v17 }
0x17d9   : > { %v3093_v20 = vmul.f32 %v3091_v18, %v3059_v53 }
0x17db   : > { %v3098_v21 = vmul.f32 %v3649_v8, %v3093_v20 }
0x17dd   : > { %v3103_v22 = vadd.f32 %v3650_v11, %v3098_v21 }
0x17df   : > { %3571 = vmatmul.msk.f32.gmra.mxu0 %vm715_vm1, %v3103_v22 }
0x1854   : > { %v3137_v28 = vpop.f32.mrf.mxu0 }
0x1855   : > { %v3138_v29 = vadd.f32 %v3651_v27, %v3137_v28 }
0x1857   : > { %v3143_v30 = vmax.f32 %v3138_v29, 0.0 }
0x1859   : > { %3581 = vmatmul.msk.f32.vlgmr.msra.gmra.mxu1 %vm1894_vm0, %v3143_v30 }
0x185c   : > { %v3140_v32 = vpop.f32.mrf.mxu0 }
0x185d   : > { %v3141_v33 = vadd.f32 %v3651_v27, %v3140_v32 }
0x185f   : > { %v3144_v34 = vmax.f32 %v3141_v33, 0.0 }
0x1861   : > { %3582 = vmatmul.msk.f32.gmra.mxu1 %vm1894_vm0, %v3144_v34 }
0x18d6   : > { %v3182_v37 = vpop.f32.mrf.mxu1 }
0x18d7   : > { %v3183_v38 = vadd.f32 %v3652_v35, %v3182_v37 }
0x18d9   : > { %v3188_v39 = vadd.f32 %v3183_v38, %v3102_v16 }
0x18db   : > { %v3194_v40 = vsel %vm715_vm1, %v3188_v39, 0.0 }
0x18dc   : > { %3195 = vadd.xlane.f32.xlu2 %v3194_v40 }
0x18de   : > { %v3185_v43 = vpop.f32.mrf.mxu1 }
0x18df   : > { %v3186_v44 = vadd.f32 %v3652_v35, %v3185_v43 }
0x18e1   : > { %v3189_v47 = vadd.f32 %v3186_v44, %v3103_v22 }
0x18e3   : > { %v3197_v48 = vsel %vm715_vm1, %v3189_v47, 0.0 }
0x18e4   : > { %3198 = vadd.xlane.f32.xlu0 %v3197_v48 }
0x194f   : > { %v3196_v26 = vpop.xlane.xlu2 %3195 }
0x1950   : > { %v3200_v49 = vmul.f32 %v3196_v26, %v4341_v19 }
0x1952   : > { %v3202_v31 = vsub.f32 %v3188_v39, %v3200_v49 }
0x1954   : > { %v3204_v52 = vmul.f32 %v3202_v31, %v3202_v31 }
0x1956   : > { %v3206_v53 = vsel %vm715_vm1, %v3204_v52, 0.0 }
0x1957   : > { %v3199_v55 = vpop.xlane.xlu0 %3198  ;;  %3207 = vadd.xlane.f32.xlu1 %v3206_v53 }
0x1958   : > { %v3201_v56 = vmul.f32 %v3199_v55, %v4341_v19 }
0x195a   : > { %v3203_v36 = vsub.f32 %v3189_v47, %v3201_v56 }
0x195c   : > { %v3205_v57 = vmul.f32 %v3203_v36, %v3203_v36 }
0x195e   : > { %v3209_v58 = vsel %vm715_vm1, %v3205_v57, 0.0 }
0x195f   : > { %3210 = vadd.xlane.f32.xlu2 %v3209_v58 }
0x19ca   : > { %v3208_v41 = vpop.xlane.xlu1 %3207 }
0x19cb   : > { %v3212_v42 = vmul.f32 %v3208_v41, %v4341_v19 }
0x19cd   : > { %v3214_v59 = vadd.f32 1e-05, %v3212_v42 }
0x19cf   : > { %3735 = vrsqrt.f32 %v3214_v59  ;;  %vm3222_vm7 = vweird.f32 %v3214_v59 }
0x19d2   : > { %v3211_v60 = vpop.xlane.xlu2 %3210 }
0x19d3   : > { %v3213_v46 = vmul.f32 %v3211_v60, %v4341_v19 }
0x19d5   : > { %v3736_v61 = vpop.eup %3735  ;;  %v3215_v62 = vadd.f32 1e-05, %v3213_v46 }
0x19d6   : > { %v3217_v63 = vmul.f32 %v3736_v61, %v3214_v59  ;;  %vm3223_vm0 = vweird.f32 %v3736_v61 }
0x19d7   : > { %3737 = vrsqrt.f32 %v3215_v62  ;;  %vm3224_vm8 = vmor %vm3222_vm7, %vm3223_vm0  ;;  %vm3232_vm10 = vweird.f32 %v3215_v62 }
0x19d8   : > { %v3218_v0 = vmul.f32 %v3736_v61, %v3217_v63  ;;  %3739 = vrcp.f32 %v3807_v50 }
0x19da   : > { %v3219_v51 = vmul.f32 0.5, %v3218_v0 }
0x19dc   : > { %v3220_v1 = vsub.f32 1.5, %v3219_v51 }
0x19dd   : > { %v3738_v2 = vpop.eup %3737 }
0x19de   : > { %v3740_v54 = vpop.eup %3739  ;;  %v3221_v3 = vmul.f32 %v3736_v61, %v3220_v1  ;;  %v3227_v4 = vmul.f32 %v3738_v2, %v3215_v62  ;;  %vm3233_vm9 = vweird.f32 %v3738_v2 }
0x19df   : > { %v3256_v8 = vmul.f32 8.0, %v3740_v54  ;;  %vm3234_vm11 = vmor %vm3232_vm10, %vm3233_vm9  ;;  %vm3260_vm12 = vweird.f32 %v3740_v54 }
0x19e0   : > { %v3225_v19 = vsel %vm3224_vm8, %v3736_v61, %v3221_v3  ;;  %v3228_v45 = vmul.f32 %v3738_v2, %v3227_v4 }
0x19e1   : > { %v3236_v7 = vmul.f32 %v3225_v19, %v3202_v31  ;;  %v3257_v13 = vsub.f32 1.0, %v3256_v8 }
0x19e2   : > { %v3229_v9 = vmul.f32 0.5, %v3228_v45 }
0x19e3   : > { %v3241_v10 = vmul.f32 %v3653_v5, %v3236_v7  ;;  %v3258_v20 = vmul.f32 %v3740_v54, %v3257_v13 }
0x19e4   : > { %v3230_v11 = vsub.f32 1.5, %v3229_v9 }
0x19e5   : > { %v3246_v12 = vadd.f32 %v3654_v6, %v3241_v10  ;;  %v3259_v25 = vadd.f32 %v3740_v54, %v3258_v20 }
0x19e6   : > { %v3231_v14 = vmul.f32 %v3738_v2, %v3230_v11 }
0x19e7   : > { %v3248_v15 = vsel %vm715_vm1, %v3246_v12, 0.0  ;;  %v3261_v32 = vsel %vm3260_vm12, %v3740_v54, %v3259_v25 }
0x19e8   : > { %v3249_v16 = vrot.slane %v3248_v15, 4  ;;  %v3235_v17 = vsel %vm3234_vm11, %v3738_v2, %v3231_v14 }
0x19e9   : > { %v3237_v18 = vmul.f32 %v3235_v17, %v3203_v36 }
0x19ea   : > { %v3250_v21 = vadd.f32 %v3249_v16, %v3248_v15 }
0x19eb   : > { %v3242_v22 = vmul.f32 %v3653_v5, %v3237_v18 }
0x19ec   : > { %v3251_v23 = vrot.slane %v3250_v21, 2 }
0x19ed   : > { %v3247_v24 = vadd.f32 %v3654_v6, %v3242_v22 }
0x19ee   : > { %v3252_v27 = vadd.f32 %v3251_v23, %v3250_v21 }
0x19ef   : > { %v3265_v28 = vsel %vm715_vm1, %v3247_v24, 0.0 }
0x19f0   : > { %v3266_v29 = vrot.slane %v3265_v28, 4  ;;  %v3253_v30 = vrot.slane %v3252_v27, 1 }
0x19f2   : > { %v3254_v33 = vadd.f32 %v3253_v30, %v3252_v27  ;;  %v3267_v34 = vadd.f32 %v3266_v29, %v3265_v28 }
0x19f4   : > { %v3262_v35 = vmul.f32 %v3261_v32, %v3254_v33  ;;  %v3268_v37 = vrot.slane %v3267_v34, 2 }
0x19f6   : > { %3264 = vst.msk [vmem:[%s517_s20] sm:$0x1] %vm3263_vm13, %v3262_v35  ;;  %v3269_v38 = vadd.f32 %v3268_v37, %v3267_v34 }
0x19f8   : > { %v3270_v39 = vrot.slane %v3269_v38, 1 }
0x19fa   : > { %v3271_v40 = vadd.f32 %v3270_v39, %v3269_v38 }
0x19fc   : > { %v3272_v43 = vmul.f32 %v3271_v40, %v3261_v32 }
0x19fe   : > { %3273 = vst.msk [vmem:[%s517_s20 + $0x1] sm:$0x1] %vm3263_vm13, %v3272_v43 }
0x19ff   : > { %3768 = shalt.err (!%p3765_p3)
}
0x1a00   : > { %3600 = dma.vmem_to_hbm [thread:$0]  (%p3928_p5), %s3288_s16, 32, %s3290_s28, %s3275_s17  }
0x1a01 PF: > { %s4859_s18 = sld [smem:[#allocation7_spill]] }
0x1a02   : > { %s4860_s20 = sld [smem:[#allocation5_spill]] }
0x1a07   : > { %p3606_p4 = scmp.ge.s32.totalorder %s4859_s18, 2 }
0x1a08   : > { %s3301_s24 = sand.u32 1, %s4860_s20  }
0x1a09   : > { %p3603_p7 = pnand %p3606_p4, %p3932_p6  ;;  %s3302_s1 = scalar_lea.sflag [#allocation3], %s3301_s24 }
0x1a0b   : > { %p3604_p8 = pneg %p3603_p7 }
0x1a0d   : > { %3786 = dma.done.wait (%p3604_p8), %s3302_s1, 32  }
0x1a0e   : > { %3788 = vsyncadd (%p3604_p8), %s3302_s1, 4294967264  ;;  %s4862_s24 = sld [smem:[#allocation8_spill]]  ;;  %s4865_s21 = smov %s3795_s22 }
0x1a0f   : > { %s4863_s29 = sld [smem:[#allocation6_spill]] }
0x1a10   : > { %s4864_s23 = sld [smem:[#allocation9_spill]] }
0x1a14   : > { %p26_p9 = scmp.ge.s32.totalorder %s4862_s24, 4  }
0x1a15   : > { %s4866_s22 = smov %s4863_s29 }
0x1a16   :  { %28 = sbr.rel (!%p26_p9) target bundleno = 7 (0x7), region = 155 }
0x1a1b   :  { %3308 = vsyncpa [#allocation3], 1 }
0x1a1c   :  { %3310 = vsyncpa [#allocation3 + $0x1], 1 }

</bundles_post_ra>
